<compile_context>
chip_gen: v7x
topology: tpu7x:2x2x1
jax: 0.10.0
libtpu: 0.0.40
codegen_flags: <defaults>
</compile_context>

<pallas_src>
import functools

import jax
import jax.numpy as jnp
from jax import lax
from jax.experimental import pallas as pl
from jax.experimental.pallas import tpu as pltpu


# ----------------------------- Fused Pallas kernel -----------------------------

def _wrn_basic_block_kernel(x_ref, s1_ref, b1_ref, w1_ref, s2_ref, b2_ref,
                            w2_ref, *rest, H, W, Cin, Cout, stride, identity):
    """One grid step == one image of the batch; everything stays in VMEM."""
    if identity:
        o_ref, p1_ref, p2_ref = rest
        ws_ref = None
    else:
        ws_ref, o_ref, p1_ref, p2_ref = rest

    Ho = (H - 1) // stride + 1
    Wo = (W - 1) // stride + 1

    # ---- bn1 + relu (folded per-channel affine), NHWC tile ----
    x = x_ref[0]                                              # (H, W, Cin)
    act = jnp.maximum(x * s1_ref[...] + b1_ref[...], 0.0)     # relu(bn1(x))

    # ---- zero padding done on-chip: VMEM scratch, interior overwritten ----
    p1_ref[...] = jnp.zeros_like(p1_ref)
    p1_ref[1:H + 1, 1:W + 1, :] = act
    xp = p1_ref[...]                                          # (H+2, W+2, Cin)

    # ---- conv1: 3x3 / stride as ONE im2col matmul (K = 9*Cin) ----
    sh = stride * (Ho - 1) + 1
    sw = stride * (Wo - 1) + 1
    taps = [xp[ky:ky + sh:stride, kx:kx + sw:stride, :].reshape(Ho * Wo, Cin)
            for ky in range(3) for kx in range(3)]
    col = jnp.concatenate(taps, axis=-1)                      # (Ho*Wo, 9*Cin)
    h = jnp.dot(col, w1_ref[...], preferred_element_type=jnp.float32)

    # ---- bn2 + relu ----
    h = jnp.maximum(h * s2_ref[...] + b2_ref[...], 0.0)       # (Ho*Wo, Cout)

    # ---- conv2: 3x3 / 1, same single-matmul scheme (K = 9*Cout) ----
    p2_ref[...] = jnp.zeros_like(p2_ref)
    p2_ref[1:Ho + 1, 1:Wo + 1, :] = h.reshape(Ho, Wo, Cout)
    hp = p2_ref[...]                                          # (Ho+2, Wo+2, Cout)
    taps2 = [hp[ky:ky + Ho, kx:kx + Wo, :].reshape(Ho * Wo, Cout)
             for ky in range(3) for kx in range(3)]
    col2 = jnp.concatenate(taps2, axis=-1)                    # (Ho*Wo, 9*Cout)
    out = jnp.dot(col2, w2_ref[...], preferred_element_type=jnp.float32)

    # ---- residual (identity on raw x, or fused 1x1 projection of act) ----
    if identity:
        res = x.reshape(H * W, Cin)
    else:
        act_s = act[::stride, ::stride, :].reshape(Ho * Wo, Cin)
        res = jnp.dot(act_s, ws_ref[...], preferred_element_type=jnp.float32)

    o_ref[0] = (out + res).reshape(Ho, Wo, Cout).astype(o_ref.dtype)


# ----------------------------- Pallas wrapper -----------------------------

def wrn_basic_block(x, p, stride):
    """x: (N, H, W, Cin) NHWC.  Returns (N, Ho, Wo, Cout)."""
    N, H, W, Cin = x.shape
    Cout = p['w1k'].shape[-1]
    Ho = (H - 1) // stride + 1
    Wo = (W - 1) // stride + 1
    identity = (Cin == Cout) and (stride == 1)

    kern = functools.partial(_wrn_basic_block_kernel, H=H, W=W, Cin=Cin,
                             Cout=Cout, stride=stride, identity=identity)

    # Weights / BN params: constant index_map -> fetched once, resident in VMEM.
    in_specs = [
        pl.BlockSpec((1, H, W, Cin), lambda n: (n, 0, 0, 0)),
        pl.BlockSpec((1, Cin), lambda n: (0, 0)),
        pl.BlockSpec((1, Cin), lambda n: (0, 0)),
        pl.BlockSpec((9 * Cin, Cout), lambda n: (0, 0)),
        pl.BlockSpec((1, Cout), lambda n: (0, 0)),
        pl.BlockSpec((1, Cout), lambda n: (0, 0)),
        pl.BlockSpec((9 * Cout, Cout), lambda n: (0, 0)),
    ]
    args = [x, p['bn1_scale'], p['bn1_shift'], p['w1k'],
            p['bn2_scale'], p['bn2_shift'], p['w2k']]
    if not identity:
        in_specs.append(pl.BlockSpec((Cin, Cout), lambda n: (0, 0)))
        args.append(p['wsk'])

    return pl.pallas_call(
        kern,
        out_shape=jax.ShapeDtypeStruct((N, Ho, Wo, Cout), x.dtype),
        grid=(N,),
        in_specs=in_specs,
        out_specs=pl.BlockSpec((1, Ho, Wo, Cout), lambda n: (n, 0, 0, 0)),
        scratch_shapes=[pltpu.VMEM((H + 2, W + 2, Cin), jnp.float32),
                        pltpu.VMEM((Ho + 2, Wo + 2, Cout), jnp.float32)],
        compiler_params=pltpu.CompilerParams(
            dimension_semantics=("parallel",),
            vmem_limit_bytes=32 * 1024 * 1024),
    )(*args)


def wrn_network_block_forward(x_nchw, layer_params, stride):
    # NCHW at the PyTorch boundary; NHWC inside.  Only ONE transpose pair for
    # the whole network block (not per layer / per op).
    x = jnp.transpose(x_nchw, (0, 2, 3, 1))
    for i, p in enumerate(layer_params):
        x = wrn_basic_block(x, p, stride if i == 0 else 1)
    return jnp.transpose(x, (0, 3, 1, 2))


# ----------------------------- Parameter init -----------------------------

def make_layer_params(key, in_c, out_c, stride, eps):
    keys = jax.random.split(key, 5)

    def bn_fold(k, c):
        k1, k2, k3, k4 = jax.random.split(k, 4)
        gamma = jax.random.uniform(k1, (c,), minval=0.5, maxval=1.5)
        beta = 0.1 * jax.random.normal(k2, (c,))
        rmean = 0.1 * jax.random.normal(k3, (c,))
        rvar = jax.random.uniform(k4, (c,), minval=0.5, maxval=1.5)
        scale = gamma / jnp.sqrt(rvar + eps)
        shift = beta - rmean * scale
        return scale.astype(jnp.float32), shift.astype(jnp.float32)

    p = {}
    s1, b1 = bn_fold(keys[0], in_c)
    s2, b2 = bn_fold(keys[1], out_c)
    p['bn1_scale'] = s1.reshape(1, in_c)
    p['bn1_shift'] = b1.reshape(1, in_c)
    p['bn2_scale'] = s2.reshape(1, out_c)
    p['bn2_shift'] = b2.reshape(1, out_c)

    w1 = (jax.random.normal(keys[2], (3, 3, in_c, out_c)) *
          (2.0 / (9 * in_c)) ** 0.5).astype(jnp.float32)          # HWIO
    w2 = (jax.random.normal(keys[3], (3, 3, out_c, out_c)) *
          (2.0 / (9 * out_c)) ** 0.5).astype(jnp.float32)
    p['w1_hwio'] = w1
    p['w2_hwio'] = w2
    # im2col weight layout: row index = (ky*3 + kx)*Cin + ci  (matches HWIO flatten)
    p['w1k'] = w1.reshape(9 * in_c, out_c)
    p['w2k'] = w2.reshape(9 * out_c, out_c)
    if not ((in_c == out_c) and (stride == 1)):
        p['wsk'] = (jax.random.normal(keys[4], (in_c, out_c)) *
                    (1.0 / in_c) ** 0.5).astype(jnp.float32)
    return p


# ----------------------------- Pure-JAX reference -----------------------------

def _ref_basic_block(x, p, stride):
    in_c = x.shape[-1]
    out_c = p['w1_hwio'].shape[-1]
    identity = (in_c == out_c) and (stride == 1)
    s1 = p['bn1_scale'].reshape(1, 1, 1, in_c)
    b1 = p['bn1_shift'].reshape(1, 1, 1, in_c)
    s2 = p['bn2_scale'].reshape(1, 1, 1, out_c)
    b2 = p['bn2_shift'].reshape(1, 1, 1, out_c)
    act = jnp.maximum(x * s1 + b1, 0.0)
    h = lax.conv_general_dilated(act, p['w1_hwio'], (stride, stride),
                                 ((1, 1), (1, 1)),
                                 dimension_numbers=('NHWC', 'HWIO', 'NHWC'),
                                 precision=lax.Precision.HIGHEST)
    h = jnp.maximum(h * s2 + b2, 0.0)
    if identity:
        res = x
    else:
        res = jnp.einsum('nhwc,cd->nhwd', act[:, ::stride, ::stride, :],
                         p['wsk'], precision=lax.Precision.HIGHEST)
    out = lax.conv_general_dilated(h, p['w2_hwio'], (1, 1), ((1, 1), (1, 1)),
                                   dimension_numbers=('NHWC', 'HWIO', 'NHWC'),
                                   precision=lax.Precision.HIGHEST)
    return out + res


# ----------------------------- Main -----------------------------

if __name__ == "__main__":
    # WRNNetworkBlock(nb_layers=2, in_planes=4, out_planes=8,
    #                 block_type=WRNBasicBlock, batchnorm=1e-5,
    #                 stride=1, is_transposed=False)
    nb_layers, in_planes, out_planes, stride, eps = 2, 4, 8, 1, 1e-5
    N, H, W = 2, 16, 16

    key = jax.random.PRNGKey(0)
    kx, kp = jax.random.split(key)
    x_nchw = jax.random.normal(kx, (N, in_planes, H, W), dtype=jnp.float32)

    layer_keys = jax.random.split(kp, nb_layers)
    layer_params = [make_layer_params(layer_keys[i],
                                      in_planes if i == 0 else out_planes,
                                      out_planes,
                                      stride if i == 0 else 1,
                                      eps)
                    for i in range(nb_layers)]

    out = wrn_network_block_forward(x_nchw, layer_params, stride)
    out = jax.block_until_ready(out)

    # Sanity check against a pure-JAX (lax.conv) reference.
    xr = jnp.transpose(x_nchw, (0, 2, 3, 1))
    for i, p in enumerate(layer_params):
        xr = _ref_basic_block(xr, p, stride if i == 0 else 1)
    ref = jnp.transpose(xr, (0, 3, 1, 2))

    assert out.shape == (N, out_planes, H, W), out.shape
    assert jnp.allclose(out, ref, atol=1e-3, rtol=1e-3), \
        float(jnp.max(jnp.abs(out - ref)))
    print("KERNEL_OK")
</pallas_src>

<mosaic_0001>
module attributes {stable_mosaic.version = 11 : i64} {
  func.func @_wrn_basic_block_kernel(%arg0: i32, %arg1: memref<1x16x16x4xf32, #tpu.memory_space<vmem>>, %arg2: memref<1x4xf32, #tpu.memory_space<vmem>>, %arg3: memref<1x4xf32, #tpu.memory_space<vmem>>, %arg4: memref<36x8xf32, #tpu.memory_space<vmem>>, %arg5: memref<1x8xf32, #tpu.memory_space<vmem>>, %arg6: memref<1x8xf32, #tpu.memory_space<vmem>>, %arg7: memref<72x8xf32, #tpu.memory_space<vmem>>, %arg8: memref<4x8xf32, #tpu.memory_space<vmem>>, %arg9: memref<1x16x16x8xf32, #tpu.memory_space<vmem>>, %arg10: memref<18x18x4xf32, #tpu.memory_space<vmem>>, %arg11: memref<18x18x8xf32, #tpu.memory_space<vmem>>) attributes {dimension_semantics = [#tpu.dimension_semantics<parallel>], iteration_bounds = array<i64: 2>, scalar_prefetch = 0 : i64, scratch_operands = 2 : i64, tpu.core_type = #tpu.core_type<tc>, window_params = [{transform_indices = @transform_0, window_bounds = array<i64: 1, 16, 16, 4>}, {pipeline_mode = #tpu.pipeline_mode<synchronous>, transform_indices = @transform_1, window_bounds = array<i64: 1, 4>}, {pipeline_mode = #tpu.pipeline_mode<synchronous>, transform_indices = @transform_2, window_bounds = array<i64: 1, 4>}, {pipeline_mode = #tpu.pipeline_mode<synchronous>, transform_indices = @transform_3, window_bounds = array<i64: 36, 8>}, {pipeline_mode = #tpu.pipeline_mode<synchronous>, transform_indices = @transform_4, window_bounds = array<i64: 1, 8>}, {pipeline_mode = #tpu.pipeline_mode<synchronous>, transform_indices = @transform_5, window_bounds = array<i64: 1, 8>}, {pipeline_mode = #tpu.pipeline_mode<synchronous>, transform_indices = @transform_6, window_bounds = array<i64: 72, 8>}, {pipeline_mode = #tpu.pipeline_mode<synchronous>, transform_indices = @transform_7, window_bounds = array<i64: 4, 8>}, {transform_indices = @transform_8, window_bounds = array<i64: 1, 16, 16, 8>}]} {
    %c0 = arith.constant 0 : index
    %c0_0 = arith.constant 0 : index
    %c0_1 = arith.constant 0 : index
    %c0_2 = arith.constant 0 : index
    %0 = vector.load %arg1[%c0, %c0_0, %c0_1, %c0_2] : memref<1x16x16x4xf32, #tpu.memory_space<vmem>>, vector<1x16x16x4xf32>
    %1 = vector.shape_cast %0 : vector<1x16x16x4xf32> to vector<16x16x4xf32>
    %c0_3 = arith.constant 0 : index
    %c0_4 = arith.constant 0 : index
    %2 = vector.load %arg2[%c0_3, %c0_4] : memref<1x4xf32, #tpu.memory_space<vmem>>, vector<1x4xf32>
    %3 = vector.shape_cast %2 : vector<1x4xf32> to vector<1x1x4xf32>
    %4 = vector.broadcast %3 : vector<1x1x4xf32> to vector<16x16x4xf32>
    %5 = arith.mulf %1, %4 : vector<16x16x4xf32>
    %c0_5 = arith.constant 0 : index
    %c0_6 = arith.constant 0 : index
    %6 = vector.load %arg3[%c0_5, %c0_6] : memref<1x4xf32, #tpu.memory_space<vmem>>, vector<1x4xf32>
    %7 = vector.shape_cast %6 : vector<1x4xf32> to vector<1x1x4xf32>
    %8 = vector.broadcast %7 : vector<1x1x4xf32> to vector<16x16x4xf32>
    %9 = arith.addf %5, %8 : vector<16x16x4xf32>
    %cst = arith.constant 0.000000e+00 : f32
    %10 = vector.broadcast %cst : f32 to vector<16x16x4xf32>
    %11 = arith.maximumf %9, %10 : vector<16x16x4xf32>
    %cst_7 = arith.constant 0.000000e+00 : f32
    %12 = vector.broadcast %cst_7 : f32 to vector<18x18x4xf32>
    %c0_8 = arith.constant 0 : index
    %c0_9 = arith.constant 0 : index
    %c0_10 = arith.constant 0 : index
    %13 = vector.load %arg10[%c0_8, %c0_9, %c0_10] : memref<18x18x4xf32, #tpu.memory_space<vmem>>, vector<18x18x4xf32>
    tpu.vector_store %arg10[%c0_8, %c0_9, %c0_10], %12 {strides = array<i32>} : memref<18x18x4xf32, #tpu.memory_space<vmem>>, vector<18x18x4xf32>,
    %c1 = arith.constant 1 : index
    %c1_11 = arith.constant 1 : index
    %c0_12 = arith.constant 0 : index
    %14 = vector.load %arg10[%c1, %c1_11, %c0_12] : memref<18x18x4xf32, #tpu.memory_space<vmem>>, vector<16x16x4xf32>
    tpu.vector_store %arg10[%c1, %c1_11, %c0_12], %11 {strides = array<i32>} : memref<18x18x4xf32, #tpu.memory_space<vmem>>, vector<16x16x4xf32>,
    %c0_13 = arith.constant 0 : index
    %c0_14 = arith.constant 0 : index
    %c0_15 = arith.constant 0 : index
    %15 = vector.load %arg10[%c0_13, %c0_14, %c0_15] : memref<18x18x4xf32, #tpu.memory_space<vmem>>, vector<18x18x4xf32>
    %16 = vector.extract_strided_slice %15 {offsets = [0, 0, 0], sizes = [16, 16, 4], strides = [1, 1, 1]} : vector<18x18x4xf32> to vector<16x16x4xf32>
    %17 = vector.shape_cast %16 : vector<16x16x4xf32> to vector<256x4xf32>
    %18 = vector.extract_strided_slice %15 {offsets = [0, 1, 0], sizes = [16, 16, 4], strides = [1, 1, 1]} : vector<18x18x4xf32> to vector<16x16x4xf32>
    %19 = vector.shape_cast %18 : vector<16x16x4xf32> to vector<256x4xf32>
    %20 = vector.extract_strided_slice %15 {offsets = [0, 2, 0], sizes = [16, 16, 4], strides = [1, 1, 1]} : vector<18x18x4xf32> to vector<16x16x4xf32>
    %21 = vector.shape_cast %20 : vector<16x16x4xf32> to vector<256x4xf32>
    %22 = vector.extract_strided_slice %15 {offsets = [1, 0, 0], sizes = [16, 16, 4], strides = [1, 1, 1]} : vector<18x18x4xf32> to vector<16x16x4xf32>
    %23 = vector.shape_cast %22 : vector<16x16x4xf32> to vector<256x4xf32>
    %24 = vector.extract_strided_slice %15 {offsets = [1, 1, 0], sizes = [16, 16, 4], strides = [1, 1, 1]} : vector<18x18x4xf32> to vector<16x16x4xf32>
    %25 = vector.shape_cast %24 : vector<16x16x4xf32> to vector<256x4xf32>
    %26 = vector.extract_strided_slice %15 {offsets = [1, 2, 0], sizes = [16, 16, 4], strides = [1, 1, 1]} : vector<18x18x4xf32> to vector<16x16x4xf32>
    %27 = vector.shape_cast %26 : vector<16x16x4xf32> to vector<256x4xf32>
    %28 = vector.extract_strided_slice %15 {offsets = [2, 0, 0], sizes = [16, 16, 4], strides = [1, 1, 1]} : vector<18x18x4xf32> to vector<16x16x4xf32>
    %29 = vector.shape_cast %28 : vector<16x16x4xf32> to vector<256x4xf32>
    %30 = vector.extract_strided_slice %15 {offsets = [2, 1, 0], sizes = [16, 16, 4], strides = [1, 1, 1]} : vector<18x18x4xf32> to vector<16x16x4xf32>
    %31 = vector.shape_cast %30 : vector<16x16x4xf32> to vector<256x4xf32>
    %32 = vector.extract_strided_slice %15 {offsets = [2, 2, 0], sizes = [16, 16, 4], strides = [1, 1, 1]} : vector<18x18x4xf32> to vector<16x16x4xf32>
    %33 = vector.shape_cast %32 : vector<16x16x4xf32> to vector<256x4xf32>
    %34 = tpu.concatenate %17, %19, %21, %23, %25, %27, %29, %31, %33 in 1 : vector<256x4xf32>, vector<256x4xf32>, vector<256x4xf32>, vector<256x4xf32>, vector<256x4xf32>, vector<256x4xf32>, vector<256x4xf32>, vector<256x4xf32>, vector<256x4xf32> -> vector<256x36xf32>
    %c0_16 = arith.constant 0 : index
    %c0_17 = arith.constant 0 : index
    %35 = vector.load %arg4[%c0_16, %c0_17] : memref<36x8xf32, #tpu.memory_space<vmem>>, vector<36x8xf32>
    %cst_18 = arith.constant dense<0.000000e+00> : vector<256x8xf32>
    %36 = tpu.matmul %34, %35, %cst_18 {dimension_numbers = #tpu.dot_dimension_numbers<[1], [0], [0], [1], [0, 0, 1, 1], [], []>} : vector<256x36xf32>, vector<36x8xf32>, vector<256x8xf32> -> vector<256x8xf32>
    %c0_19 = arith.constant 0 : index
    %c0_20 = arith.constant 0 : index
    %37 = vector.load %arg5[%c0_19, %c0_20] : memref<1x8xf32, #tpu.memory_space<vmem>>, vector<1x8xf32>
    %38 = vector.broadcast %37 : vector<1x8xf32> to vector<256x8xf32>
    %39 = arith.mulf %36, %38 : vector<256x8xf32>
    %c0_21 = arith.constant 0 : index
    %c0_22 = arith.constant 0 : index
    %40 = vector.load %arg6[%c0_21, %c0_22] : memref<1x8xf32, #tpu.memory_space<vmem>>, vector<1x8xf32>
    %41 = vector.broadcast %40 : vector<1x8xf32> to vector<256x8xf32>
    %42 = arith.addf %39, %41 : vector<256x8xf32>
    %cst_23 = arith.constant 0.000000e+00 : f32
    %43 = vector.broadcast %cst_23 : f32 to vector<256x8xf32>
    %44 = arith.maximumf %42, %43 : vector<256x8xf32>
    %cst_24 = arith.constant 0.000000e+00 : f32
    %45 = vector.broadcast %cst_24 : f32 to vector<18x18x8xf32>
    %c0_25 = arith.constant 0 : index
    %c0_26 = arith.constant 0 : index
    %c0_27 = arith.constant 0 : index
    %46 = vector.load %arg11[%c0_25, %c0_26, %c0_27] : memref<18x18x8xf32, #tpu.memory_space<vmem>>, vector<18x18x8xf32>
    tpu.vector_store %arg11[%c0_25, %c0_26, %c0_27], %45 {strides = array<i32>} : memref<18x18x8xf32, #tpu.memory_space<vmem>>, vector<18x18x8xf32>,
    %47 = vector.shape_cast %44 : vector<256x8xf32> to vector<16x16x8xf32>
    %c1_28 = arith.constant 1 : index
    %c1_29 = arith.constant 1 : index
    %c0_30 = arith.constant 0 : index
    %48 = vector.load %arg11[%c1_28, %c1_29, %c0_30] : memref<18x18x8xf32, #tpu.memory_space<vmem>>, vector<16x16x8xf32>
    tpu.vector_store %arg11[%c1_28, %c1_29, %c0_30], %47 {strides = array<i32>} : memref<18x18x8xf32, #tpu.memory_space<vmem>>, vector<16x16x8xf32>,
    %c0_31 = arith.constant 0 : index
    %c0_32 = arith.constant 0 : index
    %c0_33 = arith.constant 0 : index
    %49 = vector.load %arg11[%c0_31, %c0_32, %c0_33] : memref<18x18x8xf32, #tpu.memory_space<vmem>>, vector<18x18x8xf32>
    %50 = vector.extract_strided_slice %49 {offsets = [0, 0, 0], sizes = [16, 16, 8], strides = [1, 1, 1]} : vector<18x18x8xf32> to vector<16x16x8xf32>
    %51 = vector.shape_cast %50 : vector<16x16x8xf32> to vector<256x8xf32>
    %52 = vector.extract_strided_slice %49 {offsets = [0, 1, 0], sizes = [16, 16, 8], strides = [1, 1, 1]} : vector<18x18x8xf32> to vector<16x16x8xf32>
    %53 = vector.shape_cast %52 : vector<16x16x8xf32> to vector<256x8xf32>
    %54 = vector.extract_strided_slice %49 {offsets = [0, 2, 0], sizes = [16, 16, 8], strides = [1, 1, 1]} : vector<18x18x8xf32> to vector<16x16x8xf32>
    %55 = vector.shape_cast %54 : vector<16x16x8xf32> to vector<256x8xf32>
    %56 = vector.extract_strided_slice %49 {offsets = [1, 0, 0], sizes = [16, 16, 8], strides = [1, 1, 1]} : vector<18x18x8xf32> to vector<16x16x8xf32>
    %57 = vector.shape_cast %56 : vector<16x16x8xf32> to vector<256x8xf32>
    %58 = vector.extract_strided_slice %49 {offsets = [1, 1, 0], sizes = [16, 16, 8], strides = [1, 1, 1]} : vector<18x18x8xf32> to vector<16x16x8xf32>
    %59 = vector.shape_cast %58 : vector<16x16x8xf32> to vector<256x8xf32>
    %60 = vector.extract_strided_slice %49 {offsets = [1, 2, 0], sizes = [16, 16, 8], strides = [1, 1, 1]} : vector<18x18x8xf32> to vector<16x16x8xf32>
    %61 = vector.shape_cast %60 : vector<16x16x8xf32> to vector<256x8xf32>
    %62 = vector.extract_strided_slice %49 {offsets = [2, 0, 0], sizes = [16, 16, 8], strides = [1, 1, 1]} : vector<18x18x8xf32> to vector<16x16x8xf32>
    %63 = vector.shape_cast %62 : vector<16x16x8xf32> to vector<256x8xf32>
    %64 = vector.extract_strided_slice %49 {offsets = [2, 1, 0], sizes = [16, 16, 8], strides = [1, 1, 1]} : vector<18x18x8xf32> to vector<16x16x8xf32>
    %65 = vector.shape_cast %64 : vector<16x16x8xf32> to vector<256x8xf32>
    %66 = vector.extract_strided_slice %49 {offsets = [2, 2, 0], sizes = [16, 16, 8], strides = [1, 1, 1]} : vector<18x18x8xf32> to vector<16x16x8xf32>
    %67 = vector.shape_cast %66 : vector<16x16x8xf32> to vector<256x8xf32>
    %68 = tpu.concatenate %51, %53, %55, %57, %59, %61, %63, %65, %67 in 1 : vector<256x8xf32>, vector<256x8xf32>, vector<256x8xf32>, vector<256x8xf32>, vector<256x8xf32>, vector<256x8xf32>, vector<256x8xf32>, vector<256x8xf32>, vector<256x8xf32> -> vector<256x72xf32>
    %c0_34 = arith.constant 0 : index
    %c0_35 = arith.constant 0 : index
    %69 = vector.load %arg7[%c0_34, %c0_35] : memref<72x8xf32, #tpu.memory_space<vmem>>, vector<72x8xf32>
    %cst_36 = arith.constant dense<0.000000e+00> : vector<256x8xf32>
    %70 = tpu.matmul %68, %69, %cst_36 {dimension_numbers = #tpu.dot_dimension_numbers<[1], [0], [0], [1], [0, 0, 1, 1], [], []>} : vector<256x72xf32>, vector<72x8xf32>, vector<256x8xf32> -> vector<256x8xf32>
    %71 = vector.shape_cast %11 : vector<16x16x4xf32> to vector<256x4xf32>
    %c0_37 = arith.constant 0 : index
    %c0_38 = arith.constant 0 : index
    %72 = vector.load %arg8[%c0_37, %c0_38] : memref<4x8xf32, #tpu.memory_space<vmem>>, vector<4x8xf32>
    %cst_39 = arith.constant dense<0.000000e+00> : vector<256x8xf32>
    %73 = tpu.matmul %71, %72, %cst_39 {dimension_numbers = #tpu.dot_dimension_numbers<[1], [0], [0], [1], [0, 0, 1, 1], [], []>} : vector<256x4xf32>, vector<4x8xf32>, vector<256x8xf32> -> vector<256x8xf32>
    %74 = arith.addf %70, %73 : vector<256x8xf32>
    %75 = vector.shape_cast %74 : vector<256x8xf32> to vector<16x16x8xf32>
    %c0_40 = arith.constant 0 : index
    %c0_41 = arith.constant 0 : index
    %c0_42 = arith.constant 0 : index
    %c0_43 = arith.constant 0 : index
    %76 = vector.load %arg9[%c0_40, %c0_41, %c0_42, %c0_43] : memref<1x16x16x8xf32, #tpu.memory_space<vmem>>, vector<1x16x16x8xf32>
    %77 = vector.shape_cast %76 : vector<1x16x16x8xf32> to vector<16x16x8xf32>
    %78 = vector.shape_cast %75 : vector<16x16x8xf32> to vector<1x16x16x8xf32>
    tpu.vector_store %arg9[%c0_40, %c0_41, %c0_42, %c0_43], %78 {strides = array<i32>} : memref<1x16x16x8xf32, #tpu.memory_space<vmem>>, vector<1x16x16x8xf32>,
    return
  }
  func.func @transform_0(%arg0: i32) -> (i32, i32, i32, i32) {
    %c0_i32 = arith.constant 0 : i32
    %c0_i32_0 = arith.constant 0 : i32
    %c0_i32_1 = arith.constant 0 : i32
    %c0_i32_2 = arith.constant 0 : i32
    return %arg0, %c0_i32, %c0_i32_0, %c0_i32_1 : i32, i32, i32, i32
  }
  func.func @transform_1(%arg0: i32) -> (i32, i32) {
    %c0_i32 = arith.constant 0 : i32
    %c0_i32_0 = arith.constant 0 : i32
    %c0_i32_1 = arith.constant 0 : i32
    return %c0_i32, %c0_i32_0 : i32, i32
  }
  func.func @transform_2(%arg0: i32) -> (i32, i32) {
    %c0_i32 = arith.constant 0 : i32
    %c0_i32_0 = arith.constant 0 : i32
    %c0_i32_1 = arith.constant 0 : i32
    return %c0_i32, %c0_i32_0 : i32, i32
  }
  func.func @transform_3(%arg0: i32) -> (i32, i32) {
    %c0_i32 = arith.constant 0 : i32
    %c0_i32_0 = arith.constant 0 : i32
    %c0_i32_1 = arith.constant 0 : i32
    return %c0_i32, %c0_i32_0 : i32, i32
  }
  func.func @transform_4(%arg0: i32) -> (i32, i32) {
    %c0_i32 = arith.constant 0 : i32
    %c0_i32_0 = arith.constant 0 : i32
    %c0_i32_1 = arith.constant 0 : i32
    return %c0_i32, %c0_i32_0 : i32, i32
  }
  func.func @transform_5(%arg0: i32) -> (i32, i32) {
    %c0_i32 = arith.constant 0 : i32
    %c0_i32_0 = arith.constant 0 : i32
    %c0_i32_1 = arith.constant 0 : i32
    return %c0_i32, %c0_i32_0 : i32, i32
  }
  func.func @transform_6(%arg0: i32) -> (i32, i32) {
    %c0_i32 = arith.constant 0 : i32
    %c0_i32_0 = arith.constant 0 : i32
    %c0_i32_1 = arith.constant 0 : i32
    return %c0_i32, %c0_i32_0 : i32, i32
  }
  func.func @transform_7(%arg0: i32) -> (i32, i32) {
    %c0_i32 = arith.constant 0 : i32
    %c0_i32_0 = arith.constant 0 : i32
    %c0_i32_1 = arith.constant 0 : i32
    return %c0_i32, %c0_i32_0 : i32, i32
  }
  func.func @transform_8(%arg0: i32) -> (i32, i32, i32, i32) {
    %c0_i32 = arith.constant 0 : i32
    %c0_i32_0 = arith.constant 0 : i32
    %c0_i32_1 = arith.constant 0 : i32
    %c0_i32_2 = arith.constant 0 : i32
    return %arg0, %c0_i32, %c0_i32_0, %c0_i32_1 : i32, i32, i32, i32
  }
}

</mosaic_0001>

<bundles_post_ra>
// kernel: tpu_custom_call.1
= control target key start
LH: loop header
LB: loop body
LE: loop exit
PB: predicated region body
PF: predicated region fallthrough
CT: control target
= control target key end

     0   :  { %s5055_s27 = smov 0   ;;  %s9285_s0 = inlined_call_operand.vmem [shape: f32[2,16,16,4], index: 0, kind: input, shape index: {}]   ;;  %s9286_s1 = inlined_call_operand.vmem [shape: f32[1,4], index: 1, kind: input, shape index: {}]   ;;  %s9287_s2 = inlined_call_operand.vmem [shape: f32[1,4], index: 2, kind: input, shape index: {}]   ;;  %s9288_s3 = inlined_call_operand.vmem [shape: f32[36,8], index: 3, kind: input, shape index: {}]   ;;  %s9289_s4 = inlined_call_operand.vmem [shape: f32[1,8], index: 4, kind: input, shape index: {}]   ;;  %s9290_s5 = inlined_call_operand.vmem [shape: f32[1,8], index: 5, kind: input, shape index: {}]   ;;  %s9291_s6 = inlined_call_operand.vmem [shape: f32[72,8], index: 6, kind: input, shape index: {}]   ;;  %s9292_s7 = inlined_call_operand.vmem [shape: f32[4,8], index: 7, kind: input, shape index: {}]   ;;  %s9293_s8 = inlined_call_operand.vmem [shape: f32[2,16,16,8], index: 8, kind: output, shape index: {}]  }
   0x1 LB: > { %s4446_s28 = sadd.s32 4294967295, %s4995_s27   ;;  %p4450_p0 = scmp.ge.s32.totalorder %s4995_s27, 1  ;;  %s4995_s27 = sphi %s5055_s27, %s18_s27  }
   0x2   : > { %p262_p1 = scmp.lt.s32.totalorder %s4995_s27, 3 }
   0x4   : > { %p263_p2 = pnand %p4450_p0, %p262_p1 }
   0x6   : > { %266 = sbr.rel (%p263_p2) target bundleno = 1681 (0x691), region = 52 }
   0xd   : > { %vm448_vm0 = vcmask 31744   ;;  %vm451_vm1 = vcmask 25600   ;;  %p5065_p3 = scmp.lt.s32.totalorder %s4446_s28, 1  ;;  %v9311_v0 = vmov 0.0   ;;  %v5187_v1 = vld [vmem:[%s9286_s1] ss:$0 sm:$0xff] }
   0xe   : > { %449 = vst.msk [vmem:[#allocation2] sm:$0xff] %vm448_vm0, %v9311_v0  ;;  %450 = vst.msk [vmem:[#allocation2 + $0x8] sm:$0xff] %vm448_vm0, %v9311_v0  ;;  %v5199_v2 = vld [vmem:[%s9287_s2] ss:$0 sm:$0xff]  ;;  %vm639_vm2 = vcmask 1046528   ;;  %s4998_s16 = smov 4  }
   0xf   : > { %453 = vst.msk [vmem:[#allocation2 + $0x18] sm:$0xff] %vm448_vm0, %v9311_v0  ;;  %454 = vst.msk [vmem:[#allocation2 + $0x20] sm:$0xff] %vm448_vm0, %v9311_v0  ;;  %s10226_s28 = smov (!%p5065_p3, %s4446_s28), 1  ;;  %vm1627_vm3 = vcmask 64512   ;;  %vm720_vm4 = vcmask 1045504   ;;  %s4999_s17 = smov 8  }
  0x10   : > { %456 = vst.msk [vmem:[#allocation2 + $0x30] sm:$0xff] %vm448_vm0, %v9311_v0  ;;  %457 = vst.msk [vmem:[#allocation2 + $0x38] sm:$0xff] %vm448_vm0, %v9311_v0  ;;  %s4559_s30 = sshll.u32 %s10226_s28, 8  ;;  %s5000_s18 = smov 12   ;;  %vm1960_vm5 = vcmask 1043456   ;;  %vm1660_vm6 = vcmask 97280  }
  0x11   : > { %459 = vst.msk [vmem:[#allocation2 + $0x48] sm:$0xff] %vm448_vm0, %v9311_v0  ;;  %460 = vst.msk [vmem:[#allocation2 + $0x50] sm:$0xff] %vm448_vm0, %v9311_v0  ;;  %s5194_s13 = scalar_lea.vmem %s9285_s0, %s4559_s30  ;;  %s5001_s19 = smov 16   ;;  %vm1693_vm7 = vcmask 130048   ;;  %vm1726_vm8 = vcmask 162816   ;;  %vm1759_vm9 = vcmask 195584  }
  0x12   : > { %462 = vst.msk [vmem:[#allocation2 + $0x60] sm:$0xff] %vm448_vm0, %v9311_v0  ;;  %463 = vst.msk [vmem:[#allocation2 + $0x68] sm:$0xff] %vm448_vm0, %v9311_v0  ;;  %v308_v3 = vld [vmem:[%s5194_s13 + $0x10] sm:$0xff]  ;;  %v309_v4 = vld [vmem:[%s5194_s13 + $0x18] sm:$0xff]  ;;  %s5002_s20 = smov 20   ;;  %s5003_s21 = smov 24  }
  0x13   : > { %465 = vst.msk [vmem:[#allocation2 + $0x78] sm:$0xff] %vm448_vm0, %v9311_v0  ;;  %466 = vst.msk [vmem:[#allocation2 + $0x80] sm:$0xff] %vm448_vm0, %v9311_v0  ;;  %v306_v5 = vld [vmem:[%s5194_s13] sm:$0xff]  ;;  %v347_v6 = vmul.f32 %v5187_v1, %v308_v3  ;;  %v348_v7 = vmul.f32 %v5187_v1, %v309_v4  ;;  %v307_v8 = vld [vmem:[%s5194_s13 + $0x8] sm:$0xff]  ;;  %s5004_s11 = smov 28   ;;  %s5005_s14 = smov 32  }
  0x14   : > { %468 = vst.msk [vmem:[#allocation2 + $0x90] sm:$0xff] %vm448_vm0, %v9311_v0  ;;  %469 = vst.msk [vmem:[#allocation2 + $0x98] sm:$0xff] %vm448_vm0, %v9311_v0  ;;  %v345_v9 = vmul.f32 %v5187_v1, %v306_v5  ;;  %v310_v10 = vld [vmem:[%s5194_s13 + $0x20] sm:$0xff]  ;;  %v311_v11 = vld [vmem:[%s5194_s13 + $0x28] sm:$0xff]  ;;  %v346_v15 = vmul.f32 %v5187_v1, %v307_v8  ;;  %vm1792_vm10 = vcmask 228352   ;;  %vm1825_vm11 = vcmask 261120   ;;  %s9089_s29 = scalar_lea.vmem %s9293_s8, %s4559_s30 }
  0x15   : > { %471 = vst.msk [vmem:[#allocation2 + $0xa8] sm:$0xff] %vm448_vm0, %v9311_v0  ;;  %472 = vst.msk [vmem:[#allocation2 + $0xb0] sm:$0xff] %vm448_vm0, %v9311_v0  ;;  %v5210_v12 = vld [vmem:[#allocation2] sm:$0xff]  ;;  %v5212_v13 = vld [vmem:[#allocation2 + $0x8] sm:$0xff]  ;;  %v349_v16 = vmul.f32 %v5187_v1, %v310_v10  ;;  %v350_v17 = vmul.f32 %v5187_v1, %v311_v11  ;;  %v5223_v21 = vadd.f32 %v5199_v2, %v347_v6  ;;  %vm1863_vm12 = vcmask 293888   ;;  %s5007_s22 = smov 48  }
  0x16   : > { %474 = vst.msk [vmem:[#allocation2 + $0xc0] sm:$0xff] %vm448_vm0, %v9311_v0  ;;  %475 = vst.msk [vmem:[#allocation2 + $0xc8] sm:$0xff] %vm448_vm0, %v9311_v0  ;;  %v640_v18 = vrot.slane %v5210_v12, 1  ;;  %v641_v19 = vrot.slane %v5212_v13, 1  ;;  %v312_v22 = vld [vmem:[%s5194_s13 + $0x30] sm:$0xff]  ;;  %v5227_v23 = vadd.f32 %v5199_v2, %v348_v7  ;;  %v5230_v24 = vadd.f32 %v5199_v2, %v345_v9  ;;  %v313_v27 = vld [vmem:[%s5194_s13 + $0x38] sm:$0xff] }
  0x17   : > { %477 = vst.msk [vmem:[#allocation2 + $0xd8] sm:$0xff] %vm448_vm0, %v9311_v0  ;;  %478 = vst.msk [vmem:[#allocation2 + $0xe0] sm:$0xff] %vm448_vm0, %v9311_v0  ;;  %v5233_v25 = vadd.f32 %v5199_v2, %v346_v15  ;;  %v5236_v26 = vadd.f32 %v5199_v2, %v349_v16  ;;  %v314_v28 = vld [vmem:[%s5194_s13 + $0x40] sm:$0xff]  ;;  %v315_v29 = vld [vmem:[%s5194_s13 + $0x48] sm:$0xff]  ;;  %v9306_v32 = vmax.f32 %v5223_v21, 0.0  ;;  %v5245_v33 = vadd.f32 %v5199_v2, %v350_v17  ;;  %s5008_s25 = smov 56  }
  0x18   : > { %480 = vst.msk [vmem:[#allocation2 + $0xf0] sm:$0xff] %vm448_vm0, %v9311_v0  ;;  %481 = vst.msk [vmem:[#allocation2 + $0xf8] sm:$0xff] %vm448_vm0, %v9311_v0  ;;  %v642_v30 = vsel %vm639_vm2, %v640_v18, %v641_v19  ;;  %v316_v34 = vld [vmem:[%s5194_s13 + $0x50] sm:$0xff]  ;;  %v317_v35 = vld [vmem:[%s5194_s13 + $0x58] sm:$0xff]  ;;  %v9304_v37 = vmax.f32 %v5227_v23, 0.0  ;;  %v9310_v38 = vmax.f32 %v5230_v24, 0.0  ;;  %v351_v43 = vmul.f32 %v5187_v1, %v312_v22 }
  0x19   : > { %483 = vst.msk [vmem:[#allocation2 + $0x108] sm:$0xff] %vm448_vm0, %v9311_v0  ;;  %484 = vst.msk [vmem:[#allocation2 + $0x110] sm:$0xff] %vm448_vm0, %v9311_v0  ;;  %v318_v36 = vld [vmem:[%s5194_s13 + $0x60] sm:$0xff]  ;;  %827 = vrot.lane.b32.xlu0 %v642_v30, %s4998_s16  ;;  %v9308_v39 = vmax.f32 %v5233_v25, 0.0  ;;  %v9303_v40 = vmax.f32 %v5236_v26, 0.0  ;;  %v319_v41 = vld [vmem:[%s5194_s13 + $0x68] sm:$0xff]  ;;  %v352_v44 = vmul.f32 %v5187_v1, %v313_v27  ;;  %v353_v45 = vmul.f32 %v5187_v1, %v314_v28 }
  0x1a   : > { %486 = vst.msk [vmem:[#allocation2 + $0x120] sm:$0xff] %vm448_vm0, %v9311_v0  ;;  %487 = vst.msk [vmem:[#allocation2 + $0x128] sm:$0xff] %vm448_vm0, %v9311_v0  ;;  %v9302_v42 = vmax.f32 %v5245_v33, 0.0  ;;  %v354_v46 = vmul.f32 %v5187_v1, %v315_v29  ;;  %v355_v47 = vmul.f32 %v5187_v1, %v316_v34  ;;  %v356_v48 = vmul.f32 %v5187_v1, %v317_v35  ;;  %v320_v58 = vld [vmem:[%s5194_s13 + $0x70] sm:$0xff]  ;;  %v321_v59 = vld [vmem:[%s5194_s13 + $0x78] sm:$0xff]  ;;  %s5009_s26 = smov 64  }
  0x1b   : > { %489 = vst.msk [vmem:[#allocation2 + $0x138] sm:$0xff] %vm448_vm0, %v9311_v0  ;;  %490 = vst.msk [vmem:[#allocation2 + $0x140] sm:$0xff] %vm448_vm0, %v9311_v0  ;;  %v357_v49 = vmul.f32 %v5187_v1, %v318_v36  ;;  %v5283_v50 = vadd.f32 %v5199_v2, %v351_v43  ;;  %v5286_v51 = vadd.f32 %v5199_v2, %v352_v44  ;;  %v322_v60 = vld [vmem:[%s5194_s13 + $0x80] sm:$0xff]  ;;  %v323_v4 = vld [vmem:[%s5194_s13 + $0x88] sm:$0xff]  ;;  %vm2301_vm13 = vcmask 58368  }
  0x1c   : > { %492 = vst.msk [vmem:[#allocation2 + $0x150] sm:$0xff] %vm448_vm0, %v9311_v0  ;;  %493 = vst.msk [vmem:[#allocation2 + $0x158] sm:$0xff] %vm448_vm0, %v9311_v0  ;;  %v5289_v52 = vadd.f32 %v5199_v2, %v353_v45  ;;  %v358_v53 = vmul.f32 %v5187_v1, %v319_v41  ;;  %v5294_v54 = vadd.f32 %v5199_v2, %v354_v46  ;;  %v324_v5 = vld [vmem:[%s5194_s13 + $0x90] sm:$0xff]  ;;  %vm3571_vm14 = vcmask 326656  }
  0x1d   : > { %495 = vst.msk [vmem:[#allocation2 + $0x168] sm:$0xff] %vm448_vm0, %v9311_v0  ;;  %496 = vst.msk [vmem:[#allocation2 + $0x170] sm:$0xff] %vm448_vm0, %v9311_v0  ;;  %v5297_v55 = vadd.f32 %v5199_v2, %v355_v47  ;;  %v5300_v56 = vadd.f32 %v5199_v2, %v356_v48  ;;  %v5303_v57 = vadd.f32 %v5199_v2, %v357_v49  ;;  %v9301_v61 = vmax.f32 %v5283_v50, 0.0 }
  0x1e   : > { %498 = vst.msk [vmem:[#allocation2 + $0x180] sm:$0xff] %vm448_vm0, %v9311_v0  ;;  %499 = vst.msk [vmem:[#allocation2 + $0x188] sm:$0xff] %vm448_vm0, %v9311_v0  ;;  %v9300_v62 = vmax.f32 %v5286_v51, 0.0  ;;  %v9299_v63 = vmax.f32 %v5289_v52, 0.0  ;;  %v5312_v3 = vadd.f32 %v5199_v2, %v358_v53  ;;  %v9298_v6 = vmax.f32 %v5294_v54, 0.0 }
  0x1f   : > { %501 = vst.msk [vmem:[#allocation2 + $0x198] sm:$0xff] %vm448_vm0, %v9311_v0  ;;  %502 = vst.msk [vmem:[#allocation2 + $0x1a0] sm:$0xff] %vm448_vm0, %v9311_v0  ;;  %v9297_v7 = vmax.f32 %v5297_v55, 0.0  ;;  %v9296_v8 = vmax.f32 %v5300_v56, 0.0  ;;  %v9295_v9 = vmax.f32 %v5303_v57, 0.0  ;;  %v359_v11 = vmul.f32 %v5187_v1, %v320_v58 }
  0x20   : > { %452 = vst.msk [vmem:[#allocation2 + $0x10] sm:$0x3] %vm451_vm1, %v9311_v0  ;;  %455 = vst.msk [vmem:[#allocation2 + $0x28] sm:$0x3] %vm451_vm1, %v9311_v0  ;;  %v9294_v10 = vmax.f32 %v5312_v3, 0.0  ;;  %v360_v15 = vmul.f32 %v5187_v1, %v321_v59  ;;  %v361_v16 = vmul.f32 %v5187_v1, %v322_v60  ;;  %v362_v18 = vmul.f32 %v5187_v1, %v323_v4  ;;  %v326_v4 = vld [vmem:[%s5194_s13 + $0xa0] sm:$0xff] }
  0x21   : > { %458 = vst.msk [vmem:[#allocation2 + $0x40] sm:$0x3] %vm451_vm1, %v9311_v0  ;;  %461 = vst.msk [vmem:[#allocation2 + $0x58] sm:$0x3] %vm451_vm1, %v9311_v0  ;;  %v398_v30 = vadd.f32 %v5199_v2, %v359_v11  ;;  %vm3604_vm15 = vcmask 392192  }
  0x22   : > { %464 = vst.msk [vmem:[#allocation2 + $0x70] sm:$0x3] %vm451_vm1, %v9311_v0  ;;  %467 = vst.msk [vmem:[#allocation2 + $0x88] sm:$0x3] %vm451_vm1, %v9311_v0  ;;  %v5365_v34 = vadd.f32 %v5199_v2, %v361_v16  ;;  %v5375_v45 = vadd.f32 %v5199_v2, %v362_v18 }
  0x23   : > { %470 = vst.msk [vmem:[#allocation2 + $0xa0] sm:$0x3] %vm451_vm1, %v9311_v0  ;;  %473 = vst.msk [vmem:[#allocation2 + $0xb8] sm:$0x3] %vm451_vm1, %v9311_v0 }
  0x24   : > { %476 = vst.msk [vmem:[#allocation2 + $0xd0] sm:$0x3] %vm451_vm1, %v9311_v0  ;;  %479 = vst.msk [vmem:[#allocation2 + $0xe8] sm:$0x3] %vm451_vm1, %v9311_v0 }
  0x25   : > { %482 = vst.msk [vmem:[#allocation2 + $0x100] sm:$0x3] %vm451_vm1, %v9311_v0  ;;  %485 = vst.msk [vmem:[#allocation2 + $0x118] sm:$0x3] %vm451_vm1, %v9311_v0 }
  0x26   : > { %488 = vst.msk [vmem:[#allocation2 + $0x130] sm:$0x3] %vm451_vm1, %v9311_v0  ;;  %491 = vst.msk [vmem:[#allocation2 + $0x148] sm:$0x3] %vm451_vm1, %v9311_v0 }
  0x27   : > { %494 = vst.msk [vmem:[#allocation2 + $0x160] sm:$0x3] %vm451_vm1, %v9311_v0  ;;  %497 = vst.msk [vmem:[#allocation2 + $0x178] sm:$0x3] %vm451_vm1, %v9311_v0  ;;  %v5214_v14 = vld [vmem:[#allocation2 + $0x10] sm:$0x3] }
  0x28   : > { %500 = vst.msk [vmem:[#allocation2 + $0x190] sm:$0x3] %vm451_vm1, %v9311_v0  ;;  %503 = vst.msk [vmem:[#allocation2 + $0x1a8] sm:$0x3] %vm451_vm1, %v9311_v0  ;;  %v643_v20 = vrot.slane %v5214_v14, 1  ;;  %vm3670_vm1 = vcmask 523264  }
  0x29   : > { %9526 = vst [vmem:[#allocation4_spill] sm:$0xff] %v5223_v21  ;;  %9527 = vst [vmem:[#allocation5_spill] sm:$0xff] %v5227_v23 }
  0x2a   : > { %9528 = vst [vmem:[#allocation6_spill] sm:$0xff] %v5230_v24  ;;  %9529 = vst [vmem:[#allocation7_spill] sm:$0xff] %v5233_v25  ;;  %v644_v31 = vsel %vm639_vm2, %v641_v19, %v643_v20  ;;  %v325_v19 = vld [vmem:[%s5194_s13 + $0x98] sm:$0xff]  ;;  %v363_v20 = vmul.f32 %v5187_v1, %v324_v5 }
  0x2b   : > { %9530 = vst [vmem:[#allocation8_spill] sm:$0xff] %v5236_v26  ;;  %9531 = vst [vmem:[#allocation9_spill] sm:$0xff] %v5245_v33  ;;  %829 = vrot.lane.b32.xlu0 %v644_v31, %s4998_s16  ;;  %v5362_v31 = vadd.f32 %v5199_v2, %v360_v15  ;;  %v364_v53 = vmul.f32 %v5187_v1, %v325_v19  ;;  %v430_v15 = vmax.f32 %v398_v30, 0.0  ;;  %v327_v19 = vld [vmem:[%s5194_s13 + $0xa8] sm:$0xff]  ;;  %v9307_v30 = vmax.f32 %v5365_v34, 0.0 }
  0x2c   : > { %507 = vst.msk [vmem:[#allocation2 + $0x31] sm:$0xff] %vm448_vm0, %v9306_v32  ;;  %508 = vst.msk [vmem:[#allocation2 + $0x39] sm:$0xff] %vm448_vm0, %v9304_v37  ;;  %v5401_v18 = vadd.f32 %v5199_v2, %v363_v20 }
  0x2d   : > { %505 = vst.msk [vmem:[#allocation2 + $0x19] sm:$0xff] %vm448_vm0, %v9310_v38  ;;  %506 = vst.msk [vmem:[#allocation2 + $0x21] sm:$0xff] %vm448_vm0, %v9308_v39  ;;  %v9309_v16 = vmax.f32 %v5362_v31, 0.0  ;;  %4753 = vmatprep.mubr.msk.f32.mxu1 %vm448_vm0, %v430_v15  ;;  %v330_v39 = vld [vmem:[%s5194_s13 + $0xc0] sm:$0xff] }
  0x2e   : > { %509 = vst.msk [vmem:[#allocation2 + $0x49] sm:$0xff] %vm448_vm0, %v9303_v40  ;;  %510 = vst.msk [vmem:[#allocation2 + $0x51] sm:$0xff] %vm448_vm0, %v9302_v42  ;;  %v9313_v42 = vmax.f32 %v5401_v18, 0.0 }
  0x2f   : > { %9532 = vst [vmem:[#allocation10_spill] sm:$0xff] %v5283_v50  ;;  %9533 = vst [vmem:[#allocation11_spill] sm:$0xff] %v5286_v51 }
  0x30   : > { %9534 = vst [vmem:[#allocation12_spill] sm:$0xff] %v5289_v52  ;;  %9535 = vst [vmem:[#allocation13_spill] sm:$0xff] %v5294_v54  ;;  %v333_v54 = vld [vmem:[%s5194_s13 + $0xd8] sm:$0xff]  ;;  %v335_v52 = vld [vmem:[%s5194_s13 + $0xe8] sm:$0xff] }
  0x31   : > { %9536 = vst [vmem:[#allocation14_spill] sm:$0xff] %v5297_v55  ;;  %9537 = vst [vmem:[#allocation15_spill] sm:$0xff] %v5300_v56 }
  0x32   : > { %9538 = vst [vmem:[#allocation16_spill] sm:$0xff] %v5303_v57  ;;  %9539 = vst [vmem:[#allocation17_spill] sm:$0xff] %v5312_v3 }
  0x33   : > { %511 = vst.msk [vmem:[#allocation2 + $0x61] sm:$0xff] %vm448_vm0, %v9301_v61  ;;  %512 = vst.msk [vmem:[#allocation2 + $0x69] sm:$0xff] %vm448_vm0, %v9300_v62  ;;  %v5333_v17 = vld [vmem:[#allocation2 + $0x30] sm:$0xff]  ;;  %v5350_v22 = vld [vmem:[#allocation2 + $0x38] sm:$0xff] }
  0x34   : > { %513 = vst.msk [vmem:[#allocation2 + $0x79] sm:$0xff] %vm448_vm0, %v9299_v63  ;;  %514 = vst.msk [vmem:[#allocation2 + $0x81] sm:$0xff] %vm448_vm0, %v9298_v6  ;;  %v650_v27 = vrot.slane %v5333_v17, 1  ;;  %v5353_v28 = vld [vmem:[#allocation2 + $0x18] sm:$0xff]  ;;  %v5355_v29 = vld [vmem:[#allocation2 + $0x20] sm:$0xff]  ;;  %v651_v35 = vrot.slane %v5350_v22, 1 }
  0x35   : > { %515 = vst.msk [vmem:[#allocation2 + $0x91] sm:$0xff] %vm448_vm0, %v9297_v7  ;;  %516 = vst.msk [vmem:[#allocation2 + $0x99] sm:$0xff] %vm448_vm0, %v9296_v8  ;;  %v645_v36 = vrot.slane %v5353_v28, 1  ;;  %v646_v41 = vrot.slane %v5355_v29, 1  ;;  %v5370_v43 = vld [vmem:[#allocation2 + $0x48] sm:$0xff]  ;;  %v5372_v44 = vld [vmem:[#allocation2 + $0x50] sm:$0xff] }
  0x36   : > { %517 = vst.msk [vmem:[#allocation2 + $0xa9] sm:$0xff] %vm448_vm0, %v9295_v9  ;;  %518 = vst.msk [vmem:[#allocation2 + $0xb1] sm:$0xff] %vm448_vm0, %v9294_v10  ;;  %v655_v46 = vrot.slane %v5370_v43, 1  ;;  %v656_v47 = vrot.slane %v5372_v44, 1  ;;  %v5379_v48 = vld [vmem:[#allocation2 + $0x28] sm:$0x3]  ;;  %v5385_v58 = vsel %vm639_vm2, %v650_v27, %v651_v35 }
  0x37   : > { %9540 = vst [vmem:[#allocation18_spill] sm:$0xff] %v5362_v31  ;;  %9541 = vst [vmem:[#allocation19_spill] sm:$0xff] %v5365_v34  ;;  %v5381_v49 = vld [vmem:[#allocation2 + $0x40] sm:$0x3]  ;;  %v5388_v59 = vsel %vm639_vm2, %v645_v36, %v646_v41  ;;  %v648_v60 = vrot.slane %v5379_v48, 1  ;;  %835 = vrot.lane.b32.xlu0 %v5385_v58, %s4998_s16  ;;  %v9305_v7 = vmax.f32 %v5375_v45, 0.0 }
  0x38   : > { %9542 = vst [vmem:[#allocation20_spill] sm:$0xff] %v5375_v45  ;;  %831 = vrot.lane.b32.xlu1 %v5388_v59, %s4998_s16  ;;  %v653_v5 = vrot.slane %v5381_v49, 1  ;;  %v5397_v11 = vld [vmem:[#allocation2 + $0x58] sm:$0x3]  ;;  %9543 = vst [vmem:[#allocation21_spill] sm:$0xff] %v5401_v18  ;;  %v5405_v27 = vsel %vm639_vm2, %v655_v46, %v656_v47 }
  0x39   : > { %v5408_v36 = vsel %vm639_vm2, %v646_v41, %v648_v60  ;;  %519 = vst.msk [vmem:[#allocation2 + $0xc1] sm:$0xff] %vm448_vm0, %v430_v15  ;;  %520 = vst.msk [vmem:[#allocation2 + $0xc9] sm:$0xff] %vm448_vm0, %v9309_v16  ;;  %v5427_v41 = vadd.f32 %v5199_v2, %v364_v53  ;;  %v658_v46 = vrot.slane %v5397_v11, 1  ;;  %v365_v60 = vmul.f32 %v5187_v1, %v326_v4 }
  0x3a   : > { %9544 = vst [vmem:[#allocation22_spill] sm:$0xff] %v5408_v36  ;;  %v5410_v10 = vld [vmem:[#allocation2 + $0x60] sm:$0xff]  ;;  %v5412_v9 = vld [vmem:[#allocation2 + $0x68] sm:$0xff]  ;;  %521 = vst.msk [vmem:[#allocation2 + $0xd9] sm:$0xff] %vm448_vm0, %v9307_v30  ;;  %v366_v53 = vmul.f32 %v5187_v1, %v327_v19  ;;  %v5452_v4 = vsel %vm639_vm2, %v651_v35, %v653_v5 }
  0x3b   : > { %v5414_v8 = vld [vmem:[#allocation2 + $0x78] sm:$0xff]  ;;  %v660_v20 = vrot.slane %v5410_v10, 1  ;;  %v661_v6 = vrot.slane %v5412_v9, 1  ;;  %v5420_v63 = vld [vmem:[#allocation2 + $0x80] sm:$0xff]  ;;  %9545 = vst [vmem:[#allocation23_spill] sm:$0xff] %v5427_v41  ;;  %522 = vst.msk [vmem:[#allocation2 + $0xe1] sm:$0xff] %vm448_vm0, %v9305_v7  ;;  %839 = vrot.lane.b32.xlu0 %v5405_v27, %s4998_s16  ;;  %v5474_v38 = vadd.f32 %v5199_v2, %v365_v60 }
  0x3c   : > { %833 = vrot.lane.b32.xlu1 %v5408_v36, %s4998_s16  ;;  %v665_v15 = vrot.slane %v5414_v8, 1  ;;  %v9316_v62 = vrot.slane %v5420_v63, 1  ;;  %v5445_v61 = vld [vmem:[#allocation2 + $0x90] sm:$0xff]  ;;  %9547 = vst [vmem:[#allocation25_spill] sm:$0xff] %v5452_v4  ;;  %v5454_v19 = vld [vmem:[#allocation2 + $0x98] sm:$0xff]  ;;  %v9318_v32 = vmax.f32 %v5427_v41, 0.0  ;;  %v5477_v0 = vadd.f32 %v5199_v2, %v366_v53 }
  0x3d   : > { %v5449_v40 = vsel %vm639_vm2, %v660_v20, %v661_v6  ;;  %v5456_v37 = vld [vmem:[#allocation2 + $0x70] sm:$0x3]  ;;  %523 = vst.msk [vmem:[#allocation2 + $0xf1] sm:$0xff] %vm448_vm0, %v9313_v42  ;;  %v329_v30 = vld [vmem:[%s5194_s13 + $0xb8] sm:$0xff]  ;;  %v5466_v20 = vsel %vm639_vm2, %v656_v47, %v658_v46  ;;  %v670_v35 = vrot.slane %v5445_v61, 1  ;;  %v5469_v5 = vld [vmem:[#allocation2 + $0xa8] sm:$0xff]  ;;  %v369_v46 = vmul.f32 %v5187_v1, %v330_v39 }
  0x3e   : > { %9546 = vst [vmem:[#allocation24_spill] sm:$0xff] %v5449_v40  ;;  %v328_v7 = vld [vmem:[%s5194_s13 + $0xb0] sm:$0xff]  ;;  %9548 = vst [vmem:[#allocation26_spill] sm:$0xff] %v5466_v20  ;;  %v5486_v47 = vsel %vm639_vm2, %v665_v15, %v9316_v62  ;;  %v663_v42 = vrot.slane %v5456_v37, 1  ;;  %v331_v53 = vld [vmem:[%s5194_s13 + $0xc8] sm:$0xff]  ;;  %v9321_v57 = vmax.f32 %v5474_v38, 0.0  ;;  %v368_v62 = vmul.f32 %v5187_v1, %v329_v30 }
  0x3f   : > { %v5471_v16 = vld [vmem:[#allocation2 + $0xb0] sm:$0xff]  ;;  %9549 = vst [vmem:[#allocation27_spill] sm:$0xff] %v5474_v38  ;;  %9550 = vst [vmem:[#allocation28_spill] sm:$0xff] %v5477_v0  ;;  %843 = vrot.lane.b32.xlu0 %v5449_v40, %s4998_s16  ;;  %v367_v60 = vmul.f32 %v5187_v1, %v328_v7  ;;  %v5495_v3 = vld [vmem:[#allocation2 + $0x88] sm:$0x3]  ;;  %v9322_v15 = vmax.f32 %v5477_v0, 0.0  ;;  %v370_v39 = vmul.f32 %v5187_v1, %v331_v53 }
  0x40   : > { %837 = vrot.lane.b32.xlu1 %v5452_v4, %s4998_s16  ;;  %9551 = vst [vmem:[#allocation29_spill] sm:$0xff] %v5486_v47  ;;  %524 = vst.msk [vmem:[#allocation2 + $0xf9] sm:$0xff] %vm448_vm0, %v9318_v32  ;;  %v675_v56 = vrot.slane %v5469_v5, 1  ;;  %v5513_v7 = vadd.f32 %v5199_v2, %v368_v62  ;;  %v332_v30 = vld [vmem:[%s5194_s13 + $0xd0] sm:$0xff]  ;;  %v334_v32 = vld [vmem:[%s5194_s13 + $0xe0] sm:$0xff]  ;;  %v5532_v53 = vsel %vm639_vm2, %v661_v6, %v663_v42  ;;  %v9588_v36 = vmov 0.0  }
  0x41   : > { %v5504_v55 = vadd.f32 %v5199_v2, %v367_v60  ;;  %525 = vst.msk [vmem:[#allocation2 + $0x109] sm:$0xff] %vm448_vm0, %v9321_v57  ;;  %526 = vst.msk [vmem:[#allocation2 + $0x111] sm:$0xff] %vm448_vm0, %v9322_v15  ;;  %v9554_v60 = vrot.slane %v5454_v19, 1  ;;  %v668_v15 = vrot.slane %v5495_v3, 1  ;;  %v5534_v51 = vld [vmem:[#allocation2 + $0xa0] sm:$0x3]  ;;  %v5538_v50 = vadd.f32 %v5199_v2, %v369_v46 }
  0x42   : > { %9553 = vst [vmem:[#allocation31_spill] sm:$0xff] %v5513_v7  ;;  %9556 = vst [vmem:[#allocation33_spill] sm:$0xff] %v5532_v53  ;;  %v9330_v0 = vmax.f32 %v5513_v7, 0.0  ;;  %v5541_v38 = vadd.f32 %v5199_v2, %v370_v39  ;;  %v5548_v62 = vld [vmem:[#allocation2 + $0xc0] sm:$0xff]  ;;  %v5550_v33 = vld [vmem:[#allocation2 + $0xc8] sm:$0xff]  ;;  %v371_v6 = vmul.f32 %v5187_v1, %v332_v30  ;;  %v372_v46 = vmul.f32 %v5187_v1, %v333_v54 }
  0x43   : > { %9552 = vst [vmem:[#allocation30_spill] sm:$0xff] %v5504_v55  ;;  %847 = vrot.lane.b32.xlu0 %v5486_v47, %s4998_s16  ;;  %v5525_v57 = vsel %vm639_vm2, %v670_v35, %v9554_v60  ;;  %9557 = vst [vmem:[#allocation34_spill] sm:$0xff] %v5538_v50  ;;  %v9559_v35 = vrot.slane %v5471_v16, 1  ;;  %v9561_v42 = vmax.f32 %v5504_v55, 0.0  ;;  %v374_v41 = vmul.f32 %v5187_v1, %v335_v52  ;;  %v5582_v39 = vld [vmem:[#allocation2 + $0xb8] sm:$0x3] }
  0x44   : > { %841 = vrot.lane.b32.xlu1 %v5466_v20, %s4998_s16  ;;  %9555 = vst [vmem:[#allocation32_spill] sm:$0xff] %v5525_v57  ;;  %9558 = vst [vmem:[#allocation35_spill] sm:$0xff] %v5541_v38  ;;  %v9562_v54 = vrot.slane %v5420_v63, 1  ;;  %v680_v52 = vrot.slane %v5548_v62, 1  ;;  %v9566_v7 = vmax.f32 %v5538_v50, 0.0  ;;  %v5598_v55 = vld [vmem:[#allocation2 + $0xe0] sm:$0xff] }
  0x45   : > { %v5546_v60 = vsel %vm639_vm2, %v675_v56, %v9559_v35  ;;  %527 = vst.msk [vmem:[#allocation2 + $0x121] sm:$0xff] %vm448_vm0, %v9561_v42  ;;  %528 = vst.msk [vmem:[#allocation2 + $0x129] sm:$0xff] %vm448_vm0, %v9330_v0  ;;  %v373_v35 = vmul.f32 %v5187_v1, %v334_v32  ;;  %v673_v42 = vrot.slane %v5534_v51, 1  ;;  %v5575_v0 = vadd.f32 %v5199_v2, %v371_v6  ;;  %v5625_v23 = vld [vmem:[#allocation2 + $0xd0] sm:$0x3] }
  0x46   : > { %9560 = vst [vmem:[#allocation36_spill] sm:$0xff] %v5546_v60  ;;  %v5571_v30 = vsel %vm639_vm2, %v9562_v54, %v668_v15  ;;  %v5578_v32 = vadd.f32 %v5199_v2, %v372_v46  ;;  %v681_v56 = vrot.slane %v5550_v33, 1  ;;  %529 = vst.msk [vmem:[#allocation2 + $0x139] sm:$0xff] %vm448_vm0, %v9566_v7  ;;  %v9567_v15 = vmax.f32 %v5541_v38, 0.0  ;;  %v5596_v54 = vld [vmem:[#allocation2 + $0xd8] sm:$0xff]  ;;  %v336_v47 = vld [vmem:[%s5194_s13 + $0xf0] sm:$0xff] }
  0x47   : > { %851 = vrot.lane.b32.xlu0 %v5525_v57, %s4998_s16  ;;  %9563 = vst [vmem:[#allocation37_spill] sm:$0xff] %v5571_v30  ;;  %9564 = vst [vmem:[#allocation38_spill] sm:$0xff] %v5575_v0  ;;  %v5591_v6 = vadd.f32 %v5199_v2, %v373_v35  ;;  %v5594_v46 = vadd.f32 %v5199_v2, %v374_v41  ;;  %v9339_v26 = vmax.f32 %v5575_v0, 0.0  ;;  %v678_v35 = vrot.slane %v5582_v39, 1  ;;  %v5632_v41 = vld [vmem:[#allocation2 + $0xf8] sm:$0xff] }
  0x48   : > { %845 = vrot.lane.b32.xlu1 %v5532_v53, %s4998_s16  ;;  %9565 = vst [vmem:[#allocation39_spill] sm:$0xff] %v5578_v32  ;;  %530 = vst.msk [vmem:[#allocation2 + $0x141] sm:$0xff] %vm448_vm0, %v9567_v15  ;;  %v9340_v50 = vmax.f32 %v5578_v32, 0.0  ;;  %v5616_v15 = vsel %vm639_vm2, %v680_v52, %v681_v56  ;;  %v9571_v7 = vrot.slane %v5454_v19, 1  ;;  %v685_v18 = vrot.slane %v5596_v54, 1  ;;  %v5652_v32 = vld [vmem:[#allocation2 + $0x108] sm:$0xff] }
  0x49   : > { %9568 = vst [vmem:[#allocation40_spill] sm:$0xff] %v5591_v6  ;;  %9569 = vst [vmem:[#allocation41_spill] sm:$0xff] %v5594_v46  ;;  %v686_v0 = vrot.slane %v5598_v55, 1  ;;  %v9574_v52 = vmax.f32 %v5594_v46, 0.0  ;;  %v5654_v45 = vld [vmem:[#allocation2 + $0x110] sm:$0xff] }
  0x4a   : > { %531 = vst.msk [vmem:[#allocation2 + $0x151] sm:$0xff] %vm448_vm0, %v9339_v26  ;;  %532 = vst.msk [vmem:[#allocation2 + $0x159] sm:$0xff] %vm448_vm0, %v9340_v50  ;;  %v5621_v38 = vsel %vm639_vm2, %v9571_v7, %v673_v42  ;;  %v9573_v26 = vmax.f32 %v5591_v6, 0.0  ;;  %v5630_v50 = vld [vmem:[#allocation2 + $0xf0] sm:$0xff]  ;;  %v683_v42 = vrot.slane %v5625_v23, 1  ;;  %v696_v34 = vrot.slane %v5654_v45, 1 }
  0x4b   : > { %855 = vrot.lane.b32.xlu0 %v5546_v60, %s4998_s16  ;;  %9570 = vst [vmem:[#allocation42_spill] sm:$0xff] %v5616_v15  ;;  %9572 = vst [vmem:[#allocation43_spill] sm:$0xff] %v5621_v38  ;;  %v5643_v7 = vsel %vm639_vm2, %v685_v18, %v686_v0  ;;  %v690_v46 = vrot.slane %v5630_v50, 1  ;;  %v5656_v21 = vld [vmem:[#allocation2 + $0xe8] sm:$0x3] }
  0x4c   : > { %849 = vrot.lane.b32.xlu1 %v5571_v30, %s4998_s16  ;;  %533 = vst.msk [vmem:[#allocation2 + $0x169] sm:$0xff] %vm448_vm0, %v9573_v26  ;;  %534 = vst.msk [vmem:[#allocation2 + $0x171] sm:$0xff] %vm448_vm0, %v9574_v52  ;;  %v9576_v26 = vrot.slane %v5471_v16, 1  ;;  %v691_v52 = vrot.slane %v5632_v41, 1  ;;  %v5663_v18 = vsel %vm639_vm2, %v681_v56, %v683_v42  ;;  %v688_v25 = vrot.slane %v5656_v21, 1  ;;  %v5673_v24 = vld [vmem:[#allocation2 + $0x120] sm:$0xff] }
  0x4d   : > { %9575 = vst [vmem:[#allocation44_spill] sm:$0xff] %v5643_v7  ;;  %9578 = vst [vmem:[#allocation46_spill] sm:$0xff] %v5663_v18  ;;  %v5671_v31 = vld [vmem:[#allocation2 + $0x100] sm:$0x3]  ;;  %v5709_v53 = vld [vmem:[#allocation2 + $0x130] sm:$0x3] }
  0x4e   : > { %v5648_v6 = vsel %vm639_vm2, %v9576_v26, %v678_v35  ;;  %v5666_v35 = vsel %vm639_vm2, %v690_v46, %v691_v52  ;;  %v695_v26 = vrot.slane %v5652_v32, 1  ;;  %v693_v56 = vrot.slane %v5671_v31, 1  ;;  %2299 = vst.msk [vmem:[#allocation3] sm:$0xff] %vm1627_vm3, %v9588_v36  ;;  %2300 = vst.msk [vmem:[#allocation3 + $0x8] sm:$0xff] %vm1627_vm3, %v9588_v36 }
  0x4f   : > { %859 = vrot.lane.b32.xlu0 %v5616_v15, %s4998_s16  ;;  %9577 = vst [vmem:[#allocation45_spill] sm:$0xff] %v5648_v6  ;;  %9579 = vst [vmem:[#allocation47_spill] sm:$0xff] %v5666_v35  ;;  %v5686_v42 = vsel %vm639_vm2, %v686_v0, %v688_v25  ;;  %v5690_v15 = vld [vmem:[#allocation2 + $0x138] sm:$0xff]  ;;  %v5692_v30 = vld [vmem:[#allocation2 + $0x140] sm:$0xff] }
  0x50   : > { %853 = vrot.lane.b32.xlu1 %v5621_v38, %s4998_s16  ;;  %v5683_v46 = vsel %vm639_vm2, %v695_v26, %v696_v34  ;;  %9581 = vst [vmem:[#allocation49_spill] sm:$0xff] %v5686_v42  ;;  %v5701_v0 = vsel %vm639_vm2, %v691_v52, %v693_v56  ;;  %v705_v26 = vrot.slane %v5690_v15, 1  ;;  %2303 = vst.msk [vmem:[#allocation3 + $0x18] sm:$0xff] %vm1627_vm3, %v9588_v36 }
  0x51   : > { %9580 = vst [vmem:[#allocation48_spill] sm:$0xff] %v5683_v46  ;;  %9582 = vst [vmem:[#allocation50_spill] sm:$0xff] %v5701_v0  ;;  %v5711_v57 = vld [vmem:[#allocation2 + $0x150] sm:$0xff] }
  0x52   : > { %2304 = vst.msk [vmem:[#allocation3 + $0x20] sm:$0xff] %vm1627_vm3, %v9588_v36  ;;  %2306 = vst.msk [vmem:[#allocation3 + $0x30] sm:$0xff] %vm1627_vm3, %v9588_v36 }
  0x53   : > { %863 = vrot.lane.b32.xlu0 %v5643_v7, %s4998_s16  ;;  %v5675_v7 = vld [vmem:[#allocation2 + $0x128] sm:$0xff]  ;;  %2307 = vst.msk [vmem:[#allocation3 + $0x38] sm:$0xff] %vm1627_vm3, %v9588_v36  ;;  %2309 = vst.msk [vmem:[#allocation3 + $0x48] sm:$0xff] %vm1627_vm3, %v9588_v36 }
  0x54   : > { %857 = vrot.lane.b32.xlu1 %v5648_v6, %s4998_s16  ;;  %v700_v6 = vrot.slane %v5673_v24, 1  ;;  %v701_v38 = vrot.slane %v5675_v7, 1  ;;  %v5731_v4 = vld [vmem:[#allocation2 + $0x168] sm:$0xff]  ;;  %2310 = vst.msk [vmem:[#allocation3 + $0x50] sm:$0xff] %vm1627_vm3, %v9588_v36  ;;  %2312 = vst.msk [vmem:[#allocation3 + $0x60] sm:$0xff] %vm1627_vm3, %v9588_v36 }
  0x55   : > { %2313 = vst.msk [vmem:[#allocation3 + $0x68] sm:$0xff] %vm1627_vm3, %v9588_v36  ;;  %2315 = vst.msk [vmem:[#allocation3 + $0x78] sm:$0xff] %vm1627_vm3, %v9588_v36 }
  0x56   : > { %v5704_v25 = vsel %vm639_vm2, %v700_v6, %v701_v38  ;;  %v703_v6 = vrot.slane %v5709_v53, 1  ;;  %2316 = vst.msk [vmem:[#allocation3 + $0x80] sm:$0xff] %vm1627_vm3, %v9588_v36  ;;  %2318 = vst.msk [vmem:[#allocation3 + $0x90] sm:$0xff] %vm1627_vm3, %v9588_v36 }
  0x57   : > { %867 = vrot.lane.b32.xlu0 %v5666_v35, %s4998_s16  ;;  %v5694_v35 = vld [vmem:[#allocation2 + $0x118] sm:$0x3]  ;;  %9583 = vst [vmem:[#allocation51_spill] sm:$0xff] %v5704_v25  ;;  %2319 = vst.msk [vmem:[#allocation3 + $0x98] sm:$0xff] %vm1627_vm3, %v9588_v36 }
  0x58   : > { %861 = vrot.lane.b32.xlu1 %v5663_v18, %s4998_s16  ;;  %v9384_v18 = vrot.slane %v5692_v30, 1  ;;  %v698_v60 = vrot.slane %v5694_v35, 1  ;;  %2321 = vst.msk [vmem:[#allocation3 + $0xa8] sm:$0xff] %vm1627_vm3, %v9588_v36  ;;  %2322 = vst.msk [vmem:[#allocation3 + $0xb0] sm:$0xff] %vm1627_vm3, %v9588_v36 }
  0x59   : > { %2324 = vst.msk [vmem:[#allocation3 + $0xc0] sm:$0xff] %vm1627_vm3, %v9588_v36  ;;  %2325 = vst.msk [vmem:[#allocation3 + $0xc8] sm:$0xff] %vm1627_vm3, %v9588_v36 }
  0x5a   : > { %v5723_v52 = vsel %vm639_vm2, %v705_v26, %v9384_v18  ;;  %v5726_v56 = vsel %vm639_vm2, %v696_v34, %v698_v60  ;;  %v5742_v34 = vsel %vm639_vm2, %v701_v38, %v703_v6  ;;  %v375_v60 = vmul.f32 %v5187_v1, %v336_v47  ;;  %2327 = vst.msk [vmem:[#allocation3 + $0xd8] sm:$0xff] %vm1627_vm3, %v9588_v36  ;;  %v337_v38 = vld [vmem:[%s5194_s13 + $0xf8] sm:$0xff]  ;;  %v5826_v47 = vld [vmem:[#allocation2 + $0x160] sm:$0x3] }
  0x5b   : > { %871 = vrot.lane.b32.xlu0 %v5683_v46, %s4998_s16  ;;  %v5713_v46 = vld [vmem:[#allocation2 + $0x158] sm:$0xff]  ;;  %9584 = vst [vmem:[#allocation52_spill] sm:$0xff] %v5723_v52  ;;  %9585 = vst [vmem:[#allocation53_spill] sm:$0xff] %v5726_v56  ;;  %v715_v18 = vrot.slane %v5731_v4, 1  ;;  %v376_v6 = vmul.f32 %v5187_v1, %v337_v38  ;;  %v9593_v1 = vrot.slane %v5692_v30, 1 }
  0x5c   : > { %865 = vrot.lane.b32.xlu1 %v5686_v42, %s4998_s16  ;;  %v710_v42 = vrot.slane %v5711_v57, 1  ;;  %v9390_v20 = vrot.slane %v5713_v46, 1  ;;  %9586 = vst [vmem:[#allocation54_spill] sm:$0xff] %v5742_v34  ;;  %2328 = vst.msk [vmem:[#allocation3 + $0xe0] sm:$0xff] %vm1627_vm3, %v9588_v36 }
  0x5d   : > { %2330 = vst.msk [vmem:[#allocation3 + $0xf0] sm:$0xff] %vm1627_vm3, %v9588_v36  ;;  %2331 = vst.msk [vmem:[#allocation3 + $0xf8] sm:$0xff] %vm1627_vm3, %v9588_v36 }
  0x5e   : > { %v5748_v26 = vsel %vm639_vm2, %v710_v42, %v9390_v20  ;;  %2333 = vst.msk [vmem:[#allocation3 + $0x108] sm:$0xff] %vm1627_vm3, %v9588_v36  ;;  %2334 = vst.msk [vmem:[#allocation3 + $0x110] sm:$0xff] %vm1627_vm3, %v9588_v36  ;;  %v5829_v42 = vadd.f32 %v5199_v2, %v375_v60  ;;  %v721_v20 = vrot.slane %v5210_v12, 2  ;;  %v5853_v12 = vld [vmem:[#allocation2 + $0x178] sm:$0x3] }
  0x5f   : > { %875 = vrot.lane.b32.xlu0 %v5704_v25, %s4998_s16  ;;  %v5733_v25 = vld [vmem:[#allocation2 + $0x170] sm:$0xff]  ;;  %9587 = vst [vmem:[#allocation55_spill] sm:$0xff] %v5748_v26  ;;  %2336 = vst.msk [vmem:[#allocation3 + $0x120] sm:$0xff] %vm1627_vm3, %v9588_v36 }
  0x60   : > { %869 = vrot.lane.b32.xlu1 %v5701_v0, %s4998_s16  ;;  %v5735_v0 = vld [vmem:[#allocation2 + $0x148] sm:$0x3]  ;;  %2337 = vst.msk [vmem:[#allocation3 + $0x128] sm:$0xff] %vm1627_vm3, %v9588_v36  ;;  %2339 = vst.msk [vmem:[#allocation3 + $0x138] sm:$0xff] %vm1627_vm3, %v9588_v36  ;;  %v9398_v40 = vmax.f32 %v5829_v42, 0.0 }
  0x61   : > { %2340 = vst.msk [vmem:[#allocation3 + $0x140] sm:$0xff] %vm1627_vm3, %v9588_v36  ;;  %2342 = vst.msk [vmem:[#allocation3 + $0x150] sm:$0xff] %vm1627_vm3, %v9588_v36 }
  0x62   : > { %2343 = vst.msk [vmem:[#allocation3 + $0x158] sm:$0xff] %vm1627_vm3, %v9588_v36  ;;  %2345 = vst.msk [vmem:[#allocation3 + $0x168] sm:$0xff] %vm1627_vm3, %v9588_v36 }
  0x63   : > { %879 = vrot.lane.b32.xlu0 %v5723_v52, %s4998_s16  ;;  %v708_v52 = vrot.slane %v5735_v0, 1  ;;  %2346 = vst.msk [vmem:[#allocation3 + $0x170] sm:$0xff] %vm1627_vm3, %v9588_v36  ;;  %2348 = vst.msk [vmem:[#allocation3 + $0x180] sm:$0xff] %vm1627_vm3, %v9588_v36 }
  0x64   : > { %873 = vrot.lane.b32.xlu1 %v5726_v56, %s4998_s16  ;;  %2349 = vst.msk [vmem:[#allocation3 + $0x188] sm:$0xff] %vm1627_vm3, %v9588_v36  ;;  %2351 = vst.msk [vmem:[#allocation3 + $0x198] sm:$0xff] %vm1627_vm3, %v9588_v36  ;;  %v9591_v56 = vrot.slane %v5733_v25, 1 }
  0x65   : > { %2352 = vst.msk [vmem:[#allocation3 + $0x1a0] sm:$0xff] %vm1627_vm3, %v9588_v36  ;;  %9589 = vst [vmem:[#allocation56_spill] sm:$0xff] %v5829_v42  ;;  %v5839_v36 = vadd.f32 %v5199_v2, %v376_v6  ;;  %v5849_v38 = vsel %vm639_vm2, %v9593_v1, %v708_v52  ;;  %v9595_v52 = vrot.slane %v5713_v46, 1  ;;  %v727_v6 = vrot.slane %v5355_v29, 2 }
  0x66   : > { %v5844_v60 = vsel %vm639_vm2, %v715_v18, %v9591_v56  ;;  %9594 = vst [vmem:[#allocation59_spill] sm:$0xff] %v5849_v38  ;;  %535 = vst.msk [vmem:[#allocation2 + $0x181] sm:$0xff] %vm448_vm0, %v9398_v40  ;;  %v726_v18 = vrot.slane %v5353_v28, 2  ;;  %v718_v1 = vrot.slane %v5853_v12, 1  ;;  %v731_v40 = vrot.slane %v5333_v17, 2 }
  0x67   : > { %883 = vrot.lane.b32.xlu0 %v5748_v26, %s4998_s16  ;;  %9590 = vst [vmem:[#allocation57_spill] sm:$0xff] %v5839_v36  ;;  %9592 = vst [vmem:[#allocation58_spill] sm:$0xff] %v5844_v60  ;;  %v722_v26 = vrot.slane %v5212_v13, 2  ;;  %v9399_v2 = vmax.f32 %v5839_v36, 0.0  ;;  %v724_v36 = vrot.slane %v5214_v14, 2 }
  0x68   : > { %877 = vrot.lane.b32.xlu1 %v5742_v34, %s4998_s16  ;;  %v713_v34 = vrot.slane %v5826_v47, 1 }
  0x69   : > { %536 = vst.msk [vmem:[#allocation2 + $0x189] sm:$0xff] %vm448_vm0, %v9399_v2  ;;  %v723_v13 = vsel %vm720_vm4, %v721_v20, %v722_v26  ;;  %v5880_v2 = vsel %vm720_vm4, %v726_v18, %v727_v6  ;;  %v9598_v20 = vrot.slane %v5733_v25, 1  ;;  %v737_v18 = vrot.slane %v5372_v44, 2 }
  0x6a   : > { %v5871_v56 = vsel %vm639_vm2, %v9595_v52, %v713_v34  ;;  %9597 = vst [vmem:[#allocation61_spill] sm:$0xff] %v5880_v2  ;;  %v732_v52 = vrot.slane %v5350_v22, 2 }
  0x6b   : > { %887 = vrot.lane.b32.xlu0 %v5844_v60, %s4998_s16  ;;  %9596 = vst [vmem:[#allocation60_spill] sm:$0xff] %v5871_v56  ;;  %v5885_v34 = vsel %vm639_vm2, %v9598_v20, %v718_v1  ;;  %v725_v1 = vsel %vm720_vm4, %v722_v26, %v724_v36  ;;  %v729_v20 = vrot.slane %v5379_v48, 2  ;;  %v746_v48 = vrot.slane %v5414_v8, 2 }
  0x6c   : > { %881 = vrot.lane.b32.xlu1 %v5849_v38, %s4998_s16  ;;  %9599 = vst [vmem:[#allocation62_spill] sm:$0xff] %v5885_v34  ;;  %v5896_v42 = vsel %vm720_vm4, %v731_v40, %v732_v52  ;;  %v742_v40 = vrot.slane %v5412_v9, 2  ;;  %v747_v36 = vrot.slane %v5420_v63, 2 }
  0x6f   : > { %923 = vrot.lane.b32.xlu0 %v723_v13, %s4999_s17  ;;  %v736_v13 = vrot.slane %v5370_v43, 2 }
  0x70   : > { %885 = vrot.lane.b32.xlu1 %v5871_v56, %s4998_s16  ;;  %v734_v56 = vrot.slane %v5381_v49, 2  ;;  %v5930_v49 = vsel %vm720_vm4, %v746_v48, %v747_v36 }
  0x71   : > { %v5904_v14 = vsel %vm720_vm4, %v736_v13, %v737_v18  ;;  %v739_v13 = vrot.slane %v5397_v11, 2  ;;  %9600 = vst [vmem:[#allocation63_spill] sm:$0xff] %v5930_v49  ;;  %v756_v11 = vrot.slane %v5469_v5, 2 }
  0x73   : > { %927 = vrot.lane.b32.xlu0 %v5880_v2, %s4999_s17  ;;  %v741_v2 = vrot.slane %v5410_v10, 2 }
  0x74   : > { %889 = vrot.lane.b32.xlu1 %v5885_v34, %s4998_s16  ;;  %v5907_v34 = vsel %vm720_vm4, %v727_v6, %v729_v20  ;;  %v5922_v6 = vsel %vm720_vm4, %v732_v52, %v734_v56  ;;  %v752_v20 = vrot.slane %v5454_v19, 2  ;;  %v744_v56 = vrot.slane %v5456_v37, 2  ;;  %s5006_s16 = smov 40  }
  0x75   : > { %v5919_v26 = vsel %vm720_vm4, %v741_v2, %v742_v40  ;;  %v751_v2 = vrot.slane %v5445_v61, 2  ;;  %v757_v52 = vrot.slane %v5471_v16, 2 }
  0x77   : > { %931 = vrot.lane.b32.xlu0 %v5896_v42, %s4999_s17  ;;  %v5945_v48 = vsel %vm720_vm4, %v751_v2, %v752_v20  ;;  %v5956_v37 = vsel %vm720_vm4, %v756_v11, %v757_v52  ;;  %v761_v2 = vrot.slane %v5548_v62, 2  ;;  %v767_v11 = vrot.slane %v5598_v55, 2 }
  0x78   : > { %925 = vrot.lane.b32.xlu1 %v725_v1, %s4999_s17  ;;  %v5933_v1 = vsel %vm720_vm4, %v737_v18, %v739_v13  ;;  %v5948_v18 = vsel %vm720_vm4, %v742_v40, %v744_v56  ;;  %v749_v13 = vrot.slane %v5495_v3, 2  ;;  %v754_v40 = vrot.slane %v5534_v51, 2 }
  0x79   : > { %9601 = vst [vmem:[#allocation64_spill] sm:$0xff] %v5933_v1  ;;  %v766_v3 = vrot.slane %v5596_v54, 2  ;;  %v771_v51 = vrot.slane %v5630_v50, 2 }
  0x7b   : > { %935 = vrot.lane.b32.xlu0 %v5904_v14, %s4999_s17 }
  0x7c   : > { %929 = vrot.lane.b32.xlu1 %v5907_v34, %s4999_s17 }
  0x7f   : > { %939 = vrot.lane.b32.xlu0 %v5919_v26, %s4999_s17 }
  0x80   : > { %933 = vrot.lane.b32.xlu1 %v5922_v6, %s4999_s17 }
  0x83   : > { %943 = vrot.lane.b32.xlu0 %v5930_v49, %s4999_s17  ;;  %v762_v49 = vrot.slane %v5550_v33, 2 }
  0x84   : > { %937 = vrot.lane.b32.xlu1 %v5933_v1, %s4999_s17  ;;  %v5959_v1 = vsel %vm720_vm4, %v747_v36, %v749_v13  ;;  %v5973_v36 = vsel %vm720_vm4, %v752_v20, %v754_v40  ;;  %v759_v13 = vrot.slane %v5582_v39, 2  ;;  %v772_v20 = vrot.slane %v5632_v41, 2 }
  0x85   : > { %9602 = vst [vmem:[#allocation65_spill] sm:$0xff] %v5959_v1  ;;  %v5970_v56 = vsel %vm720_vm4, %v761_v2, %v762_v49  ;;  %9603 = vst [vmem:[#allocation66_spill] sm:$0xff] %v5973_v36  ;;  %v764_v40 = vrot.slane %v5625_v23, 2  ;;  %v776_v39 = vrot.slane %v5652_v32, 2  ;;  %v781_v23 = vrot.slane %v5673_v24, 2 }
  0x86   : > { %v5986_v2 = vsel %vm720_vm4, %v757_v52, %v759_v13  ;;  %v777_v52 = vrot.slane %v5654_v45, 2  ;;  %v769_v13 = vrot.slane %v5656_v21, 2  ;;  %v786_v21 = vrot.slane %v5690_v15, 2 }
  0x87   : > { %947 = vrot.lane.b32.xlu0 %v5945_v48, %s4999_s17  ;;  %9604 = vst [vmem:[#allocation67_spill] sm:$0xff] %v5986_v2 }
  0x88   : > { %941 = vrot.lane.b32.xlu1 %v5948_v18, %s4999_s17 }
  0x8b   : > { %951 = vrot.lane.b32.xlu0 %v5956_v37, %s4999_s17 }
  0x8c   : > { %945 = vrot.lane.b32.xlu1 %v5959_v1, %s4999_s17  ;;  %v5983_v1 = vsel %vm720_vm4, %v766_v3, %v767_v11  ;;  %v5999_v3 = vsel %vm720_vm4, %v762_v49, %v764_v40  ;;  %v782_v49 = vrot.slane %v5675_v7, 2  ;;  %v774_v40 = vrot.slane %v5671_v31, 2 }
  0x8d   : > { %9606 = vst [vmem:[#allocation69_spill] sm:$0xff] %v5999_v3  ;;  %v791_v31 = vrot.slane %v5711_v57, 2 }
  0x8f   : > { %955 = vrot.lane.b32.xlu0 %v5970_v56, %s4999_s17 }
  0x90   : > { %949 = vrot.lane.b32.xlu1 %v5973_v36, %s4999_s17  ;;  %v5996_v36 = vsel %vm720_vm4, %v771_v51, %v772_v20  ;;  %v6012_v51 = vsel %vm720_vm4, %v767_v11, %v769_v13  ;;  %v787_v11 = vrot.slane %v5692_v30, 2  ;;  %v779_v13 = vrot.slane %v5694_v35, 2 }
  0x91   : > { %9605 = vst [vmem:[#allocation68_spill] sm:$0xff] %v5996_v36  ;;  %v784_v35 = vrot.slane %v5709_v53, 2  ;;  %v789_v53 = vrot.slane %v5735_v0, 2 }
  0x93   : > { %959 = vrot.lane.b32.xlu0 %v5983_v1, %s4999_s17 }
  0x94   : > { %953 = vrot.lane.b32.xlu1 %v5986_v2, %s4999_s17  ;;  %v6009_v2 = vsel %vm720_vm4, %v776_v39, %v777_v52  ;;  %v6025_v39 = vsel %vm720_vm4, %v772_v20, %v774_v40  ;;  %v6040_v20 = vsel %vm720_vm4, %v777_v52, %v779_v13  ;;  %v792_v40 = vrot.slane %v5713_v46, 2 }
  0x95   : > { %9607 = vst [vmem:[#allocation70_spill] sm:$0xff] %v6009_v2  ;;  %9609 = vst [vmem:[#allocation72_spill] sm:$0xff] %v6025_v39  ;;  %v6055_v52 = vsel %vm720_vm4, %v782_v49, %v784_v35  ;;  %v797_v13 = vrot.slane %v5733_v25, 2 }
  0x96   : > { %9612 = vst [vmem:[#allocation75_spill] sm:$0xff] %v6040_v20  ;;  %9615 = vst [vmem:[#allocation78_spill] sm:$0xff] %v6055_v52 }
  0x97   : > { %963 = vrot.lane.b32.xlu0 %v5996_v36, %s4999_s17  ;;  %v6029_v36 = vpop.permute.xlu0 %827 }
  0x98   : > { %957 = vrot.lane.b32.xlu1 %v5999_v3, %s4999_s17  ;;  %v6022_v3 = vsel %vm720_vm4, %v781_v23, %v782_v49  ;;  %9610 = vst [vmem:[#allocation73_spill] sm:$0xff] %v6029_v36  ;;  %v6037_v23 = vsel %vm720_vm4, %v786_v21, %v787_v11  ;;  %v6052_v21 = vsel %vm720_vm4, %v791_v31, %v792_v40  ;;  %v794_v31 = vrot.slane %v5826_v47, 2 }
  0x99   : > { %9608 = vst [vmem:[#allocation71_spill] sm:$0xff] %v6022_v3  ;;  %9611 = vst [vmem:[#allocation74_spill] sm:$0xff] %v6037_v23 }
  0x9a   : > { %9614 = vst [vmem:[#allocation77_spill] sm:$0xff] %v6052_v21  ;;  %v6079_v0 = vsel %vm720_vm4, %v792_v40, %v794_v31 }
  0x9b   : > { %967 = vrot.lane.b32.xlu0 %v6009_v2, %s4999_s17 }
  0x9c   : > { %961 = vrot.lane.b32.xlu1 %v6012_v51, %s4999_s17 }
  0x9d   : > { %v6048_v36 = vpop.permute.xlu0 %829 }
  0x9e   : > { %9613 = vst [vmem:[#allocation76_spill] sm:$0xff] %v6048_v36 }
  0x9f   : > { %971 = vrot.lane.b32.xlu0 %v6022_v3, %s4999_s17 }
  0xa0   : > { %965 = vrot.lane.b32.xlu1 %v6025_v39, %s4999_s17  ;;  %v796_v39 = vrot.slane %v5731_v4, 2 }
  0xa2   : > { %v6064_v36 = vsel %vm720_vm4, %v796_v39, %v797_v13  ;;  %v799_v39 = vrot.slane %v5853_v12, 2 }
  0xa3   : > { %975 = vrot.lane.b32.xlu0 %v6037_v23, %s4999_s17  ;;  %9616 = vst [vmem:[#allocation79_spill] sm:$0xff] %v6064_v36 }
  0xa4   : > { %969 = vrot.lane.b32.xlu1 %v6040_v20, %s4999_s17  ;;  %v6067_v20 = vsel %vm720_vm4, %v787_v11, %v789_v53  ;;  %v6091_v47 = vsel %vm720_vm4, %v797_v13, %v799_v39 }
  0xa5   : > { %9617 = vst [vmem:[#allocation80_spill] sm:$0xff] %v6067_v20 }
  0xa7   : > { %979 = vrot.lane.b32.xlu0 %v6052_v21, %s4999_s17 }
  0xa8   : > { %973 = vrot.lane.b32.xlu1 %v6055_v52, %s4999_s17 }
  0xa9   : > { %v6070_v49 = vpop.permute.xlu0 %835 }
  0xaa   : > { %9618 = vst [vmem:[#allocation81_spill] sm:$0xff] %v6070_v49  ;;  %v6072_v35 = vpop.permute.xlu1 %831 }
  0xab   : > { %9619 = vst [vmem:[#allocation82_spill] sm:$0xff] %v6072_v35  ;;  %983 = vrot.lane.b32.xlu0 %v6064_v36, %s4999_s17  ;;  %v9698_v35 = vld [vmem:[#allocation53_spill] sm:$0xff] }
  0xac   : > { %977 = vrot.lane.b32.xlu1 %v6067_v20, %s4999_s17 }
  0xad   : > { %v6082_v52 = vpop.permute.xlu0 %839 }
  0xae   : > { %9620 = vst [vmem:[#allocation83_spill] sm:$0xff] %v6082_v52  ;;  %v6084_v11 = vpop.permute.xlu1 %833 }
  0xaf   : > { %9621 = vst [vmem:[#allocation84_spill] sm:$0xff] %v6084_v11  ;;  %1019 = vrot.lane.b32.xlu0 %v5353_v28, %s5000_s18  ;;  %v9690_v11 = vld [vmem:[#allocation49_spill] sm:$0xff] }
  0xb0   : > { %981 = vrot.lane.b32.xlu1 %v6079_v0, %s4999_s17 }
  0xb1   : > { %v6093_v53 = vpop.permute.xlu0 %843 }
  0xb2   : > { %9622 = vst [vmem:[#allocation85_spill] sm:$0xff] %v6093_v53  ;;  %v6095_v40 = vpop.permute.xlu1 %837 }
  0xb3   : > { %9623 = vst [vmem:[#allocation86_spill] sm:$0xff] %v6095_v40  ;;  %1023 = vrot.lane.b32.xlu0 %v5333_v17, %s5000_s18  ;;  %v9682_v40 = vld [vmem:[#allocation45_spill] sm:$0xff] }
  0xb4   : > { %985 = vrot.lane.b32.xlu1 %v6091_v47, %s4999_s17 }
  0xb5   : > { %v6101_v12 = vpop.permute.xlu0 %847 }
  0xb6   : > { %9624 = vst [vmem:[#allocation87_spill] sm:$0xff] %v6101_v12  ;;  %v6103_v31 = vpop.permute.xlu1 %841  ;;  %v9666_v12 = vld [vmem:[#allocation26_spill] sm:$0xff] }
  0xb7   : > { %9625 = vst [vmem:[#allocation88_spill] sm:$0xff] %v6103_v31  ;;  %1027 = vrot.lane.b32.xlu0 %v5370_v43, %s5000_s18  ;;  %v9674_v31 = vld [vmem:[#allocation37_spill] sm:$0xff] }
  0xb8   : > { %1021 = vrot.lane.b32.xlu1 %v5355_v29, %s5000_s18 }
  0xb9   : > { %v6109_v28 = vpop.permute.xlu0 %851 }
  0xba   : > { %9626 = vst [vmem:[#allocation89_spill] sm:$0xff] %v6109_v28  ;;  %v6111_v13 = vpop.permute.xlu1 %845 }
  0xbb   : > { %9627 = vst [vmem:[#allocation90_spill] sm:$0xff] %v6111_v13  ;;  %1031 = vrot.lane.b32.xlu0 %v5410_v10, %s5000_s18  ;;  %v9665_v13 = vld [vmem:[#allocation29_spill] sm:$0xff] }
  0xbc   : > { %1025 = vrot.lane.b32.xlu1 %v5350_v22, %s5000_s18 }
  0xbd   : > { %v6117_v17 = vpop.permute.xlu0 %855 }
  0xbe   : > { %9628 = vst [vmem:[#allocation91_spill] sm:$0xff] %v6117_v17  ;;  %v6119_v39 = vpop.permute.xlu1 %849  ;;  %v9661_v17 = vld [vmem:[#allocation24_spill] sm:$0xff] }
  0xbf   : > { %9629 = vst [vmem:[#allocation92_spill] sm:$0xff] %v6119_v39  ;;  %1035 = vrot.lane.b32.xlu0 %v5414_v8, %s5000_s18  ;;  %v9662_v39 = vld [vmem:[#allocation25_spill] sm:$0xff] }
  0xc0   : > { %1029 = vrot.lane.b32.xlu1 %v5372_v44, %s5000_s18 }
  0xc1   : > { %v6125_v29 = vpop.permute.xlu0 %859 }
  0xc2   : > { %9630 = vst [vmem:[#allocation93_spill] sm:$0xff] %v6125_v29  ;;  %v6127_v43 = vpop.permute.xlu1 %853 }
  0xc3   : > { %9631 = vst [vmem:[#allocation94_spill] sm:$0xff] %v6127_v43  ;;  %1039 = vrot.lane.b32.xlu0 %v5445_v61, %s5000_s18 }
  0xc4   : > { %1033 = vrot.lane.b32.xlu1 %v5412_v9, %s5000_s18 }
  0xc5   : > { %v6133_v10 = vpop.permute.xlu0 %863 }
  0xc6   : > { %9632 = vst [vmem:[#allocation95_spill] sm:$0xff] %v6133_v10  ;;  %v6135_v22 = vpop.permute.xlu1 %857 }
  0xc7   : > { %9633 = vst [vmem:[#allocation96_spill] sm:$0xff] %v6135_v22  ;;  %1043 = vrot.lane.b32.xlu0 %v5469_v5, %s5000_s18 }
  0xc8   : > { %1037 = vrot.lane.b32.xlu1 %v5420_v63, %s5000_s18 }
  0xc9   : > { %v6141_v8 = vpop.permute.xlu0 %867 }
  0xca   : > { %9634 = vst [vmem:[#allocation97_spill] sm:$0xff] %v6141_v8  ;;  %v6143_v44 = vpop.permute.xlu1 %861 }
  0xcb   : > { %9635 = vst [vmem:[#allocation98_spill] sm:$0xff] %v6143_v44  ;;  %1047 = vrot.lane.b32.xlu0 %v5548_v62, %s5000_s18 }
  0xcc   : > { %1041 = vrot.lane.b32.xlu1 %v5454_v19, %s5000_s18 }
  0xcd   : > { %v6149_v61 = vpop.permute.xlu0 %871 }
  0xce   : > { %9636 = vst [vmem:[#allocation99_spill] sm:$0xff] %v6149_v61  ;;  %v6151_v9 = vpop.permute.xlu1 %865 }
  0xcf   : > { %9637 = vst [vmem:[#allocation100_spill] sm:$0xff] %v6151_v9  ;;  %1051 = vrot.lane.b32.xlu0 %v5596_v54, %s5000_s18  ;;  %v6223_v9 = vld [vmem:[#allocation2 + $0x188] sm:$0xff] }
  0xd0   : > { %1045 = vrot.lane.b32.xlu1 %v5471_v16, %s5000_s18 }
  0xd1   : > { %v6157_v63 = vpop.permute.xlu0 %875 }
  0xd2   : > { %9638 = vst [vmem:[#allocation101_spill] sm:$0xff] %v6157_v63  ;;  %v6159_v5 = vpop.permute.xlu1 %869 }
  0xd3   : > { %9639 = vst [vmem:[#allocation102_spill] sm:$0xff] %v6159_v5  ;;  %1055 = vrot.lane.b32.xlu0 %v5630_v50, %s5000_s18 }
  0xd4   : > { %1049 = vrot.lane.b32.xlu1 %v5550_v33, %s5000_s18 }
  0xd5   : > { %v6165_v19 = vpop.permute.xlu0 %879 }
  0xd6   : > { %9640 = vst [vmem:[#allocation103_spill] sm:$0xff] %v6165_v19  ;;  %v6167_v62 = vpop.permute.xlu1 %873 }
  0xd7   : > { %9641 = vst [vmem:[#allocation104_spill] sm:$0xff] %v6167_v62  ;;  %1059 = vrot.lane.b32.xlu0 %v5652_v32, %s5000_s18 }
  0xd8   : > { %1053 = vrot.lane.b32.xlu1 %v5598_v55, %s5000_s18 }
  0xd9   : > { %v6173_v16 = vpop.permute.xlu0 %883 }
  0xda   : > { %9642 = vst [vmem:[#allocation105_spill] sm:$0xff] %v6173_v16  ;;  %v6175_v63 = vpop.permute.xlu1 %877 }
  0xdb   : > { %9643 = vst [vmem:[#allocation106_spill] sm:$0xff] %v6175_v63  ;;  %1063 = vrot.lane.b32.xlu0 %v5673_v24, %s5000_s18 }
  0xdc   : > { %1057 = vrot.lane.b32.xlu1 %v5632_v41, %s5000_s18 }
  0xdd   : > { %v6181_v33 = vpop.permute.xlu0 %887 }
  0xde   : > { %9644 = vst [vmem:[#allocation107_spill] sm:$0xff] %v6181_v33  ;;  %v6183_v19 = vpop.permute.xlu1 %881 }
  0xdf   : > { %9645 = vst [vmem:[#allocation108_spill] sm:$0xff] %v6183_v19  ;;  %1067 = vrot.lane.b32.xlu0 %v5690_v15, %s5000_s18  ;;  %v6205_v19 = vld [vmem:[#allocation2 + $0x180] sm:$0xff] }
  0xe0   : > { %1061 = vrot.lane.b32.xlu1 %v5654_v45, %s5000_s18 }
  0xe1   : > { %v6189_v62 = vpop.permute.xlu0 %923 }
  0xe2   : > { %9646 = vst [vmem:[#allocation109_spill] sm:$0xff] %v6189_v62  ;;  %v6191_v16 = vpop.permute.xlu1 %885 }
  0xe3   : > { %9647 = vst [vmem:[#allocation110_spill] sm:$0xff] %v6191_v16  ;;  %1071 = vrot.lane.b32.xlu0 %v5711_v57, %s5000_s18 }
  0xe4   : > { %1065 = vrot.lane.b32.xlu1 %v5675_v7, %s5000_s18 }
  0xe5   : > { %v6197_v63 = vpop.permute.xlu0 %927 }
  0xe6   : > { %9648 = vst [vmem:[#allocation111_spill] sm:$0xff] %v6197_v63  ;;  %v6199_v33 = vpop.permute.xlu1 %889  ;;  %v9694_v63 = vld [vmem:[#allocation50_spill] sm:$0xff] }
  0xe7   : > { %9649 = vst [vmem:[#allocation112_spill] sm:$0xff] %v6199_v33  ;;  %1075 = vrot.lane.b32.xlu0 %v5731_v4, %s5000_s18 }
  0xe8   : > { %1069 = vrot.lane.b32.xlu1 %v5692_v30, %s5000_s18 }
  0xe9   : > { %v6207_v5 = vpop.permute.xlu0 %931 }
  0xea   : > { %9650 = vst [vmem:[#allocation113_spill] sm:$0xff] %v6207_v5  ;;  %v6209_v16 = vpop.permute.xlu1 %925 }
  0xeb   : > { %9651 = vst [vmem:[#allocation114_spill] sm:$0xff] %v6209_v16  ;;  %1079 = vrot.lane.b32.xlu0 %v6205_v19, %s5000_s18 }
  0xec   : > { %1073 = vrot.lane.b32.xlu1 %v5713_v46, %s5000_s18 }
  0xed   : > { %v6215_v61 = vpop.permute.xlu0 %935 }
  0xee   : > { %9652 = vst [vmem:[#allocation115_spill] sm:$0xff] %v6215_v61  ;;  %v6217_v33 = vpop.permute.xlu1 %929 }
  0xef   : > { %9653 = vst [vmem:[#allocation116_spill] sm:$0xff] %v6217_v33  ;;  %1115 = vrot.lane.b32.xlu0 %v5388_v59, %s5001_s19  ;;  %v9658_v59 = vld [vmem:[#allocation22_spill] sm:$0xff] }
  0xf0   : > { %1077 = vrot.lane.b32.xlu1 %v5733_v25, %s5000_s18  ;;  %v9686_v33 = vld [vmem:[#allocation46_spill] sm:$0xff] }
  0xf1   : > { %v6225_v8 = vpop.permute.xlu0 %939 }
  0xf2   : > { %9654 = vst [vmem:[#allocation117_spill] sm:$0xff] %v6225_v8  ;;  %v6227_v44 = vpop.permute.xlu1 %933 }
  0xf3   : > { %9655 = vst [vmem:[#allocation118_spill] sm:$0xff] %v6227_v44  ;;  %1119 = vrot.lane.b32.xlu0 %v5385_v58, %s5001_s19  ;;  %v9678_v44 = vld [vmem:[#allocation43_spill] sm:$0xff] }
  0xf4   : > { %1081 = vrot.lane.b32.xlu1 %v6223_v9, %s5000_s18 }
  0xf5   : > { %v6233_v10 = vpop.permute.xlu0 %943 }
  0xf6   : > { %9656 = vst [vmem:[#allocation119_spill] sm:$0xff] %v6233_v10  ;;  %v6235_v22 = vpop.permute.xlu1 %937 }
  0xf7   : > { %9657 = vst [vmem:[#allocation120_spill] sm:$0xff] %v6235_v22  ;;  %1123 = vrot.lane.b32.xlu0 %v5405_v27, %s5001_s19  ;;  %v9670_v22 = vld [vmem:[#allocation33_spill] sm:$0xff] }
  0xf8   : > { %1117 = vrot.lane.b32.xlu1 %v9658_v59, %s5001_s19 }
  0xf9   : > { %v6241_v29 = vpop.permute.xlu0 %947 }
  0xfa   : > { %9659 = vst [vmem:[#allocation22_spill] sm:$0xff] %v6241_v29  ;;  %v6243_v43 = vpop.permute.xlu1 %941 }
  0xfb   : > { %9660 = vst [vmem:[#allocation121_spill] sm:$0xff] %v6243_v43  ;;  %1127 = vrot.lane.b32.xlu0 %v9661_v17, %s5001_s19  ;;  %v9669_v43 = vld [vmem:[#allocation32_spill] sm:$0xff] }
  0xfc   : > { %1121 = vrot.lane.b32.xlu1 %v9662_v39, %s5001_s19 }
  0xfd   : > { %v6249_v28 = vpop.permute.xlu0 %951 }
  0xfe   : > { %9663 = vst [vmem:[#allocation24_spill] sm:$0xff] %v6249_v28  ;;  %v6251_v10 = vpop.permute.xlu1 %945 }
  0xff   : > { %9664 = vst [vmem:[#allocation25_spill] sm:$0xff] %v6251_v10  ;;  %1131 = vrot.lane.b32.xlu0 %v9665_v13, %s5001_s19  ;;  %v9673_v10 = vld [vmem:[#allocation36_spill] sm:$0xff] }
 0x100   : > { %1125 = vrot.lane.b32.xlu1 %v9666_v12, %s5001_s19 }
 0x101   : > { %v6257_v59 = vpop.permute.xlu0 %955 }
 0x102   : > { %9667 = vst [vmem:[#allocation29_spill] sm:$0xff] %v6257_v59  ;;  %v6259_v29 = vpop.permute.xlu1 %949 }
 0x103   : > { %9668 = vst [vmem:[#allocation26_spill] sm:$0xff] %v6259_v29  ;;  %1135 = vrot.lane.b32.xlu0 %v9669_v43, %s5001_s19  ;;  %v9677_v29 = vld [vmem:[#allocation42_spill] sm:$0xff] }
 0x104   : > { %1129 = vrot.lane.b32.xlu1 %v9670_v22, %s5001_s19 }
 0x105   : > { %v6265_v8 = vpop.permute.xlu0 %959 }
 0x106   : > { %9671 = vst [vmem:[#allocation32_spill] sm:$0xff] %v6265_v8  ;;  %v6267_v28 = vpop.permute.xlu1 %953 }
 0x107   : > { %9672 = vst [vmem:[#allocation33_spill] sm:$0xff] %v6267_v28  ;;  %1139 = vrot.lane.b32.xlu0 %v9673_v10, %s5001_s19  ;;  %v9681_v28 = vld [vmem:[#allocation44_spill] sm:$0xff] }
 0x108   : > { %1133 = vrot.lane.b32.xlu1 %v9674_v31, %s5001_s19 }
 0x109   : > { %v6273_v53 = vpop.permute.xlu0 %963 }
 0x10a   : > { %9675 = vst [vmem:[#allocation36_spill] sm:$0xff] %v6273_v53  ;;  %v6275_v59 = vpop.permute.xlu1 %957 }
 0x10b   : > { %9676 = vst [vmem:[#allocation37_spill] sm:$0xff] %v6275_v59  ;;  %1143 = vrot.lane.b32.xlu0 %v9677_v29, %s5001_s19  ;;  %v9685_v59 = vld [vmem:[#allocation47_spill] sm:$0xff] }
 0x10c   : > { %1137 = vrot.lane.b32.xlu1 %v9678_v44, %s5001_s19 }
 0x10d   : > { %v6281_v61 = vpop.permute.xlu0 %967 }
 0x10e   : > { %9679 = vst [vmem:[#allocation42_spill] sm:$0xff] %v6281_v61  ;;  %v6283_v8 = vpop.permute.xlu1 %961 }
 0x10f   : > { %9680 = vst [vmem:[#allocation43_spill] sm:$0xff] %v6283_v8  ;;  %1147 = vrot.lane.b32.xlu0 %v9681_v28, %s5001_s19  ;;  %v9689_v8 = vld [vmem:[#allocation48_spill] sm:$0xff] }
 0x110   : > { %1141 = vrot.lane.b32.xlu1 %v9682_v40, %s5001_s19 }
 0x111   : > { %v6289_v5 = vpop.permute.xlu0 %971 }
 0x112   : > { %9683 = vst [vmem:[#allocation44_spill] sm:$0xff] %v6289_v5  ;;  %v6291_v53 = vpop.permute.xlu1 %965 }
 0x113   : > { %9684 = vst [vmem:[#allocation45_spill] sm:$0xff] %v6291_v53  ;;  %1151 = vrot.lane.b32.xlu0 %v9685_v59, %s5001_s19  ;;  %v9693_v53 = vld [vmem:[#allocation51_spill] sm:$0xff] }
 0x114   : > { %1145 = vrot.lane.b32.xlu1 %v9686_v33, %s5001_s19 }
 0x115   : > { %v6297_v52 = vpop.permute.xlu0 %975 }
 0x116   : > { %9687 = vst [vmem:[#allocation47_spill] sm:$0xff] %v6297_v52  ;;  %v6299_v61 = vpop.permute.xlu1 %969 }
 0x117   : > { %9688 = vst [vmem:[#allocation46_spill] sm:$0xff] %v6299_v61  ;;  %1155 = vrot.lane.b32.xlu0 %v9689_v8, %s5001_s19  ;;  %v9697_v61 = vld [vmem:[#allocation52_spill] sm:$0xff] }
 0x118   : > { %1149 = vrot.lane.b32.xlu1 %v9690_v11, %s5001_s19 }
 0x119   : > { %v6305_v49 = vpop.permute.xlu0 %979 }
 0x11a   : > { %9691 = vst [vmem:[#allocation49_spill] sm:$0xff] %v6305_v49  ;;  %v6307_v5 = vpop.permute.xlu1 %973 }
 0x11b   : > { %9692 = vst [vmem:[#allocation122_spill] sm:$0xff] %v6307_v5  ;;  %1159 = vrot.lane.b32.xlu0 %v9693_v53, %s5001_s19  ;;  %v9701_v5 = vld [vmem:[#allocation55_spill] sm:$0xff]  ;;  %v9702_v53 = vld [vmem:[#allocation54_spill] sm:$0xff] }
 0x11c   : > { %1153 = vrot.lane.b32.xlu1 %v9694_v63, %s5001_s19 }
 0x11d   : > { %v6313_v16 = vpop.permute.xlu0 %983 }
 0x11e   : > { %9695 = vst [vmem:[#allocation123_spill] sm:$0xff] %v6313_v16  ;;  %v6315_v52 = vpop.permute.xlu1 %977  ;;  %v804_v16 = vrot.slane %v6205_v19, 1 }
 0x11f   : > { %9696 = vst [vmem:[#allocation124_spill] sm:$0xff] %v6315_v52  ;;  %1163 = vrot.lane.b32.xlu0 %v9697_v61, %s5001_s19  ;;  %v805_v52 = vrot.slane %v6223_v9, 1 }
 0x120   : > { %1157 = vrot.lane.b32.xlu1 %v9698_v35, %s5001_s19 }
 0x121   : > { %v6321_v62 = vpop.permute.xlu0 %1019 }
 0x122   : > { %9699 = vst [vmem:[#allocation125_spill] sm:$0xff] %v6321_v62  ;;  %v6323_v49 = vpop.permute.xlu1 %981 }
 0x123   : > { %9700 = vst [vmem:[#allocation126_spill] sm:$0xff] %v6323_v49  ;;  %1167 = vrot.lane.b32.xlu0 %v9701_v5, %s5001_s19  ;;  %v6340_v49 = vsel %vm639_vm2, %v804_v16, %v805_v52  ;;  %v9711_v16 = vld [vmem:[#allocation61_spill] sm:$0xff] }
 0x124   : > { %1161 = vrot.lane.b32.xlu1 %v9702_v53, %s5001_s19  ;;  %9705 = vst [vmem:[#allocation129_spill] sm:$0xff] %v6340_v49  ;;  %v6346_v53 = vld [vmem:[#allocation2 + $0x190] sm:$0x3] }
 0x125   : > { %v6331_v63 = vpop.permute.xlu0 %1023 }
 0x126   : > { %9703 = vst [vmem:[#allocation127_spill] sm:$0xff] %v6331_v63  ;;  %v6333_v61 = vpop.permute.xlu1 %985  ;;  %v807_v63 = vrot.slane %v6346_v53, 1 }
 0x127   : > { %9704 = vst [vmem:[#allocation128_spill] sm:$0xff] %v6333_v61  ;;  %1171 = vrot.lane.b32.xlu0 %v5844_v60, %s5001_s19  ;;  %v9708_v61 = vld [vmem:[#allocation60_spill] sm:$0xff] }
 0x128   : > { %1165 = vrot.lane.b32.xlu1 %v5849_v38, %s5001_s19 }
 0x129   : > { %v6342_v62 = vpop.permute.xlu0 %1027 }
 0x12a   : > { %9706 = vst [vmem:[#allocation130_spill] sm:$0xff] %v6342_v62  ;;  %v6344_v5 = vpop.permute.xlu1 %1021  ;;  %v9712_v62 = vld [vmem:[#allocation62_spill] sm:$0xff] }
 0x12b   : > { %9707 = vst [vmem:[#allocation131_spill] sm:$0xff] %v6344_v5  ;;  %1175 = vrot.lane.b32.xlu0 %v6340_v49, %s5001_s19  ;;  %v6362_v5 = vsel %vm639_vm2, %v805_v52, %v807_v63 }
 0x12c   : > { %1169 = vrot.lane.b32.xlu1 %v9708_v61, %s5001_s19  ;;  %9713 = vst [vmem:[#allocation61_spill] sm:$0xff] %v6362_v5  ;;  %v9738_v61 = vld [vmem:[#allocation69_spill] sm:$0xff] }
 0x12d   : > { %v6353_v60 = vpop.permute.xlu0 %1031 }
 0x12e   : > { %9709 = vst [vmem:[#allocation132_spill] sm:$0xff] %v6353_v60  ;;  %v6355_v38 = vpop.permute.xlu1 %1025 }
 0x12f   : > { %9710 = vst [vmem:[#allocation133_spill] sm:$0xff] %v6355_v38  ;;  %1211 = vrot.lane.b32.xlu0 %v9711_v16, %s5002_s20 }
 0x130   : > { %1173 = vrot.lane.b32.xlu1 %v9712_v62, %s5001_s19 }
 0x131   : > { %v6364_v49 = vpop.permute.xlu0 %1035 }
 0x132   : > { %9714 = vst [vmem:[#allocation134_spill] sm:$0xff] %v6364_v49  ;;  %v6366_v35 = vpop.permute.xlu1 %1029  ;;  %v9723_v49 = vld [vmem:[#allocation64_spill] sm:$0xff] }
 0x133   : > { %9715 = vst [vmem:[#allocation135_spill] sm:$0xff] %v6366_v35  ;;  %1215 = vrot.lane.b32.xlu0 %v5896_v42, %s5002_s20 }
 0x134   : > { %1177 = vrot.lane.b32.xlu1 %v6362_v5, %s5001_s19 }
 0x135   : > { %v6372_v60 = vpop.permute.xlu0 %1039 }
 0x136   : > { %9716 = vst [vmem:[#allocation136_spill] sm:$0xff] %v6372_v60  ;;  %v6374_v38 = vpop.permute.xlu1 %1033 }
 0x137   : > { %9717 = vst [vmem:[#allocation137_spill] sm:$0xff] %v6374_v38  ;;  %1219 = vrot.lane.b32.xlu0 %v5904_v14, %s5002_s20  ;;  %v9722_v38 = vld [vmem:[#allocation63_spill] sm:$0xff] }
 0x138   : > { %1213 = vrot.lane.b32.xlu1 %v5907_v34, %s5002_s20 }
 0x139   : > { %v6380_v52 = vpop.permute.xlu0 %1043 }
 0x13a   : > { %9718 = vst [vmem:[#allocation138_spill] sm:$0xff] %v6380_v52  ;;  %v6382_v63 = vpop.permute.xlu1 %1037 }
 0x13b   : > { %9719 = vst [vmem:[#allocation139_spill] sm:$0xff] %v6382_v63  ;;  %1223 = vrot.lane.b32.xlu0 %v5919_v26, %s5002_s20 }
 0x13c   : > { %1217 = vrot.lane.b32.xlu1 %v5922_v6, %s5002_s20 }
 0x13d   : > { %v6388_v16 = vpop.permute.xlu0 %1047 }
 0x13e   : > { %9720 = vst [vmem:[#allocation140_spill] sm:$0xff] %v6388_v16  ;;  %v6390_v60 = vpop.permute.xlu1 %1041 }
 0x13f   : > { %9721 = vst [vmem:[#allocation141_spill] sm:$0xff] %v6390_v60  ;;  %1227 = vrot.lane.b32.xlu0 %v9722_v38, %s5002_s20  ;;  %v9728_v60 = vld [vmem:[#allocation65_spill] sm:$0xff] }
 0x140   : > { %1221 = vrot.lane.b32.xlu1 %v9723_v49, %s5002_s20 }
 0x141   : > { %v6396_v34 = vpop.permute.xlu0 %1051 }
 0x142   : > { %9724 = vst [vmem:[#allocation63_spill] sm:$0xff] %v6396_v34  ;;  %v6398_v52 = vpop.permute.xlu1 %1045 }
 0x143   : > { %9725 = vst [vmem:[#allocation64_spill] sm:$0xff] %v6398_v52  ;;  %1231 = vrot.lane.b32.xlu0 %v5945_v48, %s5002_s20  ;;  %v9731_v52 = vld [vmem:[#allocation66_spill] sm:$0xff] }
 0x144   : > { %1225 = vrot.lane.b32.xlu1 %v5948_v18, %s5002_s20 }
 0x145   : > { %v6404_v63 = vpop.permute.xlu0 %1055 }
 0x146   : > { %9726 = vst [vmem:[#allocation142_spill] sm:$0xff] %v6404_v63  ;;  %v6406_v16 = vpop.permute.xlu1 %1049 }
 0x147   : > { %9727 = vst [vmem:[#allocation143_spill] sm:$0xff] %v6406_v16  ;;  %1235 = vrot.lane.b32.xlu0 %v5956_v37, %s5002_s20  ;;  %v9734_v16 = vld [vmem:[#allocation67_spill] sm:$0xff] }
 0x148   : > { %1229 = vrot.lane.b32.xlu1 %v9728_v60, %s5002_s20 }
 0x149   : > { %v6412_v35 = vpop.permute.xlu0 %1059 }
 0x14a   : > { %9729 = vst [vmem:[#allocation65_spill] sm:$0xff] %v6412_v35  ;;  %v6414_v34 = vpop.permute.xlu1 %1053 }
 0x14b   : > { %9730 = vst [vmem:[#allocation144_spill] sm:$0xff] %v6414_v34  ;;  %1239 = vrot.lane.b32.xlu0 %v5970_v56, %s5002_s20  ;;  %v9737_v34 = vld [vmem:[#allocation68_spill] sm:$0xff] }
 0x14c   : > { %1233 = vrot.lane.b32.xlu1 %v9731_v52, %s5002_s20 }
 0x14d   : > { %v6420_v5 = vpop.permute.xlu0 %1063 }
 0x14e   : > { %9732 = vst [vmem:[#allocation66_spill] sm:$0xff] %v6420_v5  ;;  %v6422_v63 = vpop.permute.xlu1 %1057 }
 0x14f   : > { %9733 = vst [vmem:[#allocation145_spill] sm:$0xff] %v6422_v63  ;;  %1243 = vrot.lane.b32.xlu0 %v5983_v1, %s5002_s20 }
 0x150   : > { %1237 = vrot.lane.b32.xlu1 %v9734_v16, %s5002_s20 }
 0x151   : > { %v6428_v62 = vpop.permute.xlu0 %1067 }
 0x152   : > { %9735 = vst [vmem:[#allocation67_spill] sm:$0xff] %v6428_v62  ;;  %v6430_v35 = vpop.permute.xlu1 %1061 }
 0x153   : > { %9736 = vst [vmem:[#allocation146_spill] sm:$0xff] %v6430_v35  ;;  %1247 = vrot.lane.b32.xlu0 %v9737_v34, %s5002_s20  ;;  %v9743_v35 = vld [vmem:[#allocation72_spill] sm:$0xff] }
 0x154   : > { %1241 = vrot.lane.b32.xlu1 %v9738_v61, %s5002_s20 }
 0x155   : > { %v6436_v8 = vpop.permute.xlu0 %1071 }
 0x156   : > { %9739 = vst [vmem:[#allocation69_spill] sm:$0xff] %v6436_v8  ;;  %v6438_v5 = vpop.permute.xlu1 %1065 }
 0x157   : > { %9740 = vst [vmem:[#allocation147_spill] sm:$0xff] %v6438_v5  ;;  %1251 = vrot.lane.b32.xlu0 %v6009_v2, %s5002_s20  ;;  %v9746_v5 = vld [vmem:[#allocation75_spill] sm:$0xff] }
 0x158   : > { %1245 = vrot.lane.b32.xlu1 %v6012_v51, %s5002_s20 }
 0x159   : > { %v6444_v63 = vpop.permute.xlu0 %1075 }
 0x15a   : > { %9741 = vst [vmem:[#allocation148_spill] sm:$0xff] %v6444_v63  ;;  %v6446_v62 = vpop.permute.xlu1 %1069 }
 0x15b   : > { %9742 = vst [vmem:[#allocation149_spill] sm:$0xff] %v6446_v62  ;;  %1255 = vrot.lane.b32.xlu0 %v6022_v3, %s5002_s20  ;;  %v9749_v62 = vld [vmem:[#allocation78_spill] sm:$0xff] }
 0x15c   : > { %1249 = vrot.lane.b32.xlu1 %v9743_v35, %s5002_s20 }
 0x15d   : > { %v6452_v34 = vpop.permute.xlu0 %1079 }
 0x15e   : > { %9744 = vst [vmem:[#allocation72_spill] sm:$0xff] %v6452_v34  ;;  %v6454_v8 = vpop.permute.xlu1 %1073  ;;  %v809_v34 = vrot.slane %v6205_v19, 2 }
 0x15f   : > { %9745 = vst [vmem:[#allocation150_spill] sm:$0xff] %v6454_v8  ;;  %1259 = vrot.lane.b32.xlu0 %v6037_v23, %s5002_s20  ;;  %v810_v8 = vrot.slane %v6223_v9, 2 }
 0x160   : > { %1253 = vrot.lane.b32.xlu1 %v9746_v5, %s5002_s20 }
 0x161   : > { %v6460_v2 = vpop.permute.xlu0 %1115 }
 0x162   : > { %9747 = vst [vmem:[#allocation75_spill] sm:$0xff] %v6460_v2  ;;  %v6462_v63 = vpop.permute.xlu1 %1077 }
 0x163   : > { %9748 = vst [vmem:[#allocation151_spill] sm:$0xff] %v6462_v63  ;;  %1263 = vrot.lane.b32.xlu0 %v6052_v21, %s5002_s20  ;;  %v6479_v63 = vsel %vm720_vm4, %v809_v34, %v810_v8 }
 0x164   : > { %1257 = vrot.lane.b32.xlu1 %v9749_v62, %s5002_s20 }
 0x165   : > { %v6470_v3 = vpop.permute.xlu0 %1119 }
 0x166   : > { %9750 = vst [vmem:[#allocation78_spill] sm:$0xff] %v6470_v3  ;;  %v6472_v23 = vpop.permute.xlu1 %1081 }
 0x167   : > { %9751 = vst [vmem:[#allocation152_spill] sm:$0xff] %v6472_v23  ;;  %1267 = vrot.lane.b32.xlu0 %v6064_v36, %s5002_s20  ;;  %v812_v23 = vrot.slane %v6346_v53, 2  ;;  %v6507_v53 = vld [vmem:[#allocation2 + $0x48] sm:$0xff] }
 0x168   : > { %1261 = vrot.lane.b32.xlu1 %v6067_v20, %s5002_s20  ;;  %v6494_v20 = vld [vmem:[#allocation2 + $0x30] sm:$0xff]  ;;  %9759 = vst [vmem:[#allocation160_spill] sm:$0xff] %v6507_v53 }
 0x169   : > { %v6481_v2 = vpop.permute.xlu0 %1123  ;;  %9756 = vst [vmem:[#allocation157_spill] sm:$0xff] %v6494_v20  ;;  %v6501_v34 = vsel %vm720_vm4, %v810_v8, %v812_v23  ;;  %v6521_v23 = vld [vmem:[#allocation2 + $0x38] sm:$0xff] }
 0x16a   : > { %9752 = vst [vmem:[#allocation153_spill] sm:$0xff] %v6481_v2  ;;  %v6483_v21 = vpop.permute.xlu1 %1117  ;;  %9763 = vst [vmem:[#allocation164_spill] sm:$0xff] %v6521_v23 }
 0x16b   : > { %9753 = vst [vmem:[#allocation154_spill] sm:$0xff] %v6483_v21  ;;  %1271 = vrot.lane.b32.xlu0 %v6479_v63, %s5002_s20 }
 0x16c   : > { %1265 = vrot.lane.b32.xlu1 %v6079_v0, %s5002_s20 }
 0x16d   : > { %v6490_v3 = vpop.permute.xlu0 %1127 }
 0x16e   : > { %9754 = vst [vmem:[#allocation155_spill] sm:$0xff] %v6490_v3  ;;  %v6492_v36 = vpop.permute.xlu1 %1121 }
 0x16f   : > { %9755 = vst [vmem:[#allocation156_spill] sm:$0xff] %v6492_v36  ;;  %1307 = vrot.lane.b32.xlu0 %v6494_v20, %s5003_s21  ;;  %v6517_v20 = vld [vmem:[#allocation2 + $0x60] sm:$0xff] }
 0x170   : > { %1269 = vrot.lane.b32.xlu1 %v6091_v47, %s5002_s20  ;;  %9762 = vst [vmem:[#allocation163_spill] sm:$0xff] %v6517_v20 }
 0x171   : > { %v6503_v2 = vpop.permute.xlu0 %1131 }
 0x172   : > { %9757 = vst [vmem:[#allocation158_spill] sm:$0xff] %v6503_v2  ;;  %v6505_v21 = vpop.permute.xlu1 %1125 }
 0x173   : > { %9758 = vst [vmem:[#allocation159_spill] sm:$0xff] %v6505_v21  ;;  %1311 = vrot.lane.b32.xlu0 %v6507_v53, %s5003_s21  ;;  %v6529_v21 = vld [vmem:[#allocation2 + $0x78] sm:$0xff]  ;;  %v6541_v53 = vld [vmem:[#allocation2 + $0x90] sm:$0xff] }
 0x174   : > { %1273 = vrot.lane.b32.xlu1 %v6501_v34, %s5002_s20  ;;  %9766 = vst [vmem:[#allocation167_spill] sm:$0xff] %v6529_v21  ;;  %9770 = vst [vmem:[#allocation171_spill] sm:$0xff] %v6541_v53 }
 0x175   : > { %v6513_v3 = vpop.permute.xlu0 %1135 }
 0x176   : > { %9760 = vst [vmem:[#allocation161_spill] sm:$0xff] %v6513_v3  ;;  %v6515_v36 = vpop.permute.xlu1 %1129  ;;  %v6533_v3 = vld [vmem:[#allocation2 + $0x50] sm:$0xff] }
 0x177   : > { %9761 = vst [vmem:[#allocation162_spill] sm:$0xff] %v6515_v36  ;;  %1315 = vrot.lane.b32.xlu0 %v6517_v20, %s5003_s21  ;;  %9767 = vst [vmem:[#allocation168_spill] sm:$0xff] %v6533_v3 }
 0x178   : > { %1309 = vrot.lane.b32.xlu1 %v6521_v23, %s5003_s21  ;;  %v6553_v23 = vld [vmem:[#allocation2 + $0xa8] sm:$0xff] }
 0x179   : > { %v6525_v8 = vpop.permute.xlu0 %1139  ;;  %9773 = vst [vmem:[#allocation174_spill] sm:$0xff] %v6553_v23 }
 0x17a   : > { %9764 = vst [vmem:[#allocation165_spill] sm:$0xff] %v6525_v8  ;;  %v6527_v2 = vpop.permute.xlu1 %1133  ;;  %v6545_v8 = vld [vmem:[#allocation2 + $0x68] sm:$0xff] }
 0x17b   : > { %9765 = vst [vmem:[#allocation166_spill] sm:$0xff] %v6527_v2  ;;  %1319 = vrot.lane.b32.xlu0 %v6529_v21, %s5003_s21 }
 0x17c   : > { %1313 = vrot.lane.b32.xlu1 %v6533_v3, %s5003_s21  ;;  %v6565_v3 = vld [vmem:[#allocation2 + $0xc0] sm:$0xff] }
 0x17d   : > { %v6537_v36 = vpop.permute.xlu0 %1143  ;;  %9776 = vst [vmem:[#allocation177_spill] sm:$0xff] %v6565_v3 }
 0x17e   : > { %9768 = vst [vmem:[#allocation169_spill] sm:$0xff] %v6537_v36  ;;  %v6539_v20 = vpop.permute.xlu1 %1137  ;;  %v6557_v36 = vld [vmem:[#allocation2 + $0x80] sm:$0xff] }
 0x17f   : > { %9769 = vst [vmem:[#allocation170_spill] sm:$0xff] %v6539_v20  ;;  %1323 = vrot.lane.b32.xlu0 %v6541_v53, %s5003_s21 }
 0x180   : > { %1317 = vrot.lane.b32.xlu1 %v6545_v8, %s5003_s21 }
 0x181   : > { %v6549_v2 = vpop.permute.xlu0 %1147 }
 0x182   : > { %9771 = vst [vmem:[#allocation172_spill] sm:$0xff] %v6549_v2  ;;  %v6551_v21 = vpop.permute.xlu1 %1141  ;;  %v6569_v2 = vld [vmem:[#allocation2 + $0x98] sm:$0xff] }
 0x183   : > { %9772 = vst [vmem:[#allocation173_spill] sm:$0xff] %v6551_v21  ;;  %1327 = vrot.lane.b32.xlu0 %v6553_v23, %s5003_s21  ;;  %9777 = vst [vmem:[#allocation178_spill] sm:$0xff] %v6569_v2 }
 0x184   : > { %1321 = vrot.lane.b32.xlu1 %v6557_v36, %s5003_s21 }
 0x185   : > { %v6561_v20 = vpop.permute.xlu0 %1151 }
 0x186   : > { %9774 = vst [vmem:[#allocation175_spill] sm:$0xff] %v6561_v20  ;;  %v6563_v53 = vpop.permute.xlu1 %1145  ;;  %v6579_v20 = vld [vmem:[#allocation2 + $0xb0] sm:$0xff] }
 0x187   : > { %9775 = vst [vmem:[#allocation176_spill] sm:$0xff] %v6563_v53  ;;  %1331 = vrot.lane.b32.xlu0 %v6565_v3, %s5003_s21 }
 0x188   : > { %1325 = vrot.lane.b32.xlu1 %v6569_v2, %s5003_s21  ;;  %v6589_v2 = vld [vmem:[#allocation2 + $0xc8] sm:$0xff] }
 0x189   : > { %v6573_v21 = vpop.permute.xlu0 %1155 }
 0x18a   : > { %9778 = vst [vmem:[#allocation179_spill] sm:$0xff] %v6573_v21  ;;  %v6575_v23 = vpop.permute.xlu1 %1149 }
 0x18b   : > { %1335 = vrot.lane.b32.xlu0 %v5596_v54, %s5003_s21 }
 0x18c   : > { %1329 = vrot.lane.b32.xlu1 %v6579_v20, %s5003_s21 }
 0x18d   : > { %v6583_v53 = vpop.permute.xlu0 %1159 }
 0x18e   : > { %9779 = vst [vmem:[#allocation180_spill] sm:$0xff] %v6583_v53  ;;  %v6585_v3 = vpop.permute.xlu1 %1153 }
 0x18f   : > { %9780 = vst [vmem:[#allocation181_spill] sm:$0xff] %v6585_v3  ;;  %1339 = vrot.lane.b32.xlu0 %v5630_v50, %s5003_s21 }
 0x190   : > { %1333 = vrot.lane.b32.xlu1 %v6589_v2, %s5003_s21 }
 0x191   : > { %v6593_v21 = vpop.permute.xlu0 %1163 }
 0x192   : > { %9781 = vst [vmem:[#allocation182_spill] sm:$0xff] %v6593_v21  ;;  %v6595_v54 = vpop.permute.xlu1 %1157 }
 0x193   : > { %9782 = vst [vmem:[#allocation183_spill] sm:$0xff] %v6595_v54  ;;  %1343 = vrot.lane.b32.xlu0 %v5652_v32, %s5003_s21 }
 0x194   : > { %1337 = vrot.lane.b32.xlu1 %v5598_v55, %s5003_s21 }
 0x195   : > { %v6601_v53 = vpop.permute.xlu0 %1167 }
 0x196   : > { %9783 = vst [vmem:[#allocation184_spill] sm:$0xff] %v6601_v53  ;;  %v6603_v3 = vpop.permute.xlu1 %1161  ;;  %v9814_v53 = vld [vmem:[#allocation74_spill] sm:$0xff] }
 0x197   : > { %9784 = vst [vmem:[#allocation185_spill] sm:$0xff] %v6603_v3  ;;  %1347 = vrot.lane.b32.xlu0 %v5673_v24, %s5003_s21  ;;  %v9821_v3 = vld [vmem:[#allocation77_spill] sm:$0xff] }
 0x198   : > { %1341 = vrot.lane.b32.xlu1 %v5632_v41, %s5003_s21 }
 0x199   : > { %v6609_v50 = vpop.permute.xlu0 %1171 }
 0x19a   : > { %9785 = vst [vmem:[#allocation186_spill] sm:$0xff] %v6609_v50  ;;  %v6611_v21 = vpop.permute.xlu1 %1165 }
 0x19b   : > { %9786 = vst [vmem:[#allocation187_spill] sm:$0xff] %v6611_v21  ;;  %1351 = vrot.lane.b32.xlu0 %v5690_v15, %s5003_s21 }
 0x19c   : > { %1345 = vrot.lane.b32.xlu1 %v5654_v45, %s5003_s21 }
 0x19d   : > { %v6617_v55 = vpop.permute.xlu0 %1175 }
 0x19e   : > { %9787 = vst [vmem:[#allocation188_spill] sm:$0xff] %v6617_v55  ;;  %v6619_v32 = vpop.permute.xlu1 %1169  ;;  %v1860_v55 = vld [vmem:[%s9288_s3 + $0x10] sm:$0xff] }
 0x19f   : > { %9788 = vst [vmem:[#allocation189_spill] sm:$0xff] %v6619_v32  ;;  %1355 = vrot.lane.b32.xlu0 %v5711_v57, %s5003_s21  ;;  %v6641_v57 = vld [vmem:[#allocation2 + $0x198] sm:$0xff] }
 0x1a0   : > { %1349 = vrot.lane.b32.xlu1 %v5675_v7, %s5003_s21  ;;  %v1861_v32 = vld [vmem:[%s9288_s3 + $0x18] sm:$0xff] }
 0x1a1   : > { %v6625_v24 = vpop.permute.xlu0 %1211 }
 0x1a2   : > { %v6627_v41 = vpop.permute.xlu1 %1173 }
 0x1a3   : > { %9789 = vst [vmem:[#allocation190_spill] sm:$0xff] %v6627_v41  ;;  %1359 = vrot.lane.b32.xlu0 %v5731_v4, %s5003_s21  ;;  %v1858_v4 = vld [vmem:[%s9288_s3] sm:$0xff] }
 0x1a4   : > { %1353 = vrot.lane.b32.xlu1 %v5692_v30, %s5003_s21  ;;  %v1859_v30 = vld [vmem:[%s9288_s3 + $0x8] sm:$0xff] }
 0x1a5   : > { %v6633_v45 = vpop.permute.xlu0 %1215 }
 0x1a6   : > { %v6635_v15 = vpop.permute.xlu1 %1177 }
 0x1a7   : > { %9790 = vst [vmem:[#allocation191_spill] sm:$0xff] %v6635_v15  ;;  %1363 = vrot.lane.b32.xlu0 %v6205_v19, %s5003_s21 }
 0x1a8   : > { %1357 = vrot.lane.b32.xlu1 %v5713_v46, %s5003_s21  ;;  %v4846_v46 = vpack.c.bf16 %v1859_v30, %v1858_v4  ;;  %v6671_v4 = vld [vmem:[#allocation2 + $0x1a0] sm:$0xff] }
 0x1a9   : > { %v6643_v7 = vpop.permute.xlu0 %1219 }
 0x1aa   : > { %v6645_v41 = vpop.permute.xlu1 %1213  ;;  %4847 = vmatprep.subr.bf16.mxu0 %v4846_v46 }
 0x1ab   : > { %1367 = vrot.lane.b32.xlu0 %v6641_v57, %s5003_s21  ;;  %4849 = vmatpush3.bf16.msra.mxu0 %v4846_v46 }
 0x1ac   : > { %1361 = vrot.lane.b32.xlu1 %v5733_v25, %s5003_s21  ;;  %v4850_v25 = vpack.c.bf16 %v1861_v32, %v1860_v55 }
 0x1ad   : > { %v6657_v19 = vpop.permute.xlu0 %1223 }
 0x1ae   : > { %v6659_v15 = vpop.permute.xlu1 %1217  ;;  %4851 = vmatprep.subr.bf16.mxu0 %v4850_v25 }
 0x1af   : > { %1403 = vrot.lane.b32.xlu0 %v5385_v58, %s5004_s11  ;;  %4853 = vmatpush3.bf16.msra.mxu0 %v4850_v25  ;;  %v1862_v58 = vld [vmem:[%s9288_s3 + $0x20] sm:$0xf] }
 0x1b0   : > { %1365 = vrot.lane.b32.xlu1 %v6223_v9, %s5003_s21  ;;  %4680 = vmatprep.subr.msk.mxu0 %vm1960_vm5, %v1862_v58 }
 0x1b1   : > { %v6673_v30 = vpop.permute.xlu0 %1227 }
 0x1b2   : > { %v6675_v46 = vpop.permute.xlu1 %1221 }
 0x1b3   : > { %1407 = vrot.lane.b32.xlu0 %v5405_v27, %s5004_s11  ;;  %4681 = vmatpush3.msk.msra.mxu0 %vm1960_vm5, %v1862_v58 }
 0x1b4   : > { %1369 = vrot.lane.b32.xlu1 %v6671_v4, %s5003_s21 }
 0x1b5   : > { %v6685_v9 = vpop.permute.xlu0 %1231 }
 0x1b6   : > { %v6687_v55 = vpop.permute.xlu1 %1225 }
 0x1b7   : > { %1411 = vrot.lane.b32.xlu0 %v9661_v17, %s5004_s11 }
 0x1b8   : > { %1405 = vrot.lane.b32.xlu1 %v9662_v39, %s5004_s11 }
 0x1b9   : > { %v6694_v27 = vpop.permute.xlu0 %1235 }
 0x1ba   : > { %v6696_v32 = vpop.permute.xlu1 %1229 }
 0x1bb   : > { %1499 = vrot.lane.b32.xlu0 %v5896_v42, %s5005_s14 }
 0x1bc   : > { %1409 = vrot.lane.b32.xlu1 %v9666_v12, %s5004_s11 }
 0x1bd   : > { %v6702_v25 = vpop.permute.xlu0 %1239 }
 0x1be   : > { %v6704_v58 = vpop.permute.xlu1 %1233 }
 0x1bf   : > { %1503 = vrot.lane.b32.xlu0 %v5904_v14, %s5005_s14 }
 0x1c0   : > { %1413 = vrot.lane.b32.xlu1 %v9670_v22, %s5004_s11 }
 0x1c1   : > { %v6710_v17 = vpop.permute.xlu0 %1243 }
 0x1c2   : > { %v6712_v39 = vpop.permute.xlu1 %1237 }
 0x1c3   : > { %1507 = vrot.lane.b32.xlu0 %v5919_v26, %s5005_s14 }
 0x1c4   : > { %1501 = vrot.lane.b32.xlu1 %v5922_v6, %s5005_s14 }
 0x1c5   : > { %v6718_v42 = vpop.permute.xlu0 %1247 }
 0x1c6   : > { %v6720_v12 = vpop.permute.xlu1 %1241 }
 0x1c7   : > { %1415 = vrot.lane.b32.xlu0 %v9665_v13, %s5004_s11 }
 0x1c8   : > { %1505 = vrot.lane.b32.xlu1 %v9723_v49, %s5005_s14 }
 0x1c9   : > { %v6726_v14 = vpop.permute.xlu0 %1251 }
 0x1ca   : > { %9791 = vst [vmem:[#allocation192_spill] sm:$0xff] %v6726_v14  ;;  %v6728_v22 = vpop.permute.xlu1 %1245 }
 0x1cb   : > { %1511 = vrot.lane.b32.xlu0 %v9722_v38, %s5005_s14 }
 0x1cc   : > { %1509 = vrot.lane.b32.xlu1 %v5948_v18, %s5005_s14 }
 0x1cd   : > { %v6734_v26 = vpop.permute.xlu0 %1255 }
 0x1ce   : > { %9792 = vst [vmem:[#allocation193_spill] sm:$0xff] %v6734_v26  ;;  %v6736_v6 = vpop.permute.xlu1 %1249  ;;  %v4939_v26 = vld [vmem:[#allocation2] sm:$0xff] }
 0x1cf   : > { %9793 = vst [vmem:[#allocation194_spill] sm:$0xff] %v6736_v6  ;;  %1419 = vrot.lane.b32.xlu0 %v9669_v43, %s5004_s11  ;;  %v9847_v6 = vld [vmem:[#allocation154_spill] sm:$0xff] }
 0x1d0   : > { %1417 = vrot.lane.b32.xlu1 %v9674_v31, %s5004_s11 }
 0x1d1   : > { %v6742_v49 = vpop.permute.xlu0 %1259 }
 0x1d2   : > { %9794 = vst [vmem:[#allocation195_spill] sm:$0xff] %v6742_v49  ;;  %v6744_v13 = vpop.permute.xlu1 %1253 }
 0x1d3   : > { %9795 = vst [vmem:[#allocation196_spill] sm:$0xff] %v6744_v13  ;;  %1515 = vrot.lane.b32.xlu0 %v5945_v48, %s5005_s14  ;;  %v9825_v13 = vld [vmem:[#allocation58_spill] sm:$0xff] }
 0x1d4   : > { %1513 = vrot.lane.b32.xlu1 %v9728_v60, %s5005_s14 }
 0x1d5   : > { %v6750_v38 = vpop.permute.xlu0 %1263 }
 0x1d6   : > { %9796 = vst [vmem:[#allocation197_spill] sm:$0xff] %v6750_v38  ;;  %v6752_v18 = vpop.permute.xlu1 %1257  ;;  %v9811_v38 = vld [vmem:[#allocation52_spill] sm:$0xff] }
 0x1d7   : > { %9797 = vst [vmem:[#allocation198_spill] sm:$0xff] %v6752_v18  ;;  %1423 = vrot.lane.b32.xlu0 %v9673_v10, %s5004_s11  ;;  %v9817_v18 = vld [vmem:[#allocation55_spill] sm:$0xff] }
 0x1d8   : > { %1421 = vrot.lane.b32.xlu1 %v9678_v44, %s5004_s11 }
 0x1d9   : > { %v6758_v31 = vpop.permute.xlu0 %1267 }
 0x1da   : > { %9798 = vst [vmem:[#allocation199_spill] sm:$0xff] %v6758_v31  ;;  %v6760_v43 = vpop.permute.xlu1 %1261  ;;  %v9808_v31 = vld [vmem:[#allocation51_spill] sm:$0xff] }
 0x1db   : > { %9799 = vst [vmem:[#allocation200_spill] sm:$0xff] %v6760_v43  ;;  %1519 = vrot.lane.b32.xlu0 %v5956_v37, %s5005_s14  ;;  %v9810_v43 = vld [vmem:[#allocation71_spill] sm:$0xff] }
 0x1dc   : > { %1517 = vrot.lane.b32.xlu1 %v9731_v52, %s5005_s14 }
 0x1dd   : > { %v6766_v60 = vpop.permute.xlu0 %1271 }
 0x1de   : > { %9800 = vst [vmem:[#allocation201_spill] sm:$0xff] %v6766_v60  ;;  %v6768_v48 = vpop.permute.xlu1 %1265 }
 0x1df   : > { %9801 = vst [vmem:[#allocation202_spill] sm:$0xff] %v6768_v48  ;;  %1427 = vrot.lane.b32.xlu0 %v9677_v29, %s5004_s11  ;;  %v9807_v48 = vld [vmem:[#allocation70_spill] sm:$0xff] }
 0x1e0   : > { %1425 = vrot.lane.b32.xlu1 %v9682_v40, %s5004_s11 }
 0x1e1   : > { %v6774_v10 = vpop.permute.xlu0 %1307 }
 0x1e2   : > { %v6776_v44 = vpop.permute.xlu1 %1269 }
 0x1e3   : > { %9802 = vst [vmem:[#allocation203_spill] sm:$0xff] %v6776_v44  ;;  %1523 = vrot.lane.b32.xlu0 %v5970_v56, %s5005_s14  ;;  %v9805_v44 = vld [vmem:[#allocation48_spill] sm:$0xff] }
 0x1e4   : > { %1521 = vrot.lane.b32.xlu1 %v9734_v16, %s5005_s14 }
 0x1e5   : > { %v6782_v37 = vpop.permute.xlu0 %1311 }
 0x1e6   : > { %v6784_v52 = vpop.permute.xlu1 %1273 }
 0x1e7   : > { %9803 = vst [vmem:[#allocation204_spill] sm:$0xff] %v6784_v52  ;;  %1431 = vrot.lane.b32.xlu0 %v9681_v28, %s5004_s11  ;;  %v9804_v52 = vld [vmem:[#allocation68_spill] sm:$0xff] }
 0x1e8   : > { %1429 = vrot.lane.b32.xlu1 %v9686_v33, %s5004_s11 }
 0x1e9   : > { %v6790_v40 = vpop.permute.xlu0 %1315 }
 0x1ea   : > { %v6792_v29 = vpop.permute.xlu1 %1309 }
 0x1eb   : > { %1527 = vrot.lane.b32.xlu0 %v5983_v1, %s5005_s14 }
 0x1ec   : > { %1525 = vrot.lane.b32.xlu1 %v9738_v61, %s5005_s14 }
 0x1ed   : > { %v6798_v56 = vpop.permute.xlu0 %1319 }
 0x1ee   : > { %v6800_v16 = vpop.permute.xlu1 %1313 }
 0x1ef   : > { %1435 = vrot.lane.b32.xlu0 %v9685_v59, %s5004_s11  ;;  %v9806_v59 = vld [vmem:[#allocation50_spill] sm:$0xff] }
 0x1f0   : > { %1433 = vrot.lane.b32.xlu1 %v9690_v11, %s5004_s11 }
 0x1f1   : > { %v6806_v28 = vpop.permute.xlu0 %1323 }
 0x1f2   : > { %v6808_v33 = vpop.permute.xlu1 %1317 }
 0x1f3   : > { %1531 = vrot.lane.b32.xlu0 %v9804_v52, %s5005_s14 }
 0x1f4   : > { %1529 = vrot.lane.b32.xlu1 %v6012_v51, %s5005_s14 }
 0x1f5   : > { %v6814_v1 = vpop.permute.xlu0 %1327 }
 0x1f6   : > { %v6816_v61 = vpop.permute.xlu1 %1321 }
 0x1f7   : > { %1439 = vrot.lane.b32.xlu0 %v9805_v44, %s5004_s11  ;;  %v9809_v44 = vld [vmem:[#allocation53_spill] sm:$0xff] }
 0x1f8   : > { %1437 = vrot.lane.b32.xlu1 %v9806_v59, %s5004_s11 }
 0x1f9   : > { %v6822_v11 = vpop.permute.xlu0 %1331 }
 0x1fa   : > { %v6824_v60 = vpop.permute.xlu1 %1325 }
 0x1fb   : > { %1535 = vrot.lane.b32.xlu0 %v9807_v48, %s5005_s14 }
 0x1fc   : > { %1533 = vrot.lane.b32.xlu1 %v9743_v35, %s5005_s14 }
 0x1fd   : > { %v6830_v51 = vpop.permute.xlu0 %1335 }
 0x1fe   : > { %v6832_v52 = vpop.permute.xlu1 %1329 }
 0x1ff   : > { %1443 = vrot.lane.b32.xlu0 %v9808_v31, %s5004_s11  ;;  %v9812_v31 = vld [vmem:[#allocation54_spill] sm:$0xff] }
 0x200   : > { %1441 = vrot.lane.b32.xlu1 %v9809_v44, %s5004_s11 }
 0x201   : > { %v6838_v59 = vpop.permute.xlu0 %1339 }
 0x202   : > { %v6840_v50 = vpop.permute.xlu1 %1333 }
 0x203   : > { %1539 = vrot.lane.b32.xlu0 %v9810_v43, %s5005_s14 }
 0x204   : > { %1537 = vrot.lane.b32.xlu1 %v9746_v5, %s5005_s14 }
 0x205   : > { %v6846_v35 = vpop.permute.xlu0 %1343 }
 0x206   : > { %v6848_v48 = vpop.permute.xlu1 %1337 }
 0x207   : > { %1447 = vrot.lane.b32.xlu0 %v9811_v38, %s5004_s11  ;;  %v9818_v38 = vld [vmem:[#allocation59_spill] sm:$0xff] }
 0x208   : > { %1445 = vrot.lane.b32.xlu1 %v9812_v31, %s5004_s11 }
 0x209   : > { %v6854_v44 = vpop.permute.xlu0 %1347 }
 0x20a   : > { %9813 = vst [vmem:[#allocation68_spill] sm:$0xff] %v6854_v44  ;;  %v6856_v21 = vpop.permute.xlu1 %1341 }
 0x20b   : > { %1543 = vrot.lane.b32.xlu0 %v9814_v53, %s5005_s14  ;;  %v9822_v53 = vld [vmem:[#allocation80_spill] sm:$0xff] }
 0x20c   : > { %1541 = vrot.lane.b32.xlu1 %v9749_v62, %s5005_s14 }
 0x20d   : > { %v6862_v5 = vpop.permute.xlu0 %1351 }
 0x20e   : > { %9815 = vst [vmem:[#allocation48_spill] sm:$0xff] %v6862_v5  ;;  %v6864_v43 = vpop.permute.xlu1 %1345 }
 0x20f   : > { %9816 = vst [vmem:[#allocation50_spill] sm:$0xff] %v6864_v43  ;;  %1451 = vrot.lane.b32.xlu0 %v9817_v18, %s5004_s11  ;;  %v9826_v18 = vld [vmem:[#allocation60_spill] sm:$0xff] }
 0x210   : > { %1449 = vrot.lane.b32.xlu1 %v9818_v38, %s5004_s11 }
 0x211   : > { %v6870_v31 = vpop.permute.xlu0 %1355 }
 0x212   : > { %9819 = vst [vmem:[#allocation70_spill] sm:$0xff] %v6870_v31  ;;  %v6872_v49 = vpop.permute.xlu1 %1349 }
 0x213   : > { %9820 = vst [vmem:[#allocation51_spill] sm:$0xff] %v6872_v49  ;;  %1547 = vrot.lane.b32.xlu0 %v9821_v3, %s5005_s14  ;;  %v9829_v49 = vld [vmem:[#allocation79_spill] sm:$0xff] }
 0x214   : > { %1545 = vrot.lane.b32.xlu1 %v9822_v53, %s5005_s14 }
 0x215   : > { %v6878_v62 = vpop.permute.xlu0 %1359 }
 0x216   : > { %9823 = vst [vmem:[#allocation53_spill] sm:$0xff] %v6878_v62  ;;  %v6880_v5 = vpop.permute.xlu1 %1353  ;;  %v9832_v62 = vld [vmem:[#allocation129_spill] sm:$0xff] }
 0x217   : > { %9824 = vst [vmem:[#allocation71_spill] sm:$0xff] %v6880_v5  ;;  %1455 = vrot.lane.b32.xlu0 %v9825_v13, %s5004_s11  ;;  %v9833_v13 = vld [vmem:[#allocation62_spill] sm:$0xff] }
 0x218   : > { %1453 = vrot.lane.b32.xlu1 %v9826_v18, %s5004_s11  ;;  %v817_v18 = vrot.slane %v6641_v57, 1 }
 0x219   : > { %v6886_v38 = vpop.permute.xlu0 %1363 }
 0x21a   : > { %9827 = vst [vmem:[#allocation52_spill] sm:$0xff] %v6886_v38  ;;  %v6888_v31 = vpop.permute.xlu1 %1357  ;;  %v818_v38 = vrot.slane %v6671_v4, 1 }
 0x21b   : > { %9828 = vst [vmem:[#allocation54_spill] sm:$0xff] %v6888_v31  ;;  %1551 = vrot.lane.b32.xlu0 %v9829_v49, %s5005_s14  ;;  %v823_v49 = vrot.slane %v6671_v4, 2 }
 0x21c   : > { %1549 = vrot.lane.b32.xlu1 %v6079_v0, %s5005_s14  ;;  %v822_v0 = vrot.slane %v6641_v57, 2 }
 0x21d   : > { %v6894_v3 = vpop.permute.xlu0 %1367 }
 0x21e   : > { %9830 = vst [vmem:[#allocation74_spill] sm:$0xff] %v6894_v3  ;;  %v6896_v53 = vpop.permute.xlu1 %1361  ;;  %v824_v4 = vsel %vm720_vm4, %v822_v0, %v823_v49 }
 0x21f   : > { %9831 = vst [vmem:[#allocation55_spill] sm:$0xff] %v6896_v53  ;;  %1459 = vrot.lane.b32.xlu0 %v9832_v62, %s5004_s11  ;;  %v819_v62 = vsel %vm639_vm2, %v817_v18, %v818_v38  ;;  %v590_v53 = vld [vmem:[#allocation2 + $0x1a8] sm:$0x3] }
 0x220   : > { %1457 = vrot.lane.b32.xlu1 %v9833_v13, %s5004_s11  ;;  %v820_v18 = vrot.slane %v590_v53, 1  ;;  %v825_v0 = vrot.slane %v590_v53, 2 }
 0x221   : > { %v1404_v31 = vpop.permute.xlu0 %1403 }
 0x222   : > { %v6904_v5 = vpop.permute.xlu1 %1365 }
 0x223   : > { %9834 = vst [vmem:[#allocation59_spill] sm:$0xff] %v6904_v5  ;;  %1555 = vrot.lane.b32.xlu0 %v6479_v63, %s5005_s14  ;;  %v9836_v5 = vld [vmem:[#allocation73_spill] sm:$0xff] }
 0x224   : > { %1553 = vrot.lane.b32.xlu1 %v6091_v47, %s5005_s14  ;;  %v1595_v54 = vsel %vm448_vm0, %v4939_v26, %v9836_v5  ;;  %v9837_v47 = vld [vmem:[#allocation61_spill] sm:$0xff]  ;;  %v9840_v5 = vld [vmem:[#allocation75_spill] sm:$0xff] }
 0x225   : > { %v6913_v13 = vpop.permute.xlu0 %1407  ;;  %v9838_v63 = vld [vmem:[#allocation109_spill] sm:$0xff] }
 0x226   : > { %v6915_v3 = vpop.permute.xlu1 %1369  ;;  %v1628_v57 = vsel %vm1627_vm3, %v1595_v54, %v9838_v63 }
 0x227   : > { %9835 = vst [vmem:[#allocation77_spill] sm:$0xff] %v6915_v3  ;;  %1463 = vrot.lane.b32.xlu0 %v819_v62, %s5004_s11  ;;  %v9839_v3 = vld [vmem:[#allocation125_spill] sm:$0xff] }
 0x228   : > { %1461 = vrot.lane.b32.xlu1 %v9837_v47, %s5004_s11  ;;  %v1661_v43 = vsel %vm1660_vm6, %v1628_v57, %v9839_v3  ;;  %v821_v3 = vsel %vm639_vm2, %v818_v38, %v820_v18  ;;  %v9843_v38 = vld [vmem:[#allocation114_spill] sm:$0xff]  ;;  %v9844_v18 = vld [vmem:[#allocation111_spill] sm:$0xff] }
 0x229   : > { %v6927_v44 = vpop.permute.xlu0 %1411  ;;  %v1694_v62 = vsel %vm1693_vm7, %v1661_v43, %v9840_v5 }
 0x22a   : > { %v1406_v26 = vpop.permute.xlu1 %1405  ;;  %v1727_v47 = vsel %vm1726_vm8, %v1694_v62, %v6625_v24  ;;  %v4940_v24 = vld [vmem:[#allocation2 + $0x8] sm:$0xff]  ;;  %v9841_v62 = vld [vmem:[#allocation76_spill] sm:$0xff] }
 0x22b   : > { %1559 = vrot.lane.b32.xlu0 %v824_v4, %s5005_s14  ;;  %v1760_v54 = vsel %vm1759_vm9, %v1727_v47, %v6774_v10  ;;  %v1596_v4 = vsel %vm448_vm0, %v4940_v24, %v9841_v62  ;;  %v9842_v10 = vld [vmem:[#allocation82_spill] sm:$0xff] }
 0x22c   : > { %1557 = vrot.lane.b32.xlu1 %v6501_v34, %s5005_s14  ;;  %v1793_v63 = vsel %vm1792_vm10, %v1760_v54, %v1404_v31  ;;  %v4941_v34 = vld [vmem:[#allocation2 + $0x18] sm:$0xff]  ;;  %v1629_v53 = vsel %vm1627_vm3, %v1596_v4, %v9843_v38  ;;  %v826_v31 = vsel %vm720_vm4, %v823_v49, %v825_v0  ;;  %v4942_v38 = vld [vmem:[#allocation2 + $0x20] sm:$0xff] }
 0x22d   : > { %v1500_v43 = vpop.permute.xlu0 %1499  ;;  %v1597_v47 = vsel %vm448_vm0, %v4941_v34, %v9842_v10  ;;  %v9848_v34 = vld [vmem:[#allocation81_spill] sm:$0xff]  ;;  %v9850_v49 = vld [vmem:[#allocation84_spill] sm:$0xff] }
 0x22e   : > { %v1410_v57 = vpop.permute.xlu1 %1409  ;;  %v1826_v5 = vsel %vm1825_vm11, %v1793_v63, %v1500_v43  ;;  %v1630_v54 = vsel %vm1627_vm3, %v1597_v47, %v9844_v18  ;;  %v9845_v63 = vld [vmem:[#allocation131_spill] sm:$0xff]  ;;  %v9849_v10 = vld [vmem:[#allocation157_spill] sm:$0xff]  ;;  %v1598_v0 = vsel %vm448_vm0, %v4942_v38, %v9850_v49  ;;  %v9851_v47 = vld [vmem:[#allocation78_spill] sm:$0xff] }
 0x22f   : > { %4682 = vmatprep.mubr.msk.f32.mxu0 %vm1863_vm12, %v1826_v5  ;;  %v1662_v43 = vsel %vm1660_vm6, %v1629_v53, %v9845_v63  ;;  %v9846_v5 = vld [vmem:[#allocation127_spill] sm:$0xff]  ;;  %v1599_v4 = vsel %vm448_vm0, %v9849_v10, %v9848_v34  ;;  %v9853_v63 = vld [vmem:[#allocation160_spill] sm:$0xff]  ;;  %v9855_v38 = vld [vmem:[#allocation113_spill] sm:$0xff] }
 0x230   : > { %1465 = vrot.lane.b32.xlu1 %v821_v3, %s5004_s11  ;;  %v1663_v3 = vsel %vm1660_vm6, %v1630_v54, %v9846_v5  ;;  %v1695_v14 = vsel %vm1693_vm7, %v1662_v43, %v9847_v6  ;;  %v9852_v54 = vld [vmem:[#allocation83_spill] sm:$0xff]  ;;  %v9854_v43 = vld [vmem:[#allocation116_spill] sm:$0xff]  ;;  %v9856_v49 = vld [vmem:[#allocation133_spill] sm:$0xff] }
 0x231   : > { %v1504_v24 = vpop.permute.xlu0 %1503  ;;  %v1696_v18 = vsel %vm1693_vm7, %v1663_v3, %v9851_v47  ;;  %v1728_v53 = vsel %vm1726_vm8, %v1695_v14, %v6645_v41  ;;  %v1601_v6 = vsel %vm448_vm0, %v9853_v63, %v9852_v54  ;;  %v1631_v5 = vsel %vm1627_vm3, %v1598_v0, %v9854_v43  ;;  %v9857_v0 = vld [vmem:[#allocation130_spill] sm:$0xff]  ;;  %v9860_v43 = vld [vmem:[#allocation164_spill] sm:$0xff] }
 0x232   : > { %v1414_v62 = vpop.permute.xlu1 %1413  ;;  %v1729_v34 = vsel %vm1726_vm8, %v1696_v18, %v6633_v45  ;;  %v1761_v10 = vsel %vm1759_vm9, %v1728_v53, %v6792_v29  ;;  %v1632_v3 = vsel %vm1627_vm3, %v1599_v4, %v9855_v38  ;;  %v1664_v41 = vsel %vm1660_vm6, %v1631_v5, %v9856_v49  ;;  %v9858_v45 = vld [vmem:[#allocation156_spill] sm:$0xff]  ;;  %v9859_v53 = vld [vmem:[#allocation86_spill] sm:$0xff]  ;;  %v9862_v38 = vld [vmem:[#allocation115_spill] sm:$0xff] }
 0x233   : > { %v1762_v14 = vsel %vm1759_vm9, %v1729_v34, %v6782_v37  ;;  %v1665_v63 = vsel %vm1660_vm6, %v1632_v3, %v9857_v0  ;;  %v1697_v18 = vsel %vm1693_vm7, %v1664_v41, %v9858_v45  ;;  %v1600_v5 = vsel %vm448_vm0, %v9860_v43, %v9859_v53  ;;  %v9861_v37 = vld [vmem:[#allocation153_spill] sm:$0xff] }
 0x234   : > { %1561 = vrot.lane.b32.xlu1 %v826_v31, %s5005_s14  ;;  %v1794_v31 = vsel %vm1792_vm10, %v1761_v10, %v1406_v26  ;;  %v1795_v29 = vsel %vm1792_vm10, %v1762_v14, %v6913_v13  ;;  %v1698_v26 = vsel %vm1693_vm7, %v1665_v63, %v9861_v37  ;;  %v1730_v34 = vsel %vm1726_vm8, %v1697_v18, %v6659_v15  ;;  %v9863_v13 = vld [vmem:[#allocation118_spill] sm:$0xff]  ;;  %v9866_v18 = vld [vmem:[#allocation155_spill] sm:$0xff] }
 0x235   : > { %v1508_v47 = vpop.permute.xlu0 %1507  ;;  %v1828_v10 = vsel %vm1825_vm11, %v1795_v29, %v1504_v24  ;;  %v1634_v3 = vsel %vm1627_vm3, %v1601_v6, %v9862_v38  ;;  %v1633_v49 = vsel %vm1627_vm3, %v1600_v5, %v9863_v13  ;;  %v1731_v41 = vsel %vm1726_vm8, %v1698_v26, %v6643_v7  ;;  %v9865_v24 = vld [vmem:[#allocation135_spill] sm:$0xff]  ;;  %v9871_v13 = vld [vmem:[#allocation168_spill] sm:$0xff] }
 0x236   : > { %v1502_v54 = vpop.permute.xlu1 %1501  ;;  %v1763_v14 = vsel %vm1759_vm9, %v1730_v34, %v6800_v16  ;;  %v1764_v6 = vsel %vm1759_vm9, %v1731_v41, %v6790_v40  ;;  %v9867_v29 = vld [vmem:[#allocation159_spill] sm:$0xff]  ;;  %v9873_v41 = vld [vmem:[#allocation120_spill] sm:$0xff] }
 0x237   : > { %v1827_v4 = vsel %vm1825_vm11, %v1794_v31, %v1502_v54  ;;  %v9864_v31 = vld [vmem:[#allocation132_spill] sm:$0xff]  ;;  %v1666_v54 = vsel %vm1660_vm6, %v1633_v49, %v9865_v24  ;;  %v1796_v0 = vsel %vm1792_vm10, %v1763_v14, %v1410_v57  ;;  %v9869_v38 = vld [vmem:[#allocation163_spill] sm:$0xff]  ;;  %v9872_v49 = vld [vmem:[#allocation117_spill] sm:$0xff] }
 0x238   : > { %4683 = vmatmul.mubr.msk.f32.vlgmr.msra.gmra.mrb[0].mxu0 %vm1863_vm12, %v1827_v4  ;;  %v1667_v15 = vsel %vm1660_vm6, %v1634_v3, %v9864_v31  ;;  %v1699_v16 = vsel %vm1693_vm7, %v1666_v54, %v9867_v29  ;;  %v1797_v4 = vsel %vm1792_vm10, %v1764_v6, %v6927_v44  ;;  %v9874_v31 = vld [vmem:[#allocation134_spill] sm:$0xff]  ;;  %v9875_v24 = vld [vmem:[#allocation137_spill] sm:$0xff] }
 0x239   : > { %4685 = vmatprep.mubr.msk.f32.mxu0 %vm1863_vm12, %v1828_v10  ;;  %v1416_v63 = vpop.permute.xlu0 %1415  ;;  %v1700_v7 = vsel %vm1693_vm7, %v1667_v15, %v9866_v18  ;;  %v1732_v40 = vsel %vm1726_vm8, %v1699_v16, %v6675_v46  ;;  %v1830_v57 = vsel %vm1825_vm11, %v1797_v4, %v1508_v47  ;;  %v9868_v10 = vld [vmem:[#allocation85_spill] sm:$0xff]  ;;  %v9877_v18 = vld [vmem:[#allocation162_spill] sm:$0xff] }
 0x23a   : > { %v1506_v45 = vpop.permute.xlu1 %1505  ;;  %v1733_v43 = vsel %vm1726_vm8, %v1700_v7, %v6657_v19  ;;  %v1765_v37 = vsel %vm1759_vm9, %v1732_v40, %v6808_v33  ;;  %v1603_v3 = vsel %vm448_vm0, %v9869_v38, %v9868_v10  ;;  %v9883_v10 = vld [vmem:[#allocation136_spill] sm:$0xff] }
 0x23b   : > { %v1829_v53 = vsel %vm1825_vm11, %v1796_v0, %v1506_v45  ;;  %v1766_v5 = vsel %vm1759_vm9, %v1733_v43, %v6798_v56  ;;  %v1798_v44 = vsel %vm1792_vm10, %v1765_v37, %v1414_v62  ;;  %v9870_v56 = vld [vmem:[#allocation88_spill] sm:$0xff]  ;;  %v1636_v62 = vsel %vm1627_vm3, %v1603_v3, %v9872_v49  ;;  %v9884_v3 = vld [vmem:[#allocation139_spill] sm:$0xff]  ;;  %v9885_v49 = vld [vmem:[#allocation161_spill] sm:$0xff] }
 0x23c   : > { %4686 = vmatmul.mubr.msk.f32.gmra.mrb[2].mxu0 %vm1863_vm12, %v1829_v53  ;;  %v1799_v26 = vsel %vm1792_vm10, %v1766_v5, %v1416_v63  ;;  %v1602_v33 = vsel %vm448_vm0, %v9871_v13, %v9870_v56  ;;  %v1669_v15 = vsel %vm1660_vm6, %v1636_v62, %v9874_v31  ;;  %v9876_v63 = vld [vmem:[#allocation158_spill] sm:$0xff] }
 0x23d   : > { %4688 = vmatprep.mubr.msk.f32.mxu0 %vm1863_vm12, %v1830_v57  ;;  %v1512_v19 = vpop.permute.xlu0 %1511  ;;  %v1635_v14 = vsel %vm1627_vm3, %v1602_v33, %v9873_v41  ;;  %v1702_v45 = vsel %vm1693_vm7, %v1669_v15, %v9876_v63  ;;  %v9886_v62 = vld [vmem:[#allocation166_spill] sm:$0xff] }
 0x23e   : > { %v1510_v34 = vpop.permute.xlu1 %1509  ;;  %v1832_v46 = vsel %vm1825_vm11, %v1799_v26, %v1512_v19  ;;  %v1668_v54 = vsel %vm1660_vm6, %v1635_v14, %v9875_v24  ;;  %v1735_v29 = vsel %vm1726_vm8, %v1702_v45, %v6673_v30  ;;  %v9878_v30 = vld [vmem:[#allocation87_spill] sm:$0xff]  ;;  %v9880_v19 = vld [vmem:[#allocation90_spill] sm:$0xff] }
 0x23f   : > { %v1831_v47 = vsel %vm1825_vm11, %v1798_v44, %v1510_v34  ;;  %v1701_v7 = vsel %vm1693_vm7, %v1668_v54, %v9877_v18  ;;  %v1768_v4 = vsel %vm1759_vm9, %v1735_v29, %v6806_v28  ;;  %v9879_v26 = vld [vmem:[#allocation167_spill] sm:$0xff]  ;;  %v1604_v28 = vsel %vm448_vm0, %v6545_v8, %v9880_v19  ;;  %v9889_v29 = vld [vmem:[#allocation92_spill] sm:$0xff] }
 0x240   : > { %4689 = vmatmul.mubr.msk.f32.gmra.mrb[4].mxu0 %vm1863_vm12, %v1831_v47  ;;  %v1734_v16 = vsel %vm1726_vm8, %v1701_v7, %v6687_v55  ;;  %v1605_v55 = vsel %vm448_vm0, %v9879_v26, %v9878_v30  ;;  %v9888_v7 = vld [vmem:[#allocation171_spill] sm:$0xff]  ;;  %v9894_v30 = vld [vmem:[#allocation165_spill] sm:$0xff]  ;;  %v9895_v26 = vld [vmem:[#allocation170_spill] sm:$0xff] }
 0x241   : > { %4691 = vmatprep.mubr.msk.f32.mxu0 %vm1863_vm12, %v1832_v46  ;;  %v1420_v6 = vpop.permute.xlu0 %1419  ;;  %v1767_v53 = vsel %vm1759_vm9, %v1734_v16, %v6816_v61  ;;  %v9881_v61 = vld [vmem:[#allocation119_spill] sm:$0xff]  ;;  %v9882_v46 = vld [vmem:[#allocation121_spill] sm:$0xff] }
 0x242   : > { %v1418_v0 = vpop.permute.xlu1 %1417  ;;  %v1801_v43 = vsel %vm1792_vm10, %v1768_v4, %v1420_v6  ;;  %v1638_v34 = vsel %vm1627_vm3, %v1605_v55, %v9881_v61  ;;  %v1637_v47 = vsel %vm1627_vm3, %v1604_v28, %v9882_v46  ;;  %v9891_v4 = vld [vmem:[#allocation25_spill] sm:$0xff] }
 0x243   : > { %v1800_v40 = vsel %vm1792_vm10, %v1767_v53, %v1418_v0  ;;  %v1671_v38 = vsel %vm1660_vm6, %v1638_v34, %v9883_v10  ;;  %v1670_v56 = vsel %vm1660_vm6, %v1637_v47, %v9884_v3 }
 0x244   : > { %v1704_v8 = vsel %vm1693_vm7, %v1671_v38, %v9885_v49  ;;  %v1703_v41 = vsel %vm1693_vm7, %v1670_v56, %v9886_v62  ;;  %v9899_v49 = vld [vmem:[#allocation178_spill] sm:$0xff] }
 0x245   : > { %v1516_v57 = vpop.permute.xlu0 %1515  ;;  %v1737_v14 = vsel %vm1726_vm8, %v1704_v8, %v6685_v9  ;;  %v1736_v31 = vsel %vm1726_vm8, %v1703_v41, %v6696_v32  ;;  %v9887_v9 = vld [vmem:[#allocation89_spill] sm:$0xff]  ;;  %v9901_v62 = vld [vmem:[#allocation26_spill] sm:$0xff] }
 0x246   : > { %v1514_v5 = vpop.permute.xlu1 %1513  ;;  %v1834_v37 = vsel %vm1825_vm11, %v1801_v43, %v1516_v57  ;;  %v1770_v15 = vsel %vm1759_vm9, %v1737_v14, %v6814_v1  ;;  %v1769_v24 = vsel %vm1759_vm9, %v1736_v31, %v6824_v60  ;;  %v1607_v32 = vsel %vm448_vm0, %v9888_v7, %v9887_v9  ;;  %v9890_v60 = vld [vmem:[#allocation22_spill] sm:$0xff]  ;;  %v9893_v57 = vld [vmem:[#allocation141_spill] sm:$0xff]  ;;  %v9902_v14 = vld [vmem:[#allocation140_spill] sm:$0xff] }
 0x247   : > { %v1833_v44 = vsel %vm1825_vm11, %v1800_v40, %v1514_v5  ;;  %v1606_v1 = vsel %vm448_vm0, %v6557_v36, %v9889_v29  ;;  %v1640_v16 = vsel %vm1627_vm3, %v1607_v32, %v9890_v60  ;;  %v9892_v43 = vld [vmem:[#allocation138_spill] sm:$0xff] }
 0x248   : > { %4692 = vmatmul.mubr.msk.f32.gmra.mrb[6].mxu0 %vm1863_vm12, %v1833_v44  ;;  %v1639_v53 = vsel %vm1627_vm3, %v1606_v1, %v9891_v4  ;;  %v1673_v40 = vsel %vm1660_vm6, %v1640_v16, %v9892_v43 }
 0x249   : > { %4694 = vmatprep.mubr.msk.f32.mxu0 %vm1863_vm12, %v1834_v37  ;;  %v1424_v13 = vpop.permute.xlu0 %1423  ;;  %v1672_v5 = vsel %vm1660_vm6, %v1639_v53, %v9893_v57  ;;  %v1706_v36 = vsel %vm1693_vm7, %v1673_v40, %v9894_v30  ;;  %v9907_v40 = vld [vmem:[#allocation177_spill] sm:$0xff]  ;;  %v9908_v57 = vld [vmem:[#allocation96_spill] sm:$0xff]  ;;  %v9911_v30 = vld [vmem:[#allocation63_spill] sm:$0xff] }
 0x24a   : > { %v1422_v33 = vpop.permute.xlu1 %1421  ;;  %v1803_v54 = vsel %vm1792_vm10, %v1770_v15, %v1424_v13  ;;  %v1705_v55 = vsel %vm1693_vm7, %v1672_v5, %v9895_v26  ;;  %v1739_v19 = vsel %vm1726_vm8, %v1706_v36, %v6694_v27  ;;  %v9896_v27 = vld [vmem:[#allocation91_spill] sm:$0xff]  ;;  %v9897_v13 = vld [vmem:[#allocation174_spill] sm:$0xff]  ;;  %v9903_v15 = vld [vmem:[#allocation64_spill] sm:$0xff] }
 0x24b   : > { %v1802_v6 = vsel %vm1792_vm10, %v1769_v24, %v1422_v33  ;;  %v1738_v28 = vsel %vm1726_vm8, %v1705_v55, %v6704_v58  ;;  %v1772_v61 = vsel %vm1759_vm9, %v1739_v19, %v6822_v11  ;;  %v1609_v58 = vsel %vm448_vm0, %v9897_v13, %v9896_v27  ;;  %v9898_v33 = vld [vmem:[#allocation94_spill] sm:$0xff]  ;;  %v9912_v26 = vld [vmem:[#allocation143_spill] sm:$0xff] }
 0x24c   : > { %v1771_v34 = vsel %vm1759_vm9, %v1738_v28, %v6832_v52  ;;  %v1608_v11 = vsel %vm448_vm0, %v9899_v49, %v9898_v33  ;;  %v9900_v52 = vld [vmem:[#allocation24_spill] sm:$0xff] }
 0x24d   : > { %v1520_v0 = vpop.permute.xlu0 %1519  ;;  %v1642_v8 = vsel %vm1627_vm3, %v1609_v58, %v9900_v52  ;;  %v1641_v41 = vsel %vm1627_vm3, %v1608_v11, %v9901_v62  ;;  %v9915_v11 = vld [vmem:[#allocation95_spill] sm:$0xff]  ;;  %v9916_v52 = vld [vmem:[#allocation98_spill] sm:$0xff]  ;;  %v9918_v62 = vld [vmem:[#allocation37_spill] sm:$0xff] }
 0x24e   : > { %v1518_v63 = vpop.permute.xlu1 %1517  ;;  %v1836_v45 = vsel %vm1825_vm11, %v1803_v54, %v1520_v0  ;;  %v1675_v31 = vsel %vm1660_vm6, %v1642_v8, %v9902_v14  ;;  %v1674_v24 = vsel %vm1660_vm6, %v1641_v41, %v9903_v15  ;;  %v9904_v0 = vld [vmem:[#allocation169_spill] sm:$0xff]  ;;  %v9919_v14 = vld [vmem:[#allocation142_spill] sm:$0xff]  ;;  %v9920_v15 = vld [vmem:[#allocation144_spill] sm:$0xff] }
 0x24f   : > { %v1835_v18 = vsel %vm1825_vm11, %v1802_v6, %v1518_v63  ;;  %v1708_v63 = vsel %vm1693_vm7, %v1675_v31, %v9904_v0  ;;  %v9921_v0 = vld [vmem:[#allocation175_spill] sm:$0xff] }
 0x250   : > { %4695 = vmatmul.mubr.msk.f32.gmra.mrb[8].mxu0 %vm1863_vm12, %v1835_v18  ;;  %v1741_v9 = vsel %vm1726_vm8, %v1708_v63, %v6702_v25  ;;  %v9906_v25 = vld [vmem:[#allocation93_spill] sm:$0xff] }
 0x251   : > { %4697 = vmatprep.mubr.msk.f32.mxu0 %vm1863_vm12, %v1836_v45  ;;  %v1428_v37 = vpop.permute.xlu0 %1427  ;;  %v9905_v45 = vld [vmem:[#allocation173_spill] sm:$0xff]  ;;  %v1774_v32 = vsel %vm1759_vm9, %v1741_v9, %v6830_v51  ;;  %v1610_v51 = vsel %vm448_vm0, %v6579_v20, %v9908_v57 }
 0x252   : > { %v1426_v44 = vpop.permute.xlu1 %1425  ;;  %v1805_v46 = vsel %vm1792_vm10, %v1772_v61, %v1428_v37  ;;  %v1707_v18 = vsel %vm1693_vm7, %v1674_v24, %v9905_v45  ;;  %v9910_v37 = vld [vmem:[#allocation33_spill] sm:$0xff]  ;;  %v9913_v61 = vld [vmem:[#allocation172_spill] sm:$0xff] }
 0x253   : > { %v1804_v47 = vsel %vm1792_vm10, %v1771_v34, %v1426_v44  ;;  %v1740_v7 = vsel %vm1726_vm8, %v1707_v18, %v6712_v39  ;;  %v1611_v39 = vsel %vm448_vm0, %v9907_v40, %v9906_v25  ;;  %v1643_v44 = vsel %vm1627_vm3, %v1610_v51, %v9910_v37  ;;  %v9914_v34 = vld [vmem:[#allocation176_spill] sm:$0xff]  ;;  %v9925_v40 = vld [vmem:[#allocation43_spill] sm:$0xff]  ;;  %v9926_v57 = vld [vmem:[#allocation65_spill] sm:$0xff] }
 0x254   : > { %v1773_v29 = vsel %vm1759_vm9, %v1740_v7, %v6840_v50  ;;  %v9909_v50 = vld [vmem:[#allocation29_spill] sm:$0xff]  ;;  %v1676_v55 = vsel %vm1660_vm6, %v1643_v44, %v9912_v26 }
 0x255   : > { %v1524_v10 = vpop.permute.xlu0 %1523  ;;  %v1644_v5 = vsel %vm1627_vm3, %v1611_v39, %v9909_v50  ;;  %v9927_v50 = vld [vmem:[#allocation145_spill] sm:$0xff] }
 0x256   : > { %v1522_v38 = vpop.permute.xlu1 %1521  ;;  %v1838_v3 = vsel %vm1825_vm11, %v1805_v46, %v1524_v10  ;;  %v1677_v36 = vsel %vm1660_vm6, %v1644_v5, %v9911_v30  ;;  %v1709_v46 = vsel %vm1693_vm7, %v1676_v55, %v9914_v34  ;;  %v9928_v30 = vld [vmem:[#allocation179_spill] sm:$0xff]  ;;  %v9929_v26 = vld [vmem:[#allocation181_spill] sm:$0xff]  ;;  %v9932_v34 = vld [vmem:[#allocation68_spill] sm:$0xff] }
 0x257   : > { %v1837_v56 = vsel %vm1825_vm11, %v1804_v47, %v1522_v38  ;;  %v1710_v20 = vsel %vm1693_vm7, %v1677_v36, %v9913_v61  ;;  %v1742_v10 = vsel %vm1726_vm8, %v1709_v46, %v6720_v12  ;;  %v9931_v61 = vld [vmem:[#allocation194_spill] sm:$0xff] }
 0x258   : > { %4698 = vmatmul.mubr.msk.f32.gmra.mrb[10].mxu0 %vm1863_vm12, %v1837_v56  ;;  %v1743_v47 = vsel %vm1726_vm8, %v1710_v20, %v6710_v17  ;;  %v4943_v17 = vld [vmem:[#allocation2 + $0xd8] sm:$0xff] }
 0x259   : > { %4700 = vmatprep.mubr.msk.f32.mxu0 %vm1863_vm12, %v1838_v3  ;;  %v1432_v54 = vpop.permute.xlu0 %1431  ;;  %v1776_v38 = vsel %vm1759_vm9, %v1743_v47, %v6838_v59  ;;  %v1775_v3 = vsel %vm1759_vm9, %v1742_v10, %v6848_v48  ;;  %v1613_v12 = vsel %vm448_vm0, %v4943_v17, %v9915_v11  ;;  %v1612_v59 = vsel %vm448_vm0, %v6589_v2, %v9916_v52  ;;  %v9917_v48 = vld [vmem:[#allocation32_spill] sm:$0xff]  ;;  %v9933_v47 = vld [vmem:[#allocation50_spill] sm:$0xff]  ;;  %v4947_v11 = vld [vmem:[#allocation2 + $0xf8] sm:$0xff] }
 0x25a   : > { %v1430_v6 = vpop.permute.xlu1 %1429  ;;  %v1807_v1 = vsel %vm1792_vm10, %v1774_v32, %v1432_v54  ;;  %v1646_v8 = vsel %vm1627_vm3, %v1613_v12, %v9917_v48  ;;  %v1645_v41 = vsel %vm1627_vm3, %v1612_v59, %v9918_v62  ;;  %v9935_v12 = vld [vmem:[#allocation102_spill] sm:$0xff] }
 0x25b   : > { %v1806_v60 = vsel %vm1792_vm10, %v1773_v29, %v1430_v6  ;;  %v1679_v31 = vsel %vm1660_vm6, %v1646_v8, %v9919_v14  ;;  %v1678_v24 = vsel %vm1660_vm6, %v1645_v41, %v9920_v15  ;;  %v1616_v52 = vsel %vm448_vm0, %v4947_v11, %v9935_v12  ;;  %v9936_v59 = vld [vmem:[#allocation42_spill] sm:$0xff]  ;;  %v9937_v8 = vld [vmem:[#allocation45_spill] sm:$0xff]  ;;  %v4950_v12 = vld [vmem:[#allocation2 + $0x138] sm:$0xff] }
 0x25c   : > { %v1712_v2 = vsel %vm1693_vm7, %v1679_v31, %v9921_v0  ;;  %v1711_v63 = vsel %vm1693_vm7, %v1678_v24, %v6575_v23  ;;  %v1649_v62 = vsel %vm1627_vm3, %v1616_v52, %v9937_v8  ;;  %v9938_v41 = vld [vmem:[#allocation66_spill] sm:$0xff]  ;;  %v9958_v52 = vld [vmem:[#allocation103_spill] sm:$0xff] }
 0x25d   : > { %v1528_v16 = vpop.permute.xlu0 %1527  ;;  %v1745_v45 = vsel %vm1726_vm8, %v1712_v2, %v6718_v42  ;;  %v1744_v18 = vsel %vm1726_vm8, %v1711_v63, %v6728_v22  ;;  %v4944_v42 = vld [vmem:[#allocation2 + $0xf0] sm:$0xff]  ;;  %v9941_v2 = vld [vmem:[#allocation183_spill] sm:$0xff] }
 0x25e   : > { %v1526_v4 = vpop.permute.xlu1 %1525  ;;  %v1840_v53 = vsel %vm1825_vm11, %v1807_v1, %v1528_v16  ;;  %v1778_v9 = vsel %vm1759_vm9, %v1745_v45, %v6846_v35  ;;  %v1777_v7 = vsel %vm1759_vm9, %v1744_v18, %v6856_v21  ;;  %v9924_v21 = vld [vmem:[#allocation36_spill] sm:$0xff]  ;;  %v9939_v31 = vld [vmem:[#allocation146_spill] sm:$0xff]  ;;  %v9942_v45 = vld [vmem:[#allocation193_spill] sm:$0xff] }
 0x25f   : > { %v1839_v43 = vsel %vm1825_vm11, %v1806_v60, %v1526_v4  ;;  %v9922_v4 = vld [vmem:[#allocation97_spill] sm:$0xff]  ;;  %v1682_v15 = vsel %vm1660_vm6, %v1649_v62, %v9939_v31  ;;  %v9959_v8 = vld [vmem:[#allocation106_spill] sm:$0xff] }
 0x260   : > { %4701 = vmatmul.mubr.msk.f32.gmra.mrb[12].mxu0 %vm1863_vm12, %v1839_v43  ;;  %v1615_v22 = vsel %vm448_vm0, %v4944_v42, %v9922_v4  ;;  %v9923_v43 = vld [vmem:[#allocation100_spill] sm:$0xff]  ;;  %v1715_v63 = vsel %vm1693_vm7, %v1682_v15, %v9941_v2  ;;  %v9961_v31 = vld [vmem:[#allocation122_spill] sm:$0xff] }
 0x261   : > { %4703 = vmatprep.mubr.msk.f32.mxu0 %vm1863_vm12, %v1840_v53  ;;  %v1436_v19 = vpop.permute.xlu0 %1435  ;;  %v4945_v53 = vld [vmem:[#allocation2 + $0xe0] sm:$0xff]  ;;  %v1648_v25 = vsel %vm1627_vm3, %v1615_v22, %v9924_v21 }
 0x262   : > { %v1434_v28 = vpop.permute.xlu1 %1433  ;;  %v1809_v56 = vsel %vm1792_vm10, %v1776_v38, %v1436_v19  ;;  %v1614_v35 = vsel %vm448_vm0, %v4945_v53, %v9923_v43  ;;  %v1681_v51 = vsel %vm1660_vm6, %v1648_v25, %v9926_v57  ;;  %v9930_v19 = vld [vmem:[#allocation192_spill] sm:$0xff]  ;;  %v4949_v25 = vld [vmem:[#allocation2 + $0x110] sm:$0xff] }
 0x263   : > { %v1808_v27 = vsel %vm1792_vm10, %v1775_v3, %v1434_v28  ;;  %v1647_v39 = vsel %vm1627_vm3, %v1614_v35, %v9925_v40  ;;  %v1714_v36 = vsel %vm1693_vm7, %v1681_v51, %v9928_v30  ;;  %v4948_v43 = vld [vmem:[#allocation2 + $0x120] sm:$0xff]  ;;  %v9946_v35 = vld [vmem:[#allocation101_spill] sm:$0xff]  ;;  %v9951_v30 = vld [vmem:[#allocation147_spill] sm:$0xff] }
 0x264   : > { %v1680_v5 = vsel %vm1660_vm6, %v1647_v39, %v9927_v50  ;;  %v1747_v28 = vsel %vm1726_vm8, %v1714_v36, %v9930_v19  ;;  %v1619_v21 = vsel %vm448_vm0, %v4948_v43, %v9946_v35  ;;  %v9947_v40 = vld [vmem:[#allocation104_spill] sm:$0xff]  ;;  %v9949_v50 = vld [vmem:[#allocation46_spill] sm:$0xff] }
 0x265   : > { %v1532_v13 = vpop.permute.xlu0 %1531  ;;  %v1713_v55 = vsel %vm1693_vm7, %v1680_v5, %v9929_v26  ;;  %v1780_v46 = vsel %vm1759_vm9, %v1747_v28, %v9932_v34  ;;  %v1618_v39 = vsel %vm448_vm0, %v4949_v25, %v9947_v40  ;;  %v9948_v57 = vld [vmem:[#allocation44_spill] sm:$0xff]  ;;  %v9952_v19 = vld [vmem:[#allocation182_spill] sm:$0xff]  ;;  %v9954_v34 = vld [vmem:[#allocation195_spill] sm:$0xff]  ;;  %v9970_v40 = vmov 0.0  }
 0x266   : > { %v1530_v58 = vpop.permute.xlu1 %1529  ;;  %v1842_v33 = vsel %vm1825_vm11, %v1809_v56, %v1532_v13  ;;  %v1746_v20 = vsel %vm1726_vm8, %v1713_v55, %v9931_v61  ;;  %v1652_v51 = vsel %vm1627_vm3, %v1619_v21, %v9948_v57  ;;  %v1651_v5 = vsel %vm1627_vm3, %v1618_v39, %v9949_v50  ;;  %v9953_v61 = vld [vmem:[#allocation185_spill] sm:$0xff]  ;;  %2305 = vst.msk [vmem:[#allocation3 + $0x28] sm:$0x3] %vm2301_vm13, %v9970_v40  ;;  %v4952_v39 = vld [vmem:[#allocation2 + $0x150] sm:$0xff]  ;;  %v4953_v50 = vld [vmem:[#allocation2 + $0x140] sm:$0xff] }
 0x267   : > { %v1841_v49 = vsel %vm1825_vm11, %v1808_v27, %v1530_v58  ;;  %v1779_v10 = vsel %vm1759_vm9, %v1746_v20, %v9933_v47  ;;  %v1684_v36 = vsel %vm1660_vm6, %v1651_v5, %v9951_v30  ;;  %v9955_v47 = vld [vmem:[#allocation198_spill] sm:$0xff]  ;;  %2302 = vst.msk [vmem:[#allocation3 + $0x10] sm:$0x3] %vm2301_vm13, %v9970_v40  ;;  %2308 = vst.msk [vmem:[#allocation3 + $0x40] sm:$0x3] %vm2301_vm13, %v9970_v40  ;;  %v9971_v57 = vld [vmem:[#allocation105_spill] sm:$0xff] }
 0x268   : > { %4704 = vmatmul.mubr.msk.f32.gmra.mrb[14].mxu0 %vm1863_vm12, %v1841_v49  ;;  %v9934_v49 = vld [vmem:[#allocation99_spill] sm:$0xff]  ;;  %v1717_v20 = vsel %vm1693_vm7, %v1684_v36, %v9953_v61  ;;  %2311 = vst.msk [vmem:[#allocation3 + $0x58] sm:$0x3] %vm2301_vm13, %v9970_v40  ;;  %2314 = vst.msk [vmem:[#allocation3 + $0x70] sm:$0x3] %vm2301_vm13, %v9970_v40  ;;  %v9972_v5 = vld [vmem:[#allocation108_spill] sm:$0xff] }
 0x269   : > { %4706 = vmatprep.mubr.msk.f32.mxu0 %vm1863_vm12, %v1842_v33  ;;  %v1440_v54 = vpop.permute.xlu0 %1439  ;;  %v4946_v33 = vld [vmem:[#allocation2 + $0x108] sm:$0xff]  ;;  %2317 = vst.msk [vmem:[#allocation3 + $0x88] sm:$0x3] %vm2301_vm13, %v9970_v40  ;;  %2320 = vst.msk [vmem:[#allocation3 + $0xa0] sm:$0x3] %vm2301_vm13, %v9970_v40  ;;  %v9974_v36 = vld [vmem:[#allocation124_spill] sm:$0xff] }
 0x26a   : > { %v1438_v6 = vpop.permute.xlu1 %1437  ;;  %v1811_v32 = vsel %vm1792_vm10, %v1778_v9, %v1440_v54  ;;  %v1617_v17 = vsel %vm448_vm0, %v4946_v33, %v9934_v49  ;;  %v9943_v9 = vld [vmem:[#allocation196_spill] sm:$0xff]  ;;  %2323 = vst.msk [vmem:[#allocation3 + $0xb8] sm:$0x3] %vm2301_vm13, %v9970_v40  ;;  %2326 = vst.msk [vmem:[#allocation3 + $0xd0] sm:$0x3] %vm2301_vm13, %v9970_v40 }
 0x26b   : > { %v1810_v29 = vsel %vm1792_vm10, %v1777_v7, %v1438_v6  ;;  %v1650_v48 = vsel %vm1627_vm3, %v1617_v17, %v9936_v59  ;;  %v9940_v6 = vld [vmem:[#allocation180_spill] sm:$0xff]  ;;  %v1748_v7 = vsel %vm1726_vm8, %v1715_v63, %v9943_v9  ;;  %v1621_v59 = vsel %vm448_vm0, %v4950_v12, %v9958_v52  ;;  %v9965_v9 = vld [vmem:[#allocation187_spill] sm:$0xff]  ;;  %2329 = vst.msk [vmem:[#allocation3 + $0xe8] sm:$0x3] %vm2301_vm13, %v9970_v40 }
 0x26c   : > { %v1683_v14 = vsel %vm1660_vm6, %v1650_v48, %v9938_v41  ;;  %v4951_v48 = vld [vmem:[#allocation2 + $0x128] sm:$0xff]  ;;  %v9960_v41 = vld [vmem:[#allocation47_spill] sm:$0xff]  ;;  %2332 = vst.msk [vmem:[#allocation3 + $0x100] sm:$0x3] %vm2301_vm13, %v9970_v40  ;;  %2335 = vst.msk [vmem:[#allocation3 + $0x118] sm:$0x3] %vm2301_vm13, %v9970_v40 }
 0x26d   : > { %v1536_v1 = vpop.permute.xlu0 %1535  ;;  %v1716_v0 = vsel %vm1693_vm7, %v1683_v14, %v9940_v6  ;;  %v1620_v62 = vsel %vm448_vm0, %v4951_v48, %v9959_v8  ;;  %v1654_v14 = vsel %vm1627_vm3, %v1621_v59, %v9960_v41  ;;  %v9963_v6 = vld [vmem:[#allocation149_spill] sm:$0xff]  ;;  %2338 = vst.msk [vmem:[#allocation3 + $0x130] sm:$0x3] %vm2301_vm13, %v9970_v40  ;;  %2341 = vst.msk [vmem:[#allocation3 + $0x148] sm:$0x3] %vm2301_vm13, %v9970_v40  ;;  %v7413_v48 = vld [vmem:[#allocation3] sm:$0xff] }
 0x26e   : > { %v1534_v60 = vpop.permute.xlu1 %1533  ;;  %v1844_v23 = vsel %vm1825_vm11, %v1811_v32, %v1536_v1  ;;  %v1749_v18 = vsel %vm1726_vm8, %v1716_v0, %v9942_v45  ;;  %v9944_v32 = vld [vmem:[#allocation48_spill] sm:$0xff]  ;;  %v9945_v1 = vld [vmem:[#allocation51_spill] sm:$0xff]  ;;  %v1653_v15 = vsel %vm1627_vm3, %v1620_v62, %v9961_v31  ;;  %2344 = vst.msk [vmem:[#allocation3 + $0x160] sm:$0x3] %vm2301_vm13, %v9970_v40  ;;  %2347 = vst.msk [vmem:[#allocation3 + $0x178] sm:$0x3] %vm2301_vm13, %v9970_v40 }
 0x26f   : > { %v1843_v16 = vsel %vm1825_vm11, %v1810_v29, %v1534_v60  ;;  %v1782_v29 = vsel %vm1759_vm9, %v1749_v18, %v9944_v32  ;;  %v1781_v60 = vsel %vm1759_vm9, %v1748_v7, %v9945_v1  ;;  %v1686_v0 = vsel %vm1660_vm6, %v1653_v15, %v9963_v6  ;;  %v9964_v45 = vld [vmem:[#allocation184_spill] sm:$0xff]  ;;  %v9966_v32 = vld [vmem:[#allocation197_spill] sm:$0xff]  ;;  %2350 = vst.msk [vmem:[#allocation3 + $0x190] sm:$0x3] %vm2301_vm13, %v9970_v40  ;;  %v7415_v8 = vld [vmem:[#allocation3 + $0x8] sm:$0xff] }
 0x270   : > { %4707 = vmatmul.mubr.msk.f32.gmra.mrb[16].mxu0 %vm1863_vm12, %v1843_v16  ;;  %v1719_v7 = vsel %vm1693_vm7, %v1686_v0, %v9965_v9  ;;  %v9967_v1 = vld [vmem:[#allocation200_spill] sm:$0xff]  ;;  %2353 = vst.msk [vmem:[#allocation3 + $0x1a8] sm:$0x3] %vm2301_vm13, %v9970_v40  ;;  %v2489_v31 = vrot.slane %v7413_v48, 1  ;;  %v2490_v15 = vrot.slane %v7415_v8, 1  ;;  %v4955_v0 = vld [vmem:[#allocation2 + $0x158] sm:$0xff] }
 0x271   : > { %4709 = vmatprep.mubr.msk.f32.mxu0 %vm1863_vm12, %v1844_v23  ;;  %v1444_v37 = vpop.permute.xlu0 %1443  ;;  %v7417_v62 = vld [vmem:[#allocation3 + $0x10] sm:$0x3] }
 0x272   : > { %v1442_v44 = vpop.permute.xlu1 %1441  ;;  %v1813_v38 = vsel %vm1792_vm10, %v1780_v46, %v1444_v37  ;;  %v9950_v37 = vld [vmem:[#allocation67_spill] sm:$0xff] }
 0x273   : > { %v1812_v3 = vsel %vm1792_vm10, %v1779_v10, %v1442_v44  ;;  %v1685_v44 = vsel %vm1660_vm6, %v1652_v51, %v9950_v37  ;;  %v1750_v10 = vsel %vm1726_vm8, %v1717_v20, %v9955_v47  ;;  %v1623_v51 = vsel %vm448_vm0, %v4952_v39, %v9971_v57  ;;  %v9992_v39 = vld [vmem:[#allocation203_spill] sm:$0xff] }
 0x274   : > { %v1718_v28 = vsel %vm1693_vm7, %v1685_v44, %v9952_v19  ;;  %v1622_v37 = vsel %vm448_vm0, %v4953_v50, %v9972_v5  ;;  %v9973_v44 = vld [vmem:[#allocation49_spill] sm:$0xff]  ;;  %v9994_v5 = vld [vmem:[#allocation59_spill] sm:$0xff] }
 0x275   : > { %v1540_v56 = vpop.permute.xlu0 %1539  ;;  %v1751_v46 = vsel %vm1726_vm8, %v1718_v28, %v9954_v34  ;;  %v1656_v30 = vsel %vm1627_vm3, %v1623_v51, %v9973_v44  ;;  %v9976_v28 = vld [vmem:[#allocation150_spill] sm:$0xff] }
 0x276   : > { %v1538_v27 = vpop.permute.xlu1 %1537  ;;  %v1846_v13 = vsel %vm1825_vm11, %v1813_v38, %v1540_v56  ;;  %v9956_v38 = vld [vmem:[#allocation70_spill] sm:$0xff]  ;;  %v9957_v56 = vld [vmem:[#allocation71_spill] sm:$0xff] }
 0x277   : > { %v1845_v58 = vsel %vm1825_vm11, %v1812_v3, %v1538_v27  ;;  %v1784_v3 = vsel %vm1759_vm9, %v1751_v46, %v9956_v38  ;;  %v1783_v27 = vsel %vm1759_vm9, %v1750_v10, %v9957_v56  ;;  %v9977_v46 = vld [vmem:[#allocation186_spill] sm:$0xff]  ;;  %v9978_v10 = vld [vmem:[#allocation189_spill] sm:$0xff] }
 0x278   : > { %4710 = vmatmul.mubr.msk.f32.gmra.mrb[18].mxu0 %vm1863_vm12, %v1845_v58  ;;  %v9993_v51 = vld [vmem:[#allocation74_spill] sm:$0xff] }
 0x279   : > { %4712 = vmatprep.mubr.msk.f32.mxu0 %vm1863_vm12, %v1846_v13  ;;  %v1448_v24 = vpop.permute.xlu0 %1447 }
 0x27a   : > { %v1446_v54 = vpop.permute.xlu1 %1445  ;;  %v1815_v23 = vsel %vm1792_vm10, %v1782_v29, %v1448_v24  ;;  %v9962_v24 = vld [vmem:[#allocation69_spill] sm:$0xff] }
 0x27b   : > { %v1814_v16 = vsel %vm1792_vm10, %v1781_v60, %v1446_v54  ;;  %v1687_v54 = vsel %vm1660_vm6, %v1654_v14, %v9962_v24  ;;  %v1752_v60 = vsel %vm1726_vm8, %v1719_v7, %v9967_v1  ;;  %v4954_v24 = vld [vmem:[#allocation2 + $0x168] sm:$0xff]  ;;  %v9986_v7 = vld [vmem:[#allocation126_spill] sm:$0xff]  ;;  %v9987_v1 = vld [vmem:[#allocation72_spill] sm:$0xff] }
 0x27c   : > { %v1720_v18 = vsel %vm1693_vm7, %v1687_v54, %v9964_v45  ;;  %v9983_v54 = vld [vmem:[#allocation107_spill] sm:$0xff]  ;;  %v2492_v45 = vrot.slane %v7417_v62, 1 }
 0x27d   : > { %v1544_v42 = vpop.permute.xlu0 %1543  ;;  %v1753_v29 = vsel %vm1726_vm8, %v1720_v18, %v9966_v32  ;;  %v1625_v6 = vsel %vm448_vm0, %v4954_v24, %v9983_v54  ;;  %v9985_v18 = vld [vmem:[#allocation123_spill] sm:$0xff] }
 0x27e   : > { %v1542_v4 = vpop.permute.xlu1 %1541  ;;  %v1848_v22 = vsel %vm1825_vm11, %v1815_v23, %v1544_v42  ;;  %v9968_v23 = vld [vmem:[#allocation53_spill] sm:$0xff]  ;;  %v9969_v42 = vld [vmem:[#allocation54_spill] sm:$0xff]  ;;  %v1658_v9 = vsel %vm1627_vm3, %v1625_v6, %v9985_v18 }
 0x27f   : > { %v1847_v53 = vsel %vm1825_vm11, %v1814_v16, %v1542_v4  ;;  %v1786_v16 = vsel %vm1759_vm9, %v1753_v29, %v9968_v23  ;;  %v1785_v4 = vsel %vm1759_vm9, %v1752_v60, %v9969_v42  ;;  %v2491_v29 = vsel %vm639_vm2, %v2489_v31, %v2490_v15  ;;  %v9988_v23 = vld [vmem:[#allocation151_spill] sm:$0xff] }
 0x280   : > { %4713 = vmatmul.mubr.msk.f32.gmra.mrb[20].mxu0 %vm1863_vm12, %v1847_v53  ;;  %v1691_v60 = vsel %vm1660_vm6, %v1658_v9, %v9987_v1  ;;  %2675 = vrot.lane.b32.xlu0 %v2491_v29, %s4999_s17 }
 0x281   : > { %4715 = vmatprep.mubr.msk.f32.mxu0 %vm1863_vm12, %v1848_v22  ;;  %v1452_v26 = vpop.permute.xlu0 %1451 }
 0x282   : > { %v1450_v55 = vpop.permute.xlu1 %1449  ;;  %v1817_v13 = vsel %vm1792_vm10, %v1784_v3, %v1452_v26  ;;  %v1655_v26 = vsel %vm1627_vm3, %v1622_v37, %v9974_v36  ;;  %v9979_v3 = vld [vmem:[#allocation199_spill] sm:$0xff] }
 0x283   : > { %v1816_v58 = vsel %vm1792_vm10, %v1783_v27, %v1450_v55  ;;  %v9975_v55 = vld [vmem:[#allocation148_spill] sm:$0xff]  ;;  %v1688_v61 = vsel %vm1660_vm6, %v1655_v26, %v9976_v28  ;;  %v9980_v27 = vld [vmem:[#allocation202_spill] sm:$0xff] }
 0x284   : > { %v1689_v19 = vsel %vm1660_vm6, %v1656_v30, %v9975_v55  ;;  %v1721_v38 = vsel %vm1693_vm7, %v1688_v61, %v9978_v10  ;;  %v4956_v28 = vld [vmem:[#allocation2 + $0x170] sm:$0xff]  ;;  %v9995_v61 = vld [vmem:[#allocation112_spill] sm:$0xff] }
 0x285   : > { %v1548_v33 = vpop.permute.xlu0 %1547  ;;  %v1722_v47 = vsel %vm1693_vm7, %v1689_v19, %v9977_v46 }
 0x286   : > { %v1546_v49 = vpop.permute.xlu1 %1545  ;;  %v1850_v17 = vsel %vm1825_vm11, %v1817_v13, %v1548_v33  ;;  %v1755_v56 = vsel %vm1726_vm8, %v1722_v47, %v9979_v3  ;;  %v1754_v13 = vsel %vm1726_vm8, %v1721_v38, %v9980_v27  ;;  %v9997_v47 = vld [vmem:[#allocation152_spill] sm:$0xff]  ;;  %v9998_v3 = vld [vmem:[#allocation191_spill] sm:$0xff] }
 0x287   : > { %v1849_v11 = vsel %vm1825_vm11, %v1816_v58, %v1546_v49  ;;  %v9981_v58 = vld [vmem:[#allocation52_spill] sm:$0xff]  ;;  %v9982_v49 = vld [vmem:[#allocation55_spill] sm:$0xff] }
 0x288   : > { %4716 = vmatmul.mubr.msk.f32.gmra.mrb[22].mxu0 %vm1863_vm12, %v1849_v11  ;;  %v1788_v33 = vsel %vm1759_vm9, %v1755_v56, %v9981_v58  ;;  %v9999_v27 = vld [vmem:[#allocation204_spill] sm:$0xff]  ;;  %v10000_v58 = vld [vmem:[#allocation77_spill] sm:$0xff] }
 0x289   : > { %4718 = vmatprep.mubr.msk.f32.mxu0 %vm1863_vm12, %v1850_v17  ;;  %v1456_v2 = vpop.permute.xlu0 %1455  ;;  %v1787_v17 = vsel %vm1759_vm9, %v1754_v13, %v9982_v49 }
 0x28a   : > { %v1454_v63 = vpop.permute.xlu1 %1453  ;;  %v1819_v22 = vsel %vm1792_vm10, %v1786_v16, %v1456_v2  ;;  %v9984_v2 = vld [vmem:[#allocation110_spill] sm:$0xff] }
 0x28b   : > { %v1818_v53 = vsel %vm1792_vm10, %v1785_v4, %v1454_v63  ;;  %v1624_v63 = vsel %vm448_vm0, %v4955_v0, %v9984_v2 }
 0x28c   : > { %v1657_v32 = vsel %vm1627_vm3, %v1624_v63, %v9986_v7 }
 0x28d   : > { %v1552_v43 = vpop.permute.xlu0 %1551  ;;  %v1690_v16 = vsel %vm1660_vm6, %v1657_v32, %v9988_v23 }
 0x28e   : > { %v1550_v35 = vpop.permute.xlu1 %1549  ;;  %v1852_v21 = vsel %vm1825_vm11, %v1819_v22, %v1552_v43  ;;  %v2493_v22 = vsel %vm639_vm2, %v2490_v15, %v2492_v45 }
 0x28f   : > { %v1851_v25 = vsel %vm1825_vm11, %v1818_v53, %v1550_v35  ;;  %v9989_v53 = vld [vmem:[#allocation188_spill] sm:$0xff]  ;;  %v9990_v35 = vld [vmem:[#allocation190_spill] sm:$0xff]  ;;  %2677 = vrot.lane.b32.xlu1 %v2493_v22, %s4999_s17 }
 0x290   : > { %4719 = vmatmul.mubr.msk.f32.gmra.mrb[24].mxu0 %vm1863_vm12, %v1851_v25  ;;  %v1724_v43 = vsel %vm1693_vm7, %v1691_v60, %v9989_v53  ;;  %v9991_v25 = vld [vmem:[#allocation201_spill] sm:$0xff] }
 0x291   : > { %4721 = vmatprep.mubr.msk.f32.mxu0 %vm1863_vm12, %v1852_v21  ;;  %v1460_v20 = vpop.permute.xlu0 %1459  ;;  %v1723_v21 = vsel %vm1693_vm7, %v1690_v16, %v9990_v35  ;;  %v1757_v40 = vsel %vm1726_vm8, %v1724_v43, %v9991_v25 }
 0x292   : > { %v1458_v34 = vpop.permute.xlu1 %1457  ;;  %v1821_v11 = vsel %vm1792_vm10, %v1788_v33, %v1460_v20  ;;  %v1756_v57 = vsel %vm1726_vm8, %v1723_v21, %v9992_v39  ;;  %v1790_v50 = vsel %vm1759_vm9, %v1757_v40, %v9993_v51  ;;  %v1626_v20 = vsel %vm448_vm0, %v4956_v28, %v9995_v61 }
 0x293   : > { %v1820_v12 = vsel %vm1792_vm10, %v1787_v17, %v1458_v34  ;;  %v1789_v37 = vsel %vm1759_vm9, %v1756_v57, %v9994_v5  ;;  %v9996_v34 = vld [vmem:[#allocation128_spill] sm:$0xff] }
 0x294   : > { %v1659_v46 = vsel %vm1627_vm3, %v1626_v20, %v9996_v34 }
 0x295   : > { %v1556_v52 = vpop.permute.xlu0 %1555  ;;  %v1692_v10 = vsel %vm1660_vm6, %v1659_v46, %v9997_v47 }
 0x296   : > { %v1554_v59 = vpop.permute.xlu1 %1553  ;;  %v1854_v41 = vsel %vm1825_vm11, %v1821_v11, %v1556_v52  ;;  %v1725_v56 = vsel %vm1693_vm7, %v1692_v10, %v9998_v3 }
 0x297   : > { %v1853_v14 = vsel %vm1825_vm11, %v1820_v12, %v1554_v59  ;;  %v1758_v13 = vsel %vm1726_vm8, %v1725_v56, %v9999_v27  ;;  %v10001_v12 = vld [vmem:[#allocation6_spill] sm:$0xff]  ;;  %v7481_v59 = vld [vmem:[%s9289_s4] ss:$0 sm:$0xff] }
 0x298   : > { %4722 = vmatmul.mubr.msk.f32.gmra.mrb[26].mxu0 %vm1863_vm12, %v1853_v14  ;;  %v1791_v33 = vsel %vm1759_vm9, %v1758_v13, %v10000_v58  ;;  %v10002_v52 = vmax.f32 %v10001_v12, 0.0  ;;  %v7486_v14 = vld [vmem:[%s9290_s5] ss:$0 sm:$0xff] }
 0x299   : > { %4724 = vmatprep.mubr.msk.f32.mxu0 %vm1863_vm12, %v1854_v41  ;;  %v1464_v42 = vpop.permute.xlu0 %1463 }
 0x29a   : > { %v1462_v4 = vpop.permute.xlu1 %1461  ;;  %v1823_v44 = vsel %vm1792_vm10, %v1790_v50, %v1464_v42 }
 0x29b   : > { %v1822_v30 = vsel %vm1792_vm10, %v1789_v37, %v1462_v4 }
 0x29d   : > { %v1560_v36 = vpop.permute.xlu0 %1559 }
 0x29e   : > { %v1558_v26 = vpop.permute.xlu1 %1557  ;;  %v1856_v55 = vsel %vm1825_vm11, %v1823_v44, %v1560_v36 }
 0x29f   : > { %v1855_v19 = vsel %vm1825_vm11, %v1822_v30, %v1558_v26 }
 0x2a0   : > { %4725 = vmatmul.mubr.msk.f32.gmra.mrb[28].mxu0 %vm1863_vm12, %v1855_v19 }
 0x2a1   : > { %4727 = vmatprep.mubr.msk.f32.mxu0 %vm1863_vm12, %v1856_v55 }
 0x2a2   : > { %v1466_v38 = vpop.permute.xlu1 %1465 }
 0x2a3   : > { %v1824_v49 = vsel %vm1792_vm10, %v1791_v33, %v1466_v38 }
 0x2a6   : > { %v1562_v17 = vpop.permute.xlu1 %1561 }
 0x2a7   : > { %v1857_v11 = vsel %vm1825_vm11, %v1824_v49, %v1562_v17 }
 0x2a8   : > { %4728 = vmatmul.mubr.msk.f32.gmra.mrb[30].mxu0 %vm1863_vm12, %v1857_v11 }
 0x2a9   : > { %4732 = vmatprep.mubr.msk.f32.mxu0 %vm448_vm0, %v10002_v52 }
 0x30b   : > { %v4684_v41 = vpop.f32.mrb[0].mxu0 }
 0x30c   : > { %v2197_v31 = vmul.f32 %v4684_v41, %v7481_v59  ;;  %v2030_v15 = vpop.f32.mrb[1].mxu0 }
 0x30d   : > { %v2196_v24 = vmul.f32 %v7481_v59, %v2030_v15 }
 0x30e   : > { %v2236_v54 = vadd.f32 %v7486_v14, %v2197_v31 }
 0x30f   : > { %v2235_v6 = vadd.f32 %v7486_v14, %v2196_v24  ;;  %v4687_v0 = vpop.f32.mrb[2].mxu0 }
 0x310   : > { %v2268_v2 = vmax.f32 %v2236_v54, 0.0  ;;  %v2199_v63 = vmul.f32 %v4687_v0, %v7481_v59  ;;  %v2040_v45 = vpop.f32.mrb[3].mxu0 }
 0x311   : > { %v2267_v18 = vmax.f32 %v2235_v6, 0.0  ;;  %v2198_v9 = vmul.f32 %v7481_v59, %v2040_v45 }
 0x312   : > { %2356 = vst.msk [vmem:[#allocation3 + $0x21] sm:$0xff] %vm1627_vm3, %v2268_v2  ;;  %v2238_v7 = vadd.f32 %v7486_v14, %v2199_v63 }
 0x313   : > { %2355 = vst.msk [vmem:[#allocation3 + $0x19] sm:$0xff] %vm1627_vm3, %v2267_v18  ;;  %v2237_v32 = vadd.f32 %v7486_v14, %v2198_v9  ;;  %v4690_v29 = vpop.f32.mrb[4].mxu0 }
 0x314   : > { %v2270_v1 = vmax.f32 %v2238_v7, 0.0  ;;  %v2201_v60 = vmul.f32 %v4690_v29, %v7481_v59  ;;  %v2050_v23 = vpop.f32.mrb[5].mxu0 }
 0x315   : > { %v2269_v16 = vmax.f32 %v2237_v32, 0.0  ;;  %v2200_v42 = vmul.f32 %v7481_v59, %v2050_v23 }
 0x316   : > { %2358 = vst.msk [vmem:[#allocation3 + $0x39] sm:$0xff] %vm1627_vm3, %v2270_v1  ;;  %v2240_v4 = vadd.f32 %v7486_v14, %v2201_v60 }
 0x317   : > { %2357 = vst.msk [vmem:[#allocation3 + $0x31] sm:$0xff] %vm1627_vm3, %v2269_v16  ;;  %v2239_v22 = vadd.f32 %v7486_v14, %v2200_v42 }
 0x318   : > { %v2272_v53 = vmax.f32 %v2240_v4, 0.0 }
 0x319   : > { %v2271_v43 = vmax.f32 %v2239_v22, 0.0  ;;  %v7504_v35 = vld [vmem:[#allocation3 + $0x28] sm:$0x3] }
 0x31a   : > { %2360 = vst.msk [vmem:[#allocation3 + $0x51] sm:$0xff] %vm1627_vm3, %v2272_v53  ;;  %v7507_v21 = vld [vmem:[#allocation3 + $0x20] sm:$0xff]  ;;  %v2497_v25 = vrot.slane %v7504_v35, 1  ;;  %v7510_v40 = vld [vmem:[#allocation3 + $0x18] sm:$0xff] }
 0x31b   : > { %2359 = vst.msk [vmem:[#allocation3 + $0x49] sm:$0xff] %vm1627_vm3, %v2271_v43  ;;  %v4693_v39 = vpop.f32.mrb[6].mxu0  ;;  %v2495_v57 = vrot.slane %v7507_v21, 1  ;;  %v2494_v51 = vrot.slane %v7510_v40, 1 }
 0x31c   : > { %v2203_v50 = vmul.f32 %v4693_v39, %v7481_v59  ;;  %v2060_v5 = vpop.f32.mrb[7].mxu0 }
 0x31d   : > { %v2202_v37 = vmul.f32 %v7481_v59, %v2060_v5  ;;  %v7518_v44 = vsel %vm639_vm2, %v2495_v57, %v2497_v25  ;;  %v7521_v30 = vsel %vm639_vm2, %v2494_v51, %v2495_v57  ;;  %v7523_v36 = vld [vmem:[#allocation3 + $0x40] sm:$0x3] }
 0x31e   : > { %v2242_v26 = vadd.f32 %v7486_v14, %v2203_v50  ;;  %2681 = vrot.lane.b32.xlu1 %v7518_v44, %s4999_s17  ;;  %2679 = vrot.lane.b32.xlu0 %v7521_v30, %s4999_s17  ;;  %v7530_v55 = vld [vmem:[#allocation3 + $0x38] sm:$0xff]  ;;  %v2502_v19 = vrot.slane %v7523_v36, 1  ;;  %v7533_v28 = vld [vmem:[#allocation3 + $0x30] sm:$0xff] }
 0x31f   : > { %v2241_v61 = vadd.f32 %v7486_v14, %v2202_v37  ;;  %v2500_v20 = vrot.slane %v7530_v55, 1  ;;  %v2499_v34 = vrot.slane %v7533_v28, 1 }
 0x320   : > { %v2274_v46 = vmax.f32 %v2242_v26, 0.0 }
 0x321   : > { %v2273_v47 = vmax.f32 %v2241_v61, 0.0  ;;  %v7539_v10 = vsel %vm639_vm2, %v2500_v20, %v2502_v19  ;;  %v7542_v38 = vsel %vm639_vm2, %v2499_v34, %v2500_v20  ;;  %v7544_v3 = vld [vmem:[#allocation3 + $0x58] sm:$0x3] }
 0x322   : > { %2362 = vst.msk [vmem:[#allocation3 + $0x69] sm:$0xff] %vm1627_vm3, %v2274_v46  ;;  %2685 = vrot.lane.b32.xlu1 %v7539_v10, %s4999_s17  ;;  %2683 = vrot.lane.b32.xlu0 %v7542_v38, %s4999_s17  ;;  %v7551_v56 = vld [vmem:[#allocation3 + $0x50] sm:$0xff]  ;;  %v2507_v27 = vrot.slane %v7544_v3, 1  ;;  %v7554_v13 = vld [vmem:[#allocation3 + $0x48] sm:$0xff] }
 0x323   : > { %2361 = vst.msk [vmem:[#allocation3 + $0x61] sm:$0xff] %vm1627_vm3, %v2273_v47  ;;  %v4696_v58 = vpop.f32.mrb[8].mxu0  ;;  %v2505_v33 = vrot.slane %v7551_v56, 1  ;;  %v2504_v49 = vrot.slane %v7554_v13, 1 }
 0x324   : > { %v2205_v17 = vmul.f32 %v4696_v58, %v7481_v59  ;;  %v2070_v11 = vpop.f32.mrb[9].mxu0 }
 0x325   : > { %v2204_v12 = vmul.f32 %v7481_v59, %v2070_v11  ;;  %v7562_v52 = vsel %vm639_vm2, %v2505_v33, %v2507_v27  ;;  %v7565_v41 = vsel %vm639_vm2, %v2504_v49, %v2505_v33 }
 0x326   : > { %10003 = vst [vmem:[#allocation80_spill] sm:$0xff] %v7562_v52  ;;  %10004 = vst [vmem:[#allocation58_spill] sm:$0xff] %v7565_v41  ;;  %v2244_v31 = vadd.f32 %v7486_v14, %v2205_v17  ;;  %2689 = vrot.lane.b32.xlu1 %v7562_v52, %s4999_s17  ;;  %2687 = vrot.lane.b32.xlu0 %v7565_v41, %s4999_s17 }
 0x327   : > { %v2243_v15 = vadd.f32 %v7486_v14, %v2204_v12 }
 0x328   : > { %v2276_v24 = vmax.f32 %v2244_v31, 0.0 }
 0x329   : > { %v2275_v54 = vmax.f32 %v2243_v15, 0.0  ;;  %v7573_v6 = vld [vmem:[#allocation3 + $0x70] sm:$0x3] }
 0x32a   : > { %2364 = vst.msk [vmem:[#allocation3 + $0x81] sm:$0xff] %vm1627_vm3, %v2276_v24  ;;  %v7576_v0 = vld [vmem:[#allocation3 + $0x68] sm:$0xff]  ;;  %v2512_v2 = vrot.slane %v7573_v6, 1  ;;  %v7579_v63 = vld [vmem:[#allocation3 + $0x60] sm:$0xff] }
 0x32b   : > { %2363 = vst.msk [vmem:[#allocation3 + $0x79] sm:$0xff] %vm1627_vm3, %v2275_v54  ;;  %v4699_v45 = vpop.f32.mrb[10].mxu0  ;;  %v2510_v18 = vrot.slane %v7576_v0, 1  ;;  %v2509_v9 = vrot.slane %v7579_v63, 1 }
 0x32c   : > { %v2207_v7 = vmul.f32 %v4699_v45, %v7481_v59  ;;  %v2080_v32 = vpop.f32.mrb[11].mxu0 }
 0x32d   : > { %v2206_v29 = vmul.f32 %v7481_v59, %v2080_v32  ;;  %v7587_v1 = vsel %vm639_vm2, %v2510_v18, %v2512_v2  ;;  %v7590_v60 = vsel %vm639_vm2, %v2509_v9, %v2510_v18 }
 0x32e   : > { %10005 = vst [vmem:[#allocation60_spill] sm:$0xff] %v7587_v1  ;;  %10006 = vst [vmem:[#allocation79_spill] sm:$0xff] %v7590_v60  ;;  %v2246_v23 = vadd.f32 %v7486_v14, %v2207_v7  ;;  %2693 = vrot.lane.b32.xlu1 %v7587_v1, %s4999_s17  ;;  %2691 = vrot.lane.b32.xlu0 %v7590_v60, %s4999_s17 }
 0x32f   : > { %v2245_v16 = vadd.f32 %v7486_v14, %v2206_v29 }
 0x330   : > { %v2278_v42 = vmax.f32 %v2246_v23, 0.0 }
 0x331   : > { %v2277_v4 = vmax.f32 %v2245_v16, 0.0  ;;  %v7598_v22 = vld [vmem:[#allocation3 + $0x88] sm:$0x3] }
 0x332   : > { %2366 = vst.msk [vmem:[#allocation3 + $0x99] sm:$0xff] %vm1627_vm3, %v2278_v42  ;;  %v7601_v53 = vld [vmem:[#allocation3 + $0x80] sm:$0xff]  ;;  %v2517_v43 = vrot.slane %v7598_v22, 1  ;;  %v7604_v25 = vld [vmem:[#allocation3 + $0x78] sm:$0xff] }
 0x333   : > { %2365 = vst.msk [vmem:[#allocation3 + $0x91] sm:$0xff] %vm1627_vm3, %v2277_v4  ;;  %v4702_v39 = vpop.f32.mrb[12].mxu0  ;;  %v2515_v57 = vrot.slane %v7601_v53, 1  ;;  %v2514_v51 = vrot.slane %v7604_v25, 1 }
 0x334   : > { %v2209_v50 = vmul.f32 %v4702_v39, %v7481_v59  ;;  %v2090_v5 = vpop.f32.mrb[13].mxu0 }
 0x335   : > { %v2208_v37 = vmul.f32 %v7481_v59, %v2090_v5  ;;  %v7612_v26 = vsel %vm639_vm2, %v2515_v57, %v2517_v43  ;;  %v7615_v19 = vsel %vm639_vm2, %v2514_v51, %v2515_v57 }
 0x336   : > { %10007 = vst [vmem:[#allocation129_spill] sm:$0xff] %v7612_v26  ;;  %10008 = vst [vmem:[#allocation62_spill] sm:$0xff] %v7615_v19  ;;  %v2248_v61 = vadd.f32 %v7486_v14, %v2209_v50  ;;  %2697 = vrot.lane.b32.xlu1 %v7612_v26, %s4999_s17  ;;  %2695 = vrot.lane.b32.xlu0 %v7615_v19, %s4999_s17 }
 0x337   : > { %v2247_v20 = vadd.f32 %v7486_v14, %v2208_v37 }
 0x338   : > { %v2280_v34 = vmax.f32 %v2248_v61, 0.0 }
 0x339   : > { %v2279_v46 = vmax.f32 %v2247_v20, 0.0  ;;  %v7623_v47 = vld [vmem:[#allocation3 + $0xa0] sm:$0x3] }
 0x33a   : > { %2368 = vst.msk [vmem:[#allocation3 + $0xb1] sm:$0xff] %vm1627_vm3, %v2280_v34  ;;  %v7626_v27 = vld [vmem:[#allocation3 + $0x98] sm:$0xff]  ;;  %v2522_v58 = vrot.slane %v7623_v47, 1  ;;  %v7629_v33 = vld [vmem:[#allocation3 + $0x90] sm:$0xff] }
 0x33b   : > { %2367 = vst.msk [vmem:[#allocation3 + $0xa9] sm:$0xff] %vm1627_vm3, %v2279_v46  ;;  %v4705_v49 = vpop.f32.mrb[14].mxu0  ;;  %v2520_v17 = vrot.slane %v7626_v27, 1  ;;  %v2519_v11 = vrot.slane %v7629_v33, 1 }
 0x33c   : > { %v2211_v12 = vmul.f32 %v4705_v49, %v7481_v59  ;;  %v2100_v31 = vpop.f32.mrb[15].mxu0 }
 0x33d   : > { %v2210_v15 = vmul.f32 %v7481_v59, %v2100_v31  ;;  %v7637_v24 = vsel %vm639_vm2, %v2520_v17, %v2522_v58  ;;  %v7640_v54 = vsel %vm639_vm2, %v2519_v11, %v2520_v17 }
 0x33e   : > { %10009 = vst [vmem:[#allocation73_spill] sm:$0xff] %v7637_v24  ;;  %10010 = vst [vmem:[#allocation61_spill] sm:$0xff] %v7640_v54  ;;  %v2250_v2 = vadd.f32 %v7486_v14, %v2211_v12  ;;  %2701 = vrot.lane.b32.xlu1 %v7637_v24, %s4999_s17  ;;  %2699 = vrot.lane.b32.xlu0 %v7640_v54, %s4999_s17 }
 0x33f   : > { %v2249_v45 = vadd.f32 %v7486_v14, %v2210_v15 }
 0x340   : > { %v2282_v18 = vmax.f32 %v2250_v2, 0.0 }
 0x341   : > { %v2281_v9 = vmax.f32 %v2249_v45, 0.0  ;;  %v7648_v7 = vld [vmem:[#allocation3 + $0xb8] sm:$0x3] }
 0x342   : > { %2370 = vst.msk [vmem:[#allocation3 + $0xc9] sm:$0xff] %vm1627_vm3, %v2282_v18  ;;  %v7651_v32 = vld [vmem:[#allocation3 + $0xb0] sm:$0xff]  ;;  %v2527_v29 = vrot.slane %v7648_v7, 1  ;;  %v7654_v23 = vld [vmem:[#allocation3 + $0xa8] sm:$0xff] }
 0x343   : > { %2369 = vst.msk [vmem:[#allocation3 + $0xc1] sm:$0xff] %vm1627_vm3, %v2281_v9  ;;  %v4708_v16 = vpop.f32.mrb[16].mxu0  ;;  %v2525_v42 = vrot.slane %v7651_v32, 1  ;;  %v2524_v4 = vrot.slane %v7654_v23, 1 }
 0x344   : > { %v2213_v43 = vmul.f32 %v4708_v16, %v7481_v59  ;;  %v2110_v39 = vpop.f32.mrb[17].mxu0 }
 0x345   : > { %v2212_v57 = vmul.f32 %v7481_v59, %v2110_v39  ;;  %v7662_v51 = vsel %vm639_vm2, %v2525_v42, %v2527_v29  ;;  %v7665_v50 = vsel %vm639_vm2, %v2524_v4, %v2525_v42 }
 0x346   : > { %10011 = vst [vmem:[#allocation109_spill] sm:$0xff] %v7662_v51  ;;  %10012 = vst [vmem:[#allocation125_spill] sm:$0xff] %v7665_v50  ;;  %v2252_v5 = vadd.f32 %v7486_v14, %v2213_v43  ;;  %2705 = vrot.lane.b32.xlu1 %v7662_v51, %s4999_s17  ;;  %2703 = vrot.lane.b32.xlu0 %v7665_v50, %s4999_s17 }
 0x347   : > { %v2251_v37 = vadd.f32 %v7486_v14, %v2212_v57 }
 0x348   : > { %v2284_v61 = vmax.f32 %v2252_v5, 0.0 }
 0x349   : > { %v2283_v20 = vmax.f32 %v2251_v37, 0.0  ;;  %v7673_v34 = vld [vmem:[#allocation3 + $0xd0] sm:$0x3] }
 0x34a   : > { %2372 = vst.msk [vmem:[#allocation3 + $0xe1] sm:$0xff] %vm1627_vm3, %v2284_v61  ;;  %v7676_v46 = vld [vmem:[#allocation3 + $0xc8] sm:$0xff]  ;;  %v2532_v58 = vrot.slane %v7673_v34, 1  ;;  %v7679_v49 = vld [vmem:[#allocation3 + $0xc0] sm:$0xff] }
 0x34b   : > { %2371 = vst.msk [vmem:[#allocation3 + $0xd9] sm:$0xff] %vm1627_vm3, %v2283_v20  ;;  %v4711_v17 = vpop.f32.mrb[18].mxu0  ;;  %v2530_v11 = vrot.slane %v7676_v46, 1  ;;  %v2529_v12 = vrot.slane %v7679_v49, 1 }
 0x34c   : > { %v2215_v31 = vmul.f32 %v4711_v17, %v7481_v59  ;;  %v2120_v15 = vpop.f32.mrb[19].mxu0 }
 0x34d   : > { %v2214_v2 = vmul.f32 %v7481_v59, %v2120_v15  ;;  %v7687_v45 = vsel %vm639_vm2, %v2530_v11, %v2532_v58  ;;  %v7690_v18 = vsel %vm639_vm2, %v2529_v12, %v2530_v11 }
 0x34e   : > { %10013 = vst [vmem:[#allocation75_spill] sm:$0xff] %v7687_v45  ;;  %10014 = vst [vmem:[#allocation76_spill] sm:$0xff] %v7690_v18  ;;  %v2254_v9 = vadd.f32 %v7486_v14, %v2215_v31  ;;  %2709 = vrot.lane.b32.xlu1 %v7687_v45, %s4999_s17  ;;  %2707 = vrot.lane.b32.xlu0 %v7690_v18, %s4999_s17 }
 0x34f   : > { %v2253_v29 = vadd.f32 %v7486_v14, %v2214_v2 }
 0x350   : > { %v2286_v16 = vmax.f32 %v2254_v9, 0.0 }
 0x351   : > { %v2285_v42 = vmax.f32 %v2253_v29, 0.0  ;;  %v7698_v4 = vld [vmem:[#allocation3 + $0xe8] sm:$0x3] }
 0x352   : > { %2374 = vst.msk [vmem:[#allocation3 + $0xf9] sm:$0xff] %vm1627_vm3, %v2286_v16  ;;  %v7701_v43 = vld [vmem:[#allocation3 + $0xe0] sm:$0xff]  ;;  %v2537_v39 = vrot.slane %v7698_v4, 1  ;;  %v7704_v57 = vld [vmem:[#allocation3 + $0xd8] sm:$0xff] }
 0x353   : > { %2373 = vst.msk [vmem:[#allocation3 + $0xf1] sm:$0xff] %vm1627_vm3, %v2285_v42  ;;  %v4714_v5 = vpop.f32.mrb[20].mxu0  ;;  %v2535_v37 = vrot.slane %v7701_v43, 1  ;;  %v2534_v61 = vrot.slane %v7704_v57, 1 }
 0x354   : > { %v2217_v20 = vmul.f32 %v4714_v5, %v7481_v59  ;;  %v2130_v58 = vpop.f32.mrb[21].mxu0 }
 0x355   : > { %v2216_v17 = vmul.f32 %v7481_v59, %v2130_v58  ;;  %v7712_v11 = vsel %vm639_vm2, %v2535_v37, %v2537_v39  ;;  %v7715_v12 = vsel %vm639_vm2, %v2534_v61, %v2535_v37 }
 0x356   : > { %10015 = vst [vmem:[#allocation82_spill] sm:$0xff] %v7712_v11  ;;  %10016 = vst [vmem:[#allocation114_spill] sm:$0xff] %v7715_v12  ;;  %v2256_v31 = vadd.f32 %v7486_v14, %v2217_v20  ;;  %2713 = vrot.lane.b32.xlu1 %v7712_v11, %s4999_s17  ;;  %2711 = vrot.lane.b32.xlu0 %v7715_v12, %s4999_s17 }
 0x357   : > { %v2255_v15 = vadd.f32 %v7486_v14, %v2216_v17 }
 0x358   : > { %v2288_v2 = vmax.f32 %v2256_v31, 0.0 }
 0x359   : > { %v2287_v9 = vmax.f32 %v2255_v15, 0.0  ;;  %v7723_v29 = vld [vmem:[#allocation3 + $0x100] sm:$0x3] }
 0x35a   : > { %2376 = vst.msk [vmem:[#allocation3 + $0x111] sm:$0xff] %vm1627_vm3, %v2288_v2  ;;  %v7726_v16 = vld [vmem:[#allocation3 + $0xf8] sm:$0xff]  ;;  %v2542_v42 = vrot.slane %v7723_v29, 1  ;;  %v7729_v39 = vld [vmem:[#allocation3 + $0xf0] sm:$0xff] }
 0x35b   : > { %2375 = vst.msk [vmem:[#allocation3 + $0x109] sm:$0xff] %vm1627_vm3, %v2287_v9  ;;  %v4717_v5 = vpop.f32.mrb[22].mxu0  ;;  %v2540_v37 = vrot.slane %v7726_v16, 1  ;;  %v2539_v61 = vrot.slane %v7729_v39, 1 }
 0x35c   : > { %v2219_v20 = vmul.f32 %v4717_v5, %v7481_v59  ;;  %v2140_v58 = vpop.f32.mrb[23].mxu0 }
 0x35d   : > { %v2218_v17 = vmul.f32 %v7481_v59, %v2140_v58  ;;  %v7737_v31 = vsel %vm639_vm2, %v2540_v37, %v2542_v42  ;;  %v7740_v15 = vsel %vm639_vm2, %v2539_v61, %v2540_v37 }
 0x35e   : > { %10017 = vst [vmem:[#allocation111_spill] sm:$0xff] %v7737_v31  ;;  %10018 = vst [vmem:[#allocation131_spill] sm:$0xff] %v7740_v15  ;;  %v2258_v2 = vadd.f32 %v7486_v14, %v2219_v20  ;;  %2717 = vrot.lane.b32.xlu1 %v7737_v31, %s4999_s17  ;;  %2715 = vrot.lane.b32.xlu0 %v7740_v15, %s4999_s17 }
 0x35f   : > { %v2257_v9 = vadd.f32 %v7486_v14, %v2218_v17 }
 0x360   : > { %v2290_v5 = vmax.f32 %v2258_v2, 0.0 }
 0x361   : > { %v2289_v11 = vmax.f32 %v2257_v9, 0.0  ;;  %v7748_v12 = vld [vmem:[#allocation3 + $0x118] sm:$0x3] }
 0x362   : > { %2378 = vst.msk [vmem:[#allocation3 + $0x129] sm:$0xff] %vm1627_vm3, %v2290_v5  ;;  %v7751_v42 = vld [vmem:[#allocation3 + $0x110] sm:$0xff]  ;;  %v2547_v37 = vrot.slane %v7748_v12, 1  ;;  %v7754_v61 = vld [vmem:[#allocation3 + $0x108] sm:$0xff] }
 0x363   : > { %2377 = vst.msk [vmem:[#allocation3 + $0x121] sm:$0xff] %vm1627_vm3, %v2289_v11  ;;  %v4720_v20 = vpop.f32.mrb[24].mxu0  ;;  %v2545_v58 = vrot.slane %v7751_v42, 1  ;;  %v2544_v31 = vrot.slane %v7754_v61, 1 }
 0x364   : > { %v2221_v17 = vmul.f32 %v4720_v20, %v7481_v59  ;;  %v2150_v2 = vpop.f32.mrb[25].mxu0 }
 0x365   : > { %v2220_v9 = vmul.f32 %v7481_v59, %v2150_v2  ;;  %v7762_v5 = vsel %vm639_vm2, %v2545_v58, %v2547_v37  ;;  %v7765_v15 = vsel %vm639_vm2, %v2544_v31, %v2545_v58 }
 0x366   : > { %10019 = vst [vmem:[#allocation127_spill] sm:$0xff] %v7762_v5  ;;  %10020 = vst [vmem:[#allocation154_spill] sm:$0xff] %v7765_v15  ;;  %v2260_v45 = vadd.f32 %v7486_v14, %v2221_v17  ;;  %2721 = vrot.lane.b32.xlu1 %v7762_v5, %s4999_s17  ;;  %2719 = vrot.lane.b32.xlu0 %v7765_v15, %s4999_s17 }
 0x367   : > { %v2259_v11 = vadd.f32 %v7486_v14, %v2220_v9 }
 0x368   : > { %v2292_v20 = vmax.f32 %v2260_v45, 0.0 }
 0x369   : > { %v2291_v18 = vmax.f32 %v2259_v11, 0.0  ;;  %v7773_v51 = vld [vmem:[#allocation3 + $0x130] sm:$0x3] }
 0x36a   : > { %2380 = vst.msk [vmem:[#allocation3 + $0x141] sm:$0xff] %vm1627_vm3, %v2292_v20  ;;  %v7776_v37 = vld [vmem:[#allocation3 + $0x128] sm:$0xff]  ;;  %v2552_v31 = vrot.slane %v7773_v51, 1  ;;  %v7779_v58 = vld [vmem:[#allocation3 + $0x120] sm:$0xff] }
 0x36b   : > { %2379 = vst.msk [vmem:[#allocation3 + $0x139] sm:$0xff] %vm1627_vm3, %v2291_v18  ;;  %v4723_v17 = vpop.f32.mrb[26].mxu0  ;;  %v2550_v2 = vrot.slane %v7776_v37, 1  ;;  %v2549_v5 = vrot.slane %v7779_v58, 1 }
 0x36c   : > { %v2223_v45 = vmul.f32 %v4723_v17, %v7481_v59  ;;  %v2160_v9 = vpop.f32.mrb[27].mxu0 }
 0x36d   : > { %v2222_v11 = vmul.f32 %v7481_v59, %v2160_v9  ;;  %v7787_v20 = vsel %vm639_vm2, %v2550_v2, %v2552_v31  ;;  %v7790_v15 = vsel %vm639_vm2, %v2549_v5, %v2550_v2 }
 0x36e   : > { %10021 = vst [vmem:[#allocation81_spill] sm:$0xff] %v7787_v20  ;;  %10022 = vst [vmem:[#allocation157_spill] sm:$0xff] %v7790_v15  ;;  %v2262_v50 = vadd.f32 %v7486_v14, %v2223_v45  ;;  %2725 = vrot.lane.b32.xlu1 %v7787_v20, %s4999_s17  ;;  %2723 = vrot.lane.b32.xlu0 %v7790_v15, %s4999_s17 }
 0x36f   : > { %v2261_v18 = vadd.f32 %v7486_v14, %v2222_v11 }
 0x370   : > { %v2294_v17 = vmax.f32 %v2262_v50, 0.0 }
 0x371   : > { %v2293_v24 = vmax.f32 %v2261_v18, 0.0  ;;  %v7798_v54 = vld [vmem:[#allocation3 + $0x148] sm:$0x3] }
 0x372   : > { %2382 = vst.msk [vmem:[#allocation3 + $0x159] sm:$0xff] %vm1627_vm3, %v2294_v17  ;;  %v7801_v31 = vld [vmem:[#allocation3 + $0x140] sm:$0xff]  ;;  %v2557_v5 = vrot.slane %v7798_v54, 1  ;;  %v7804_v2 = vld [vmem:[#allocation3 + $0x138] sm:$0xff] }
 0x373   : > { %2381 = vst.msk [vmem:[#allocation3 + $0x151] sm:$0xff] %vm1627_vm3, %v2293_v24  ;;  %v4726_v45 = vpop.f32.mrb[28].mxu0  ;;  %v2555_v9 = vrot.slane %v7801_v31, 1  ;;  %v2554_v20 = vrot.slane %v7804_v2, 1 }
 0x374   : > { %v2225_v50 = vmul.f32 %v4726_v45, %v7481_v59  ;;  %v2170_v11 = vpop.f32.mrb[29].mxu0 }
 0x375   : > { %v2224_v18 = vmul.f32 %v7481_v59, %v2170_v11  ;;  %v7812_v17 = vsel %vm639_vm2, %v2555_v9, %v2557_v5  ;;  %v7815_v15 = vsel %vm639_vm2, %v2554_v20, %v2555_v9 }
 0x376   : > { %10023 = vst [vmem:[#allocation84_spill] sm:$0xff] %v7812_v17  ;;  %10024 = vst [vmem:[#allocation78_spill] sm:$0xff] %v7815_v15  ;;  %v2264_v26 = vadd.f32 %v7486_v14, %v2225_v50  ;;  %2729 = vrot.lane.b32.xlu1 %v7812_v17, %s4999_s17  ;;  %2727 = vrot.lane.b32.xlu0 %v7815_v15, %s4999_s17 }
 0x377   : > { %v2263_v24 = vadd.f32 %v7486_v14, %v2224_v18 }
 0x378   : > { %v2296_v45 = vmax.f32 %v2264_v26, 0.0 }
 0x379   : > { %v2295_v19 = vmax.f32 %v2263_v24, 0.0  ;;  %v7823_v1 = vld [vmem:[#allocation3 + $0x160] sm:$0x3] }
 0x37a   : > { %2384 = vst.msk [vmem:[#allocation3 + $0x171] sm:$0xff] %vm1627_vm3, %v2296_v45  ;;  %v7826_v5 = vld [vmem:[#allocation3 + $0x158] sm:$0xff]  ;;  %v2562_v20 = vrot.slane %v7823_v1, 1  ;;  %v7829_v9 = vld [vmem:[#allocation3 + $0x150] sm:$0xff] }
 0x37b   : > { %2383 = vst.msk [vmem:[#allocation3 + $0x169] sm:$0xff] %vm1627_vm3, %v2295_v19  ;;  %v4729_v50 = vpop.f32.mrb[30].mxu0  ;;  %v2560_v11 = vrot.slane %v7826_v5, 1  ;;  %v2559_v17 = vrot.slane %v7829_v9, 1 }
 0x37c   : > { %v2227_v26 = vmul.f32 %v4729_v50, %v7481_v59  ;;  %v2180_v18 = vpop.f32.mrb[31].mxu0 }
 0x37d   : > { %v2226_v24 = vmul.f32 %v7481_v59, %v2180_v18  ;;  %v7837_v45 = vsel %vm639_vm2, %v2560_v11, %v2562_v20  ;;  %v7840_v15 = vsel %vm639_vm2, %v2559_v17, %v2560_v11  ;;  %v2570_v11 = vrot.slane %v7415_v8, 2 }
 0x37e   : > { %10025 = vst [vmem:[#allocation83_spill] sm:$0xff] %v7837_v45  ;;  %10026 = vst [vmem:[#allocation160_spill] sm:$0xff] %v7840_v15  ;;  %v2266_v60 = vadd.f32 %v7486_v14, %v2227_v26  ;;  %2733 = vrot.lane.b32.xlu1 %v7837_v45, %s4999_s17  ;;  %2731 = vrot.lane.b32.xlu0 %v7840_v15, %s4999_s17  ;;  %v2569_v18 = vrot.slane %v7413_v48, 2  ;;  %v2577_v48 = vrot.slane %v7504_v35, 2 }
 0x37f   : > { %v2265_v19 = vadd.f32 %v7486_v14, %v2226_v24 }
 0x380   : > { %v2298_v50 = vmax.f32 %v2266_v60, 0.0  ;;  %v2572_v60 = vrot.slane %v7417_v62, 2  ;;  %v2575_v62 = vrot.slane %v7507_v21, 2 }
 0x381   : > { %v2297_v52 = vmax.f32 %v2265_v19, 0.0  ;;  %v7848_v41 = vld [vmem:[#allocation3 + $0x178] sm:$0x3] }
 0x382   : > { %2386 = vst.msk [vmem:[#allocation3 + $0x189] sm:$0xff] %vm1627_vm3, %v2298_v50  ;;  %v7851_v59 = vld [vmem:[#allocation3 + $0x170] sm:$0xff]  ;;  %v2567_v17 = vrot.slane %v7848_v41, 1  ;;  %v7854_v20 = vld [vmem:[#allocation3 + $0x168] sm:$0xff]  ;;  %v2573_v8 = vsel %vm720_vm4, %v2570_v11, %v2572_v60  ;;  %v2574_v50 = vrot.slane %v7510_v40, 2 }
 0x383   : > { %2385 = vst.msk [vmem:[#allocation3 + $0x181] sm:$0xff] %vm1627_vm3, %v2297_v52  ;;  %v2565_v26 = vrot.slane %v7851_v59, 1  ;;  %v2564_v14 = vrot.slane %v7854_v20, 1  ;;  %v2571_v52 = vsel %vm720_vm4, %v2569_v18, %v2570_v11  ;;  %v2579_v11 = vrot.slane %v7533_v28, 2 }
 0x384   : > { %v7885_v60 = vsel %vm720_vm4, %v2574_v50, %v2575_v62 }
 0x385   : > { %v7863_v24 = vsel %vm639_vm2, %v2565_v26, %v2567_v17  ;;  %v7866_v19 = vsel %vm639_vm2, %v2564_v14, %v2565_v26  ;;  %v2580_v17 = vrot.slane %v7530_v55, 2  ;;  %v2582_v26 = vrot.slane %v7523_v36, 2 }
 0x386   : > { %10027 = vst [vmem:[#allocation116_spill] sm:$0xff] %v7863_v24  ;;  %10028 = vst [vmem:[#allocation113_spill] sm:$0xff] %v7866_v19  ;;  %2737 = vrot.lane.b32.xlu1 %v7863_v24, %s4999_s17  ;;  %2735 = vrot.lane.b32.xlu0 %v7866_v19, %s4999_s17  ;;  %v7882_v14 = vsel %vm720_vm4, %v2575_v62, %v2577_v48  ;;  %v2585_v36 = vrot.slane %v7551_v56, 2  ;;  %v2590_v62 = vrot.slane %v7576_v0, 2  ;;  %v2592_v48 = vrot.slane %v7573_v6, 2 }
 0x387   : > { %v7893_v35 = vsel %vm720_vm4, %v2580_v17, %v2582_v26  ;;  %v7896_v18 = vsel %vm720_vm4, %v2579_v11, %v2580_v17  ;;  %v2595_v6 = vrot.slane %v7601_v53, 2 }
 0x388   : > { %v7919_v26 = vsel %vm720_vm4, %v2590_v62, %v2592_v48  ;;  %v2602_v48 = vrot.slane %v7623_v47, 2  ;;  %v2605_v47 = vrot.slane %v7651_v32, 2 }
 0x38a   : > { %2773 = vrot.lane.b32.xlu1 %v2573_v8, %s5001_s19  ;;  %2771 = vrot.lane.b32.xlu0 %v2571_v52, %s5001_s19  ;;  %v2587_v8 = vrot.slane %v7544_v3, 2  ;;  %v2584_v52 = vrot.slane %v7554_v13, 2  ;;  %v2589_v3 = vrot.slane %v7579_v63, 2 }
 0x38c   : > { %v7908_v50 = vsel %vm720_vm4, %v2585_v36, %v2587_v8  ;;  %v7911_v17 = vsel %vm720_vm4, %v2584_v52, %v2585_v36  ;;  %v7922_v11 = vsel %vm720_vm4, %v2589_v3, %v2590_v62  ;;  %v2597_v8 = vrot.slane %v7598_v22, 2 }
 0x38d   : > { %v2594_v36 = vrot.slane %v7604_v25, 2  ;;  %v2600_v52 = vrot.slane %v7626_v27, 2  ;;  %v2599_v22 = vrot.slane %v7629_v33, 2 }
 0x38e   : > { %2777 = vrot.lane.b32.xlu1 %v7882_v14, %s5001_s19  ;;  %2775 = vrot.lane.b32.xlu0 %v7885_v60, %s5001_s19  ;;  %v7934_v24 = vsel %vm720_vm4, %v2595_v6, %v2597_v8  ;;  %v2607_v8 = vrot.slane %v7648_v7, 2  ;;  %v2609_v7 = vrot.slane %v7679_v49, 2 }
 0x38f   : > { %v7937_v62 = vsel %vm720_vm4, %v2594_v36, %v2595_v6  ;;  %v7945_v3 = vsel %vm720_vm4, %v2600_v52, %v2602_v48  ;;  %v7948_v19 = vsel %vm720_vm4, %v2599_v22, %v2600_v52  ;;  %v2604_v6 = vrot.slane %v7654_v23, 2 }
 0x390   : > { %v2610_v36 = vrot.slane %v7676_v46, 2  ;;  %v2612_v48 = vrot.slane %v7673_v34, 2  ;;  %v7960_v45 = vsel %vm720_vm4, %v2605_v47, %v2607_v8  ;;  %v2615_v34 = vrot.slane %v7701_v43, 2 }
 0x391   : > { %10029 = vst [vmem:[#allocation133_spill] sm:$0xff] %v7960_v45  ;;  %v7963_v52 = vsel %vm720_vm4, %v2604_v6, %v2605_v47  ;;  %v2617_v8 = vrot.slane %v7698_v4, 2  ;;  %v2614_v47 = vrot.slane %v7704_v57, 2  ;;  %v2620_v6 = vrot.slane %v7726_v16, 2 }
 0x392   : > { %2781 = vrot.lane.b32.xlu1 %v7893_v35, %s5001_s19  ;;  %2779 = vrot.lane.b32.xlu0 %v7896_v18, %s5001_s19  ;;  %v7971_v22 = vsel %vm720_vm4, %v2610_v36, %v2612_v48  ;;  %v7974_v15 = vsel %vm720_vm4, %v2609_v7, %v2610_v36  ;;  %v2622_v48 = vrot.slane %v7723_v29, 2  ;;  %v2619_v4 = vrot.slane %v7729_v39, 2 }
 0x393   : > { %10030 = vst [vmem:[#allocation130_spill] sm:$0xff] %v7971_v22  ;;  %v7989_v36 = vsel %vm720_vm4, %v2614_v47, %v2615_v34  ;;  %v2625_v29 = vrot.slane %v7751_v42, 2  ;;  %v2630_v47 = vrot.slane %v7776_v37, 2 }
 0x394   : > { %10032 = vst [vmem:[#allocation86_spill] sm:$0xff] %v7989_v36  ;;  %v7997_v7 = vsel %vm720_vm4, %v2620_v6, %v2622_v48  ;;  %v2632_v48 = vrot.slane %v7773_v51, 2 }
 0x395   : > { %10033 = vst [vmem:[#allocation164_spill] sm:$0xff] %v7997_v7 }
 0x396   : > { %2785 = vrot.lane.b32.xlu1 %v7908_v50, %s5001_s19  ;;  %2783 = vrot.lane.b32.xlu0 %v7911_v17, %s5001_s19  ;;  %v8027_v51 = vsel %vm720_vm4, %v2630_v47, %v2632_v48  ;;  %v2640_v48 = vrot.slane %v7826_v5, 2 }
 0x39a   : > { %2789 = vrot.lane.b32.xlu1 %v7919_v26, %s5001_s19  ;;  %2787 = vrot.lane.b32.xlu0 %v7922_v11, %s5001_s19 }
 0x39e   : > { %2793 = vrot.lane.b32.xlu1 %v7934_v24, %s5001_s19  ;;  %2791 = vrot.lane.b32.xlu0 %v7937_v62, %s5001_s19 }
 0x3a2   : > { %2797 = vrot.lane.b32.xlu1 %v7945_v3, %s5001_s19  ;;  %2795 = vrot.lane.b32.xlu0 %v7948_v19, %s5001_s19 }
 0x3a6   : > { %2801 = vrot.lane.b32.xlu1 %v7960_v45, %s5001_s19  ;;  %2799 = vrot.lane.b32.xlu0 %v7963_v52, %s5001_s19  ;;  %v7986_v45 = vsel %vm720_vm4, %v2615_v34, %v2617_v8  ;;  %v2627_v8 = vrot.slane %v7748_v12, 2  ;;  %v2624_v34 = vrot.slane %v7754_v61, 2  ;;  %v2629_v12 = vrot.slane %v7779_v58, 2 }
 0x3a7   : > { %10031 = vst [vmem:[#allocation156_spill] sm:$0xff] %v7986_v45 }
 0x3aa   : > { %2805 = vrot.lane.b32.xlu1 %v7971_v22, %s5001_s19  ;;  %2803 = vrot.lane.b32.xlu0 %v7974_v15, %s5001_s19  ;;  %v8000_v22 = vsel %vm720_vm4, %v2619_v4, %v2620_v6  ;;  %v8015_v6 = vsel %vm720_vm4, %v2624_v34, %v2625_v29  ;;  %v8018_v4 = vpop.permute.xlu0 %2675  ;;  %v2637_v34 = vrot.slane %v7798_v54, 2 }
 0x3ab   : > { %10035 = vst [vmem:[#allocation115_spill] sm:$0xff] %v8015_v6 }
 0x3ae   : > { %2809 = vrot.lane.b32.xlu1 %v7986_v45, %s5001_s19  ;;  %2807 = vrot.lane.b32.xlu0 %v7989_v36, %s5001_s19  ;;  %v8012_v45 = vsel %vm720_vm4, %v2625_v29, %v2627_v8  ;;  %v8020_v36 = vpop.permute.xlu1 %2677  ;;  %v8030_v8 = vsel %vm720_vm4, %v2629_v12, %v2630_v47  ;;  %v2635_v29 = vrot.slane %v7801_v31, 2  ;;  %v2642_v47 = vrot.slane %v7823_v1, 2 }
 0x3af   : > { %10034 = vst [vmem:[#allocation153_spill] sm:$0xff] %v8012_v45  ;;  %v2645_v1 = vrot.slane %v7851_v59, 2 }
 0x3b0   : > { %v8046_v31 = vsel %vm720_vm4, %v2635_v29, %v2637_v34  ;;  %v8057_v12 = vsel %vm720_vm4, %v2640_v48, %v2642_v47  ;;  %v2647_v34 = vrot.slane %v7848_v41, 2 }
 0x3b1   : > { %10036 = vst [vmem:[#allocation118_spill] sm:$0xff] %v8046_v31  ;;  %10038 = vst [vmem:[#allocation135_spill] sm:$0xff] %v8057_v12 }
 0x3b2   : > { %2813 = vrot.lane.b32.xlu1 %v7997_v7, %s5001_s19  ;;  %2811 = vrot.lane.b32.xlu0 %v8000_v22, %s5001_s19  ;;  %v2634_v7 = vrot.slane %v7804_v2, 2  ;;  %v2639_v2 = vrot.slane %v7829_v9, 2  ;;  %v8074_v47 = vsel %vm720_vm4, %v2645_v1, %v2647_v34 }
 0x3b3   : > { %10040 = vst [vmem:[#allocation159_spill] sm:$0xff] %v8074_v47 }
 0x3b4   : > { %v8049_v54 = vsel %vm720_vm4, %v2634_v7, %v2635_v29  ;;  %v8060_v5 = vsel %vm720_vm4, %v2639_v2, %v2640_v48  ;;  %v2644_v7 = vrot.slane %v7854_v20, 2 }
 0x3b5   : > { %10037 = vst [vmem:[#allocation132_spill] sm:$0xff] %v8049_v54  ;;  %10039 = vst [vmem:[#allocation155_spill] sm:$0xff] %v8060_v5 }
 0x3b6   : > { %2817 = vrot.lane.b32.xlu1 %v8012_v45, %s5001_s19  ;;  %2815 = vrot.lane.b32.xlu0 %v8015_v6, %s5001_s19  ;;  %v8039_v45 = vpop.permute.xlu0 %2679  ;;  %v8041_v6 = vpop.permute.xlu1 %2681  ;;  %v8077_v48 = vsel %vm720_vm4, %v2644_v7, %v2645_v1 }
 0x3b7   : > { %10041 = vst [vmem:[#allocation85_spill] sm:$0xff] %v8077_v48 }
 0x3ba   : > { %2821 = vrot.lane.b32.xlu1 %v8027_v51, %s5001_s19  ;;  %2819 = vrot.lane.b32.xlu0 %v8030_v8, %s5001_s19  ;;  %v8065_v29 = vpop.permute.xlu0 %2683  ;;  %v8067_v9 = vpop.permute.xlu1 %2685 }
 0x3be   : > { %2825 = vrot.lane.b32.xlu1 %v8046_v31, %s5001_s19  ;;  %2823 = vrot.lane.b32.xlu0 %v8049_v54, %s5001_s19  ;;  %v8083_v41 = vpop.permute.xlu0 %2687  ;;  %v8085_v59 = vpop.permute.xlu1 %2689  ;;  %v10061_v54 = vld [vmem:[#allocation5_spill] sm:$0xff] }
 0x3c2   : > { %2829 = vrot.lane.b32.xlu1 %v8057_v12, %s5001_s19  ;;  %2827 = vrot.lane.b32.xlu0 %v8060_v5, %s5001_s19  ;;  %v8091_v20 = vpop.permute.xlu0 %2691  ;;  %v8093_v2 = vpop.permute.xlu1 %2693 }
 0x3c6   : > { %2833 = vrot.lane.b32.xlu1 %v8074_v47, %s5001_s19  ;;  %2831 = vrot.lane.b32.xlu0 %v8077_v48, %s5001_s19  ;;  %v8099_v1 = vpop.permute.xlu0 %2695  ;;  %v8101_v34 = vpop.permute.xlu1 %2697  ;;  %v3712_v48 = vld [vmem:[%s9292_s7] sm:$0xf] }
 0x3c7   : > { %10042 = vst [vmem:[#allocation163_spill] sm:$0xff] %v8101_v34  ;;  %4870 = vmatprep.subr.msk.mxu1 %vm1960_vm5, %v3712_v48  ;;  %4730 = vmatprep.subr.msk.mxu0 %vm1960_vm5, %v3712_v48  ;;  %v10062_v34 = vmax.f32 %v10061_v54, 0.0  ;;  %v10069_v54 = vld [vmem:[#allocation23_spill] sm:$0xff] }
 0x3c8   : > { %4871 = vmatpush3.msk.msra.mxu1 %vm1960_vm5, %v3712_v48  ;;  %4731 = vmatpush3.msk.msra.mxu0 %vm1960_vm5, %v3712_v48  ;;  %vm4037_vm5 = vcmask 588800  }
 0x3ca   : > { %2869 = vrot.lane.b32.xlu1 %v7507_v21, %s5003_s21  ;;  %2867 = vrot.lane.b32.xlu0 %v7510_v40, %s5003_s21  ;;  %v8107_v21 = vpop.permute.xlu0 %2699  ;;  %v8109_v40 = vpop.permute.xlu1 %2701 }
 0x3cb   : > { %10043 = vst [vmem:[#allocation88_spill] sm:$0xff] %v8107_v21  ;;  %10044 = vst [vmem:[#allocation168_spill] sm:$0xff] %v8109_v40  ;;  %v10051_v40 = vld [vmem:[#allocation7_spill] sm:$0xff]  ;;  %v10055_v21 = vld [vmem:[#allocation4_spill] sm:$0xff] }
 0x3cc   : > { %v10052_v31 = vmax.f32 %v10051_v40, 0.0  ;;  %v10056_v48 = vmax.f32 %v10055_v21, 0.0  ;;  %v10059_v40 = vld [vmem:[#allocation20_spill] sm:$0xff] }
 0x3cd   : > { %v10065_v21 = vld [vmem:[#allocation8_spill] sm:$0xff] }
 0x3ce   : > { %2873 = vrot.lane.b32.xlu1 %v7530_v55, %s5003_s21  ;;  %2871 = vrot.lane.b32.xlu0 %v7533_v28, %s5003_s21  ;;  %v8115_v7 = vpop.permute.xlu0 %2703  ;;  %v8117_v47 = vpop.permute.xlu1 %2705 }
 0x3cf   : > { %10045 = vst [vmem:[#allocation117_spill] sm:$0xff] %v8115_v7  ;;  %10046 = vst [vmem:[#allocation120_spill] sm:$0xff] %v8117_v47  ;;  %v10049_v47 = vld [vmem:[#allocation18_spill] sm:$0xff]  ;;  %4733 = vmatmul.mubr.msk.f32.vlgmr.msra.gmra.mrb[32].mxu0 %vm448_vm0, %v10052_v31  ;;  %v10060_v31 = vmax.f32 %v10059_v40, 0.0 }
 0x3d0   : > { %v10050_v7 = vmax.f32 %v10049_v47, 0.0  ;;  %4735 = vmatprep.mubr.msk.f32.mxu0 %vm448_vm0, %v10056_v48  ;;  %v10066_v48 = vmax.f32 %v10065_v21, 0.0  ;;  %v10075_v21 = vld [vmem:[#allocation10_spill] sm:$0xff] }
 0x3d2   : > { %2877 = vrot.lane.b32.xlu1 %v7551_v56, %s5003_s21  ;;  %2875 = vrot.lane.b32.xlu0 %v7554_v13, %s5003_s21  ;;  %v8128_v12 = vpop.permute.xlu0 %2707  ;;  %v8130_v5 = vpop.permute.xlu1 %2709 }
 0x3d3   : > { %10047 = vst [vmem:[#allocation134_spill] sm:$0xff] %v8128_v12  ;;  %10048 = vst [vmem:[#allocation137_spill] sm:$0xff] %v8130_v5  ;;  %4754 = vmatmul.mubr.msk.f32.vlgmr.msra.gmra.mrb[0].mxu1 %vm448_vm0, %v10050_v7  ;;  %v10053_v12 = vld [vmem:[#allocation19_spill] sm:$0xff]  ;;  %4736 = vmatmul.mubr.msk.f32.gmra.mrb[34].mxu0 %vm448_vm0, %v10062_v34  ;;  %v10070_v34 = vmax.f32 %v10069_v54, 0.0 }
 0x3d4   : > { %v10054_v5 = vmax.f32 %v10053_v12, 0.0  ;;  %v10063_v12 = vld [vmem:[#allocation21_spill] sm:$0xff]  ;;  %4738 = vmatprep.mubr.msk.f32.mxu0 %vm448_vm0, %v10066_v48  ;;  %v10076_v48 = vmax.f32 %v10075_v21, 0.0 }
 0x3d6   : > { %2881 = vrot.lane.b32.xlu1 %v7576_v0, %s5003_s21  ;;  %2879 = vrot.lane.b32.xlu0 %v7579_v63, %s5003_s21  ;;  %v8150_v47 = vpop.permute.xlu0 %2711  ;;  %v8152_v7 = vpop.permute.xlu1 %2713 }
 0x3d7   : > { %4756 = vmatprep.mubr.msk.f32.mxu1 %vm448_vm0, %v10054_v5  ;;  %10057 = vst [vmem:[#allocation158_spill] sm:$0xff] %v8150_v47  ;;  %10058 = vst [vmem:[#allocation162_spill] sm:$0xff] %v8152_v7  ;;  %v10064_v5 = vmax.f32 %v10063_v12, 0.0  ;;  %v10071_v7 = vld [vmem:[#allocation9_spill] sm:$0xff]  ;;  %v10073_v12 = vld [vmem:[#allocation27_spill] sm:$0xff] }
 0x3d8   : > { %4757 = vmatmul.mubr.msk.f32.gmra.mrb[2].mxu1 %vm448_vm0, %v10060_v31  ;;  %v10072_v47 = vmax.f32 %v10071_v7, 0.0  ;;  %v10079_v7 = vld [vmem:[#allocation28_spill] sm:$0xff] }
 0x3d9   : > { %4759 = vmatprep.mubr.msk.f32.mxu1 %vm448_vm0, %v10064_v5  ;;  %v10074_v5 = vmax.f32 %v10073_v12, 0.0 }
 0x3da   : > { %2885 = vrot.lane.b32.xlu1 %v7601_v53, %s5003_s21  ;;  %2883 = vrot.lane.b32.xlu0 %v7604_v25, %s5003_s21  ;;  %v8170_v40 = vpop.permute.xlu0 %2715  ;;  %v8172_v31 = vpop.permute.xlu1 %2717 }
 0x3db   : > { %10067 = vst [vmem:[#allocation87_spill] sm:$0xff] %v8170_v40  ;;  %10068 = vst [vmem:[#allocation167_spill] sm:$0xff] %v8172_v31  ;;  %4739 = vmatmul.mubr.msk.f32.gmra.mrb[36].mxu0 %vm448_vm0, %v10072_v47  ;;  %v10080_v47 = vmax.f32 %v10079_v7, 0.0  ;;  %v10152_v40 = vld [vmem:[#allocation125_spill] sm:$0xff] }
 0x3dc   : > { %4760 = vmatmul.mubr.msk.f32.gmra.mrb[4].mxu1 %vm448_vm0, %v10070_v34  ;;  %4741 = vmatprep.mubr.msk.f32.mxu0 %vm448_vm0, %v10076_v48 }
 0x3dd   : > { %4762 = vmatprep.mubr.msk.f32.mxu1 %vm448_vm0, %v10074_v5  ;;  %v10085_v5 = vld [vmem:[#allocation12_spill] sm:$0xff] }
 0x3de   : > { %2889 = vrot.lane.b32.xlu1 %v7626_v27, %s5003_s21  ;;  %2887 = vrot.lane.b32.xlu0 %v7629_v33, %s5003_s21  ;;  %v8190_v54 = vpop.permute.xlu0 %2719  ;;  %v8192_v34 = vpop.permute.xlu1 %2721  ;;  %v10086_v21 = vmax.f32 %v10085_v5, 0.0 }
 0x3df   : > { %10077 = vst [vmem:[#allocation90_spill] sm:$0xff] %v8190_v54  ;;  %10078 = vst [vmem:[#allocation119_spill] sm:$0xff] %v8192_v34 }
 0x3e0   : > { %4763 = vmatmul.mubr.msk.f32.gmra.mrb[6].mxu1 %vm448_vm0, %v10080_v47  ;;  %v10089_v47 = vld [vmem:[#allocation31_spill] sm:$0xff] }
 0x3e2   : > { %2893 = vrot.lane.b32.xlu1 %v7651_v32, %s5003_s21  ;;  %2891 = vrot.lane.b32.xlu0 %v7654_v23, %s5003_s21  ;;  %v8210_v48 = vpop.permute.xlu0 %2723  ;;  %v8212_v7 = vpop.permute.xlu1 %2725 }
 0x3e3   : > { %10087 = vst [vmem:[#allocation121_spill] sm:$0xff] %v8210_v48  ;;  %10088 = vst [vmem:[#allocation136_spill] sm:$0xff] %v8212_v7  ;;  %v10136_v7 = vld [vmem:[#allocation60_spill] sm:$0xff] }
 0x3e6   : > { %2897 = vrot.lane.b32.xlu1 %v7676_v46, %s5003_s21  ;;  %2895 = vrot.lane.b32.xlu0 %v7679_v49, %s5003_s21  ;;  %v10081_v46 = vld [vmem:[#allocation11_spill] sm:$0xff]  ;;  %v10083_v49 = vld [vmem:[#allocation30_spill] sm:$0xff] }
 0x3e7   : > { %v10082_v31 = vmax.f32 %v10081_v46, 0.0  ;;  %v10084_v12 = vmax.f32 %v10083_v49, 0.0 }
 0x3e9   : > { %4742 = vmatmul.mubr.msk.f32.gmra.mrb[38].mxu0 %vm448_vm0, %v10082_v31  ;;  %4765 = vmatprep.mubr.msk.f32.mxu1 %vm448_vm0, %v10084_v12  ;;  %v10090_v31 = vmax.f32 %v10089_v47, 0.0  ;;  %v10095_v12 = vld [vmem:[#allocation14_spill] sm:$0xff]  ;;  %v8232_v47 = vpop.permute.xlu1 %2729 }
 0x3ea   : > { %2901 = vrot.lane.b32.xlu1 %v7701_v43, %s5003_s21  ;;  %2899 = vrot.lane.b32.xlu0 %v7704_v57, %s5003_s21  ;;  %v10091_v43 = vld [vmem:[#allocation13_spill] sm:$0xff]  ;;  %v10093_v57 = vld [vmem:[#allocation34_spill] sm:$0xff]  ;;  %v10096_v5 = vmax.f32 %v10095_v12, 0.0  ;;  %10098 = vst [vmem:[#allocation161_spill] sm:$0xff] %v8232_v47  ;;  %v10133_v47 = vld [vmem:[#allocation79_spill] sm:$0xff] }
 0x3eb   : > { %4744 = vmatprep.mubr.msk.f32.mxu0 %vm448_vm0, %v10086_v21  ;;  %4766 = vmatmul.mubr.msk.f32.gmra.mrb[8].mxu1 %vm448_vm0, %v10090_v31  ;;  %v10092_v46 = vmax.f32 %v10091_v43, 0.0  ;;  %v10094_v49 = vmax.f32 %v10093_v57, 0.0  ;;  %v8230_v21 = vpop.permute.xlu0 %2727  ;;  %v10099_v31 = vld [vmem:[#allocation35_spill] sm:$0xff]  ;;  %v3704_v57 = vld [vmem:[%s9291_s6 + $0x8] sm:$0xff] }
 0x3ec   : > { %10097 = vst [vmem:[#allocation139_spill] sm:$0xff] %v8230_v21  ;;  %v10100_v43 = vmax.f32 %v10099_v31, 0.0  ;;  %v10105_v31 = vld [vmem:[#allocation16_spill] sm:$0xff] }
 0x3ed   : > { %4745 = vmatmul.mubr.msk.f32.gmra.mrb[40].mxu0 %vm448_vm0, %v10092_v46  ;;  %4768 = vmatprep.mubr.msk.f32.mxu1 %vm448_vm0, %v10094_v49  ;;  %v10103_v49 = vld [vmem:[#allocation38_spill] sm:$0xff] }
 0x3ee   : > { %2905 = vrot.lane.b32.xlu1 %v7726_v16, %s5003_s21  ;;  %2903 = vrot.lane.b32.xlu0 %v7729_v39, %s5003_s21  ;;  %v10101_v16 = vld [vmem:[#allocation15_spill] sm:$0xff]  ;;  %v3703_v39 = vld [vmem:[%s9291_s6] sm:$0xff]  ;;  %v10104_v12 = vmax.f32 %v10103_v49, 0.0 }
 0x3ef   : > { %4747 = vmatprep.mubr.msk.f32.mxu0 %vm448_vm0, %v10096_v5  ;;  %4769 = vmatmul.mubr.msk.f32.gmra.mrb[10].mxu1 %vm448_vm0, %v10100_v43  ;;  %v10102_v46 = vmax.f32 %v10101_v16, 0.0  ;;  %v4854_v5 = vpack.c.bf16 %v3704_v57, %v3703_v39  ;;  %v10106_v43 = vmax.f32 %v10105_v31, 0.0  ;;  %v10109_v16 = vld [vmem:[#allocation39_spill] sm:$0xff]  ;;  %v3705_v39 = vld [vmem:[%s9291_s6 + $0x10] sm:$0xff]  ;;  %v10111_v49 = vld [vmem:[#allocation40_spill] sm:$0xff] }
 0x3f0   : > { %4771 = vmatprep.mubr.msk.f32.mxu1 %vm448_vm0, %v10104_v12  ;;  %v3706_v57 = vld [vmem:[%s9291_s6 + $0x18] sm:$0xff]  ;;  %v10112_v12 = vmax.f32 %v10111_v49, 0.0 }
 0x3f1   : > { %4748 = vmatmul.mubr.msk.f32.gmra.mrb[42].mxu0 %vm448_vm0, %v10102_v46  ;;  %4855 = vmatprep.subr.bf16.mxu1 %v4854_v5  ;;  %v10110_v46 = vmax.f32 %v10109_v16, 0.0  ;;  %v4858_v31 = vpack.c.bf16 %v3706_v57, %v3705_v39  ;;  %v10115_v16 = vld [vmem:[#allocation17_spill] sm:$0xff]  ;;  %v10119_v57 = vld [vmem:[#allocation56_spill] sm:$0xff] }
 0x3f2   : > { %2909 = vrot.lane.b32.xlu1 %v7751_v42, %s5003_s21  ;;  %2907 = vrot.lane.b32.xlu0 %v7754_v61, %s5003_s21  ;;  %v8256_v42 = vpop.permute.xlu0 %2731  ;;  %v8258_v61 = vpop.permute.xlu1 %2733  ;;  %v3708_v39 = vld [vmem:[%s9291_s6 + $0x28] sm:$0xff]  ;;  %v10120_v49 = vmax.f32 %v10119_v57, 0.0 }
 0x3f3   : > { %4750 = vmatprep.mubr.msk.f32.mxu0 %vm448_vm0, %v10106_v43  ;;  %10107 = vst [vmem:[#allocation166_spill] sm:$0xff] %v8256_v42  ;;  %10108 = vst [vmem:[#allocation89_spill] sm:$0xff] %v8258_v61  ;;  %4772 = vmatmul.mubr.msk.f32.gmra.mrb[12].mxu1 %vm448_vm0, %v10110_v46  ;;  %v10117_v46 = vld [vmem:[#allocation41_spill] sm:$0xff] }
 0x3f4   : > { %4857 = vmatpush3.bf16.msra.mxu1 %v4854_v5  ;;  %4774 = vmatprep.mubr.msk.f32.mxu1 %vm448_vm0, %v10112_v12  ;;  %v10118_v61 = vmax.f32 %v10117_v46, 0.0  ;;  %v3707_v5 = vld [vmem:[%s9291_s6 + $0x20] sm:$0xff] }
 0x3f5   : > { %4859 = vmatprep.subr.bf16.mxu1 %v4858_v31 }
 0x3f6   : > { %2913 = vrot.lane.b32.xlu1 %v7776_v37, %s5003_s21  ;;  %2911 = vrot.lane.b32.xlu0 %v7779_v58, %s5003_s21  ;;  %v10116_v58 = vmax.f32 %v10115_v16, 0.0 }
 0x3f7   : > { %4775 = vmatmul.mubr.msk.f32.gmra.mrb[14].mxu1 %vm448_vm0, %v10118_v61  ;;  %v4862_v61 = vpack.c.bf16 %v3708_v39, %v3707_v5 }
 0x3f8   : > { %v8276_v43 = vpop.permute.xlu0 %2735  ;;  %v8278_v37 = vpop.permute.xlu1 %2737  ;;  %4751 = vmatmul.mubr.msk.f32.gmra.mrb[44].mxu0 %vm448_vm0, %v10116_v58  ;;  %4861 = vmatpush3.bf16.msra.mxu1 %v4858_v31  ;;  %v3709_v31 = vld [vmem:[%s9291_s6 + $0x30] sm:$0xff]  ;;  %v3710_v58 = vld [vmem:[%s9291_s6 + $0x38] sm:$0xff] }
 0x3f9   : > { %10113 = vst [vmem:[#allocation171_spill] sm:$0xff] %v8276_v43  ;;  %10114 = vst [vmem:[#allocation92_spill] sm:$0xff] %v8278_v37  ;;  %4777 = vmatprep.mubr.msk.f32.mxu1 %vm448_vm0, %v10120_v49  ;;  %4863 = vmatprep.subr.bf16.mxu1 %v4862_v61  ;;  %v4866_v46 = vpack.c.bf16 %v3710_v58, %v3709_v31  ;;  %v10123_v58 = vld [vmem:[#allocation58_spill] sm:$0xff] }
 0x3fa   : > { %2965 = vrot.lane.b32.xlu1 %v7518_v44, %s5005_s14  ;;  %2963 = vrot.lane.b32.xlu0 %v7521_v30, %s5005_s14  ;;  %v10121_v30 = vld [vmem:[#allocation57_spill] sm:$0xff] }
 0x3fb   : > { %v10122_v16 = vmax.f32 %v10121_v30, 0.0 }
 0x3fc   : > { %v8299_v12 = vpop.permute.xlu0 %2771  ;;  %v8301_v44 = vpop.permute.xlu1 %2773  ;;  %4865 = vmatpush3.bf16.msra.mxu1 %v4862_v61 }
 0x3fd   : > { %4778 = vmatmul.mubr.msk.f32.gmra.mrb[16].mxu1 %vm448_vm0, %v10122_v16  ;;  %4867 = vmatprep.subr.bf16.mxu1 %v4866_v46  ;;  %vm3637_vm0 = vcmask 457728  }
 0x3fe   : > { %3061 = vrot.lane.b32.xlu1 %v7882_v14, %s5006_s16  ;;  %3059 = vrot.lane.b32.xlu0 %v7885_v60, %s5006_s16  ;;  %v3711_v14 = vld [vmem:[%s9291_s6 + $0x40] sm:$0xff] }
 0x400   : > { %v8316_v5 = vpop.permute.xlu0 %2775  ;;  %v8318_v39 = vpop.permute.xlu1 %2777  ;;  %4869 = vmatpush3.bf16.msra.mxu1 %v4866_v46 }
 0x401   : > { %4796 = vmatprep.subr.mxu1 %v3711_v14 }
 0x402   : > { %3157 = vrot.lane.b32.xlu1 %v7530_v55, %s5007_s22  ;;  %3155 = vrot.lane.b32.xlu0 %v7533_v28, %s5007_s22 }
 0x404   : > { %v8327_v60 = vpop.permute.xlu0 %2779  ;;  %v8329_v57 = vpop.permute.xlu1 %2781  ;;  %4797 = vmatpush3.msra.mxu1 %v3711_v14  ;;  %v10124_v14 = vld [vmem:[#allocation80_spill] sm:$0xff] }
 0x406   : > { %3251 = vrot.lane.b32.xlu0 %v7542_v38, %s5008_s25  ;;  %2967 = vrot.lane.b32.xlu1 %v7542_v38, %s5005_s14 }
 0x408   : > { %v8335_v55 = vpop.permute.xlu0 %2783  ;;  %v8337_v28 = vpop.permute.xlu1 %2785 }
 0x40a   : > { %3253 = vrot.lane.b32.xlu0 %v7539_v10, %s5008_s25  ;;  %3347 = vrot.lane.b32.xlu1 %v7896_v18, %s5009_s26 }
 0x40c   : > { %v8343_v49 = vpop.permute.xlu0 %2787  ;;  %v8345_v61 = vpop.permute.xlu1 %2789 }
 0x40e   : > { %2969 = vrot.lane.b32.xlu0 %v7539_v10, %s5005_s14  ;;  %3063 = vrot.lane.b32.xlu1 %v7896_v18, %s5006_s16 }
 0x410   : > { %v8351_v38 = vpop.permute.xlu0 %2791  ;;  %v8353_v30 = vpop.permute.xlu1 %2793 }
 0x412   : > { %3349 = vrot.lane.b32.xlu0 %v7893_v35, %s5009_s26  ;;  %3065 = vrot.lane.b32.xlu1 %v7893_v35, %s5006_s16 }
 0x414   : > { %v8359_v16 = vpop.permute.xlu0 %2795  ;;  %v8361_v31 = vpop.permute.xlu1 %2797 }
 0x416   : > { %3159 = vrot.lane.b32.xlu0 %v7554_v13, %s5007_s22  ;;  %3161 = vrot.lane.b32.xlu1 %v7551_v56, %s5007_s22 }
 0x418   : > { %v8367_v10 = vpop.permute.xlu0 %2799  ;;  %v8369_v18 = vpop.permute.xlu1 %2801 }
 0x41a   : > { %3255 = vrot.lane.b32.xlu0 %v10123_v58, %s5008_s25  ;;  %2971 = vrot.lane.b32.xlu1 %v10123_v58, %s5005_s14 }
 0x41c   : > { %v8375_v35 = vpop.permute.xlu0 %2803  ;;  %v8377_v46 = vpop.permute.xlu1 %2805 }
 0x41e   : > { %3257 = vrot.lane.b32.xlu0 %v10124_v14, %s5008_s25  ;;  %3351 = vrot.lane.b32.xlu1 %v7911_v17, %s5009_s26 }
 0x420   : > { %v8383_v56 = vpop.permute.xlu0 %2807  ;;  %v8385_v13 = vpop.permute.xlu1 %2809 }
 0x421   : > { %10125 = vst [vmem:[#allocation22_spill] sm:$0xff] %v8383_v56  ;;  %10126 = vst [vmem:[#allocation25_spill] sm:$0xff] %v8385_v13  ;;  %v10154_v13 = vld [vmem:[#allocation133_spill] sm:$0xff] }
 0x422   : > { %2973 = vrot.lane.b32.xlu0 %v10124_v14, %s5005_s14  ;;  %3067 = vrot.lane.b32.xlu1 %v7911_v17, %s5006_s16 }
 0x424   : > { %v8391_v58 = vpop.permute.xlu0 %2811  ;;  %v8393_v37 = vpop.permute.xlu1 %2813 }
 0x425   : > { %10127 = vst [vmem:[#allocation138_spill] sm:$0xff] %v8391_v58  ;;  %10128 = vst [vmem:[#allocation141_spill] sm:$0xff] %v8393_v37 }
 0x426   : > { %3353 = vrot.lane.b32.xlu0 %v7908_v50, %s5009_s26  ;;  %3069 = vrot.lane.b32.xlu1 %v7908_v50, %s5006_s16 }
 0x428   : > { %v8399_v43 = vpop.permute.xlu0 %2815  ;;  %v8401_v42 = vpop.permute.xlu1 %2817 }
 0x429   : > { %10129 = vst [vmem:[#allocation165_spill] sm:$0xff] %v8399_v43  ;;  %10130 = vst [vmem:[#allocation170_spill] sm:$0xff] %v8401_v42  ;;  %v10143_v42 = vld [vmem:[#allocation61_spill] sm:$0xff] }
 0x42a   : > { %3163 = vrot.lane.b32.xlu0 %v7579_v63, %s5007_s22  ;;  %3165 = vrot.lane.b32.xlu1 %v7576_v0, %s5007_s22  ;;  %v10144_v43 = vld [vmem:[#allocation73_spill] sm:$0xff] }
 0x42c   : > { %v8407_v17 = vpop.permute.xlu0 %2819  ;;  %v8409_v14 = vpop.permute.xlu1 %2821 }
 0x42d   : > { %10131 = vst [vmem:[#allocation91_spill] sm:$0xff] %v8407_v17  ;;  %10132 = vst [vmem:[#allocation174_spill] sm:$0xff] %v8409_v14 }
 0x42e   : > { %3259 = vrot.lane.b32.xlu0 %v10133_v47, %s5008_s25  ;;  %2975 = vrot.lane.b32.xlu1 %v10133_v47, %s5005_s14 }
 0x430   : > { %v8415_v50 = vpop.permute.xlu0 %2823  ;;  %v8417_v21 = vpop.permute.xlu1 %2825 }
 0x431   : > { %10134 = vst [vmem:[#allocation94_spill] sm:$0xff] %v8415_v50  ;;  %10135 = vst [vmem:[#allocation178_spill] sm:$0xff] %v8417_v21 }
 0x432   : > { %3261 = vrot.lane.b32.xlu0 %v10136_v7, %s5008_s25  ;;  %3355 = vrot.lane.b32.xlu1 %v7922_v11, %s5009_s26 }
 0x434   : > { %v8423_v0 = vpop.permute.xlu0 %2827  ;;  %v8425_v63 = vpop.permute.xlu1 %2829 }
 0x435   : > { %10137 = vst [vmem:[#allocation24_spill] sm:$0xff] %v8423_v0  ;;  %10138 = vst [vmem:[#allocation26_spill] sm:$0xff] %v8425_v63  ;;  %v10142_v63 = vld [vmem:[#allocation129_spill] sm:$0xff] }
 0x436   : > { %2977 = vrot.lane.b32.xlu0 %v10136_v7, %s5005_s14  ;;  %3071 = vrot.lane.b32.xlu1 %v7922_v11, %s5006_s16 }
 0x438   : > { %v8431_v47 = vpop.permute.xlu0 %2831  ;;  %v8433_v50 = vpop.permute.xlu1 %2833 }
 0x439   : > { %10139 = vst [vmem:[#allocation140_spill] sm:$0xff] %v8431_v47  ;;  %10140 = vst [vmem:[#allocation64_spill] sm:$0xff] %v8433_v50  ;;  %v10141_v50 = vld [vmem:[#allocation62_spill] sm:$0xff] }
 0x43a   : > { %3357 = vrot.lane.b32.xlu0 %v7919_v26, %s5009_s26  ;;  %3073 = vrot.lane.b32.xlu1 %v7919_v26, %s5006_s16 }
 0x43c   : > { %v8439_v21 = vpop.permute.xlu0 %2867  ;;  %v8441_v0 = vpop.permute.xlu1 %2869 }
 0x43e   : > { %3167 = vrot.lane.b32.xlu0 %v7604_v25, %s5007_s22  ;;  %3169 = vrot.lane.b32.xlu1 %v7601_v53, %s5007_s22 }
 0x440   : > { %v8447_v11 = vpop.permute.xlu0 %2871  ;;  %v8449_v7 = vpop.permute.xlu1 %2873 }
 0x442   : > { %3263 = vrot.lane.b32.xlu0 %v10141_v50, %s5008_s25  ;;  %2979 = vrot.lane.b32.xlu1 %v10141_v50, %s5005_s14 }
 0x444   : > { %v8455_v26 = vpop.permute.xlu0 %2875  ;;  %v8457_v47 = vpop.permute.xlu1 %2877 }
 0x446   : > { %3265 = vrot.lane.b32.xlu0 %v10142_v63, %s5008_s25  ;;  %3359 = vrot.lane.b32.xlu1 %v7937_v62, %s5009_s26 }
 0x448   : > { %v8463_v53 = vpop.permute.xlu0 %2879  ;;  %v8465_v25 = vpop.permute.xlu1 %2881 }
 0x44a   : > { %2981 = vrot.lane.b32.xlu0 %v10142_v63, %s5005_s14  ;;  %3075 = vrot.lane.b32.xlu1 %v7937_v62, %s5006_s16 }
 0x44c   : > { %v8471_v50 = vpop.permute.xlu0 %2883  ;;  %v8473_v14 = vpop.permute.xlu1 %2885 }
 0x44e   : > { %3361 = vrot.lane.b32.xlu0 %v7934_v24, %s5009_s26  ;;  %3077 = vrot.lane.b32.xlu1 %v7934_v24, %s5006_s16 }
 0x450   : > { %v8479_v17 = vpop.permute.xlu0 %2887  ;;  %v8481_v48 = vpop.permute.xlu1 %2889 }
 0x452   : > { %3171 = vrot.lane.b32.xlu0 %v7629_v33, %s5007_s22  ;;  %3173 = vrot.lane.b32.xlu1 %v7626_v27, %s5007_s22 }
 0x454   : > { %v8487_v62 = vpop.permute.xlu0 %2891  ;;  %v8489_v63 = vpop.permute.xlu1 %2893 }
 0x456   : > { %3267 = vrot.lane.b32.xlu0 %v10143_v42, %s5008_s25  ;;  %2983 = vrot.lane.b32.xlu1 %v10143_v42, %s5005_s14 }
 0x458   : > { %v8495_v24 = vpop.permute.xlu0 %2895  ;;  %v8497_v34 = vpop.permute.xlu1 %2897 }
 0x45a   : > { %3269 = vrot.lane.b32.xlu0 %v10144_v43, %s5008_s25  ;;  %3363 = vrot.lane.b32.xlu1 %v7948_v19, %s5009_s26 }
 0x45c   : > { %v8503_v27 = vpop.permute.xlu0 %2899  ;;  %v8505_v33 = vpop.permute.xlu1 %2901 }
 0x45d   : > { %10145 = vst [vmem:[#allocation169_spill] sm:$0xff] %v8505_v33 }
 0x45e   : > { %2985 = vrot.lane.b32.xlu0 %v10144_v43, %s5005_s14  ;;  %3079 = vrot.lane.b32.xlu1 %v7948_v19, %s5006_s16 }
 0x460   : > { %v8511_v42 = vpop.permute.xlu0 %2903  ;;  %v8513_v54 = vpop.permute.xlu1 %2905 }
 0x461   : > { %10146 = vst [vmem:[#allocation173_spill] sm:$0xff] %v8511_v42  ;;  %10147 = vst [vmem:[#allocation93_spill] sm:$0xff] %v8513_v54  ;;  %v4957_v54 = vld [vmem:[#allocation3] sm:$0xff] }
 0x462   : > { %3365 = vrot.lane.b32.xlu0 %v7945_v3, %s5009_s26  ;;  %3081 = vrot.lane.b32.xlu1 %v7945_v3, %s5006_s16 }
 0x464   : > { %v8519_v37 = vpop.permute.xlu0 %2907  ;;  %v8521_v58 = vpop.permute.xlu1 %2909 }
 0x465   : > { %10148 = vst [vmem:[#allocation177_spill] sm:$0xff] %v8519_v37  ;;  %10149 = vst [vmem:[#allocation96_spill] sm:$0xff] %v8521_v58  ;;  %v10153_v58 = vld [vmem:[#allocation109_spill] sm:$0xff] }
 0x466   : > { %3175 = vrot.lane.b32.xlu0 %v7654_v23, %s5007_s22  ;;  %3177 = vrot.lane.b32.xlu1 %v7651_v32, %s5007_s22 }
 0x468   : > { %v8527_v19 = vpop.permute.xlu0 %2911  ;;  %v8529_v43 = vpop.permute.xlu1 %2913 }
 0x469   : > { %10150 = vst [vmem:[#allocation29_spill] sm:$0xff] %v8527_v19  ;;  %10151 = vst [vmem:[#allocation33_spill] sm:$0xff] %v8529_v43 }
 0x46a   : > { %3271 = vrot.lane.b32.xlu0 %v10152_v40, %s5008_s25  ;;  %2987 = vrot.lane.b32.xlu1 %v10152_v40, %s5005_s14  ;;  %v3443_v40 = vsel %vm1627_vm3, %v4957_v54, %v8018_v4  ;;  %v8555_v54 = vld [vmem:[#allocation3 + $0xc0] sm:$0xff] }
 0x46b   : > { %v3475_v42 = vsel %vm1693_vm7, %v3443_v40, %v8299_v12 }
 0x46c   : > { %v2964_v3 = vpop.permute.xlu0 %2963  ;;  %v2966_v37 = vpop.permute.xlu1 %2965 }
 0x46e   : > { %3273 = vrot.lane.b32.xlu0 %v10153_v58, %s5008_s25  ;;  %3367 = vrot.lane.b32.xlu1 %v7963_v52, %s5009_s26 }
 0x470   : > { %v3060_v23 = vpop.permute.xlu0 %3059  ;;  %v3062_v32 = vpop.permute.xlu1 %3061 }
 0x472   : > { %2989 = vrot.lane.b32.xlu0 %v10153_v58, %s5005_s14  ;;  %3083 = vrot.lane.b32.xlu1 %v7963_v52, %s5006_s16  ;;  %v3507_v58 = vsel %vm1759_vm9, %v3475_v42, %v8439_v21 }
 0x473   : > { %v3539_v33 = vsel %vm1825_vm11, %v3507_v58, %v2964_v3  ;;  %v10155_v58 = vld [vmem:[#allocation76_spill] sm:$0xff] }
 0x474   : > { %v3156_v43 = vpop.permute.xlu0 %3155  ;;  %v3158_v19 = vpop.permute.xlu1 %3157  ;;  %v3572_v4 = vsel %vm3571_vm14, %v3539_v33, %v3060_v23  ;;  %v4960_v23 = vld [vmem:[#allocation3 + $0x8] sm:$0xff] }
 0x475   : > { %v3605_v21 = vsel %vm3604_vm15, %v3572_v4, %v3156_v43  ;;  %v3444_v40 = vsel %vm1627_vm3, %v4960_v23, %v8020_v36 }
 0x476   : > { %3369 = vrot.lane.b32.xlu0 %v10154_v13, %s5009_s26  ;;  %3085 = vrot.lane.b32.xlu1 %v10154_v13, %s5006_s16  ;;  %v8559_v13 = vld [vmem:[#allocation3 + $0xc8] sm:$0xff]  ;;  %v3476_v43 = vsel %vm1693_vm7, %v3444_v40, %v8301_v44 }
 0x478   : > { %v3252_v52 = vpop.permute.xlu0 %3251  ;;  %v2968_v56 = vpop.permute.xlu1 %2967 }
 0x479   : > { %v3638_v12 = vsel %vm3637_vm0, %v3605_v21, %v3252_v52  ;;  %v3508_v52 = vsel %vm1759_vm9, %v3476_v43, %v8441_v0 }
 0x47a   : > { %3179 = vrot.lane.b32.xlu0 %v8555_v54, %s5007_s22  ;;  %3181 = vrot.lane.b32.xlu1 %v8559_v13, %s5007_s22 }
 0x47c   : > { %v3254_v42 = vpop.permute.xlu0 %3253  ;;  %v3348_v3 = vpop.permute.xlu1 %3347 }
 0x47d   : > { %v3671_v33 = vsel %vm3670_vm1, %v3638_v12, %v3348_v3  ;;  %v3540_v12 = vsel %vm1825_vm11, %v3508_v52, %v2966_v37  ;;  %v10156_v3 = vld [vmem:[#allocation75_spill] sm:$0xff] }
 0x47e   : > { %3275 = vrot.lane.b32.xlu0 %v10155_v58, %s5008_s25  ;;  %2991 = vrot.lane.b32.xlu1 %v10155_v58, %s5005_s14  ;;  %v3573_v36 = vsel %vm3571_vm14, %v3540_v12, %v3062_v32  ;;  %v4961_v58 = vld [vmem:[#allocation3 + $0x18] sm:$0xff] }
 0x47f   : > { %4798 = vmatprep.mubr.msk.f32.mxu1 %vm4037_vm5, %v3671_v33  ;;  %v3606_v23 = vsel %vm3604_vm15, %v3573_v36, %v3158_v19  ;;  %v3445_v19 = vsel %vm1627_vm3, %v4961_v58, %v8039_v45  ;;  %v8607_v45 = vld [vmem:[#allocation3 + $0xe0] sm:$0xff] }
 0x480   : > { %v2970_v4 = vpop.permute.xlu0 %2969  ;;  %v3064_v21 = vpop.permute.xlu1 %3063  ;;  %v3639_v44 = vsel %vm3637_vm0, %v3606_v23, %v3254_v42  ;;  %v10157_v42 = vld [vmem:[#allocation130_spill] sm:$0xff]  ;;  %v3477_v43 = vsel %vm1693_vm7, %v3445_v19, %v8316_v5  ;;  %v8603_v23 = vld [vmem:[#allocation3 + $0xd8] sm:$0xff] }
 0x481   : > { %v10158_v58 = vld [vmem:[#allocation114_spill] sm:$0xff] }
 0x482   : > { %3277 = vrot.lane.b32.xlu0 %v10156_v3, %s5008_s25  ;;  %3371 = vrot.lane.b32.xlu1 %v7974_v15, %s5009_s26 }
 0x484   : > { %v3350_v33 = vpop.permute.xlu0 %3349  ;;  %v3066_v40 = vpop.permute.xlu1 %3065 }
 0x485   : > { %v3672_v0 = vsel %vm3670_vm1, %v3639_v44, %v3350_v33 }
 0x486   : > { %2993 = vrot.lane.b32.xlu0 %v10156_v3, %s5005_s14  ;;  %3087 = vrot.lane.b32.xlu1 %v7974_v15, %s5006_s16  ;;  %v3509_v15 = vsel %vm1759_vm9, %v3477_v43, %v8447_v11 }
 0x487   : > { %4799 = vmatmul.mubr.msk.f32.vlgmr.msra.gmra.mrb[18].mxu1 %vm4037_vm5, %v3672_v0  ;;  %v3541_v36 = vsel %vm1825_vm11, %v3509_v15, %v2968_v56  ;;  %v4964_v0 = vld [vmem:[#allocation3 + $0x20] sm:$0xff] }
 0x488   : > { %v3160_v37 = vpop.permute.xlu0 %3159  ;;  %v3162_v32 = vpop.permute.xlu1 %3161  ;;  %v3574_v3 = vsel %vm3571_vm14, %v3541_v36, %v3064_v21  ;;  %v3446_v21 = vsel %vm1627_vm3, %v4964_v0, %v8041_v6  ;;  %v10160_v36 = vld [vmem:[#allocation86_spill] sm:$0xff] }
 0x489   : > { %v3607_v5 = vsel %vm3604_vm15, %v3574_v3, %v3160_v37  ;;  %v3478_v19 = vsel %vm1693_vm7, %v3446_v21, %v8318_v39 }
 0x48a   : > { %3373 = vrot.lane.b32.xlu0 %v10157_v42, %s5009_s26  ;;  %3089 = vrot.lane.b32.xlu1 %v10157_v42, %s5006_s16  ;;  %v3510_v37 = vsel %vm1759_vm9, %v3478_v19, %v8449_v7 }
 0x48b   : > { %v3542_v15 = vsel %vm1825_vm11, %v3510_v37, %v2970_v4 }
 0x48c   : > { %v3256_v52 = vpop.permute.xlu0 %3255  ;;  %v2972_v12 = vpop.permute.xlu1 %2971  ;;  %v3575_v6 = vsel %vm3571_vm14, %v3542_v15, %v3066_v40  ;;  %v8651_v15 = vld [vmem:[#allocation3 + $0xf0] sm:$0xff] }
 0x48d   : > { %v3640_v11 = vsel %vm3637_vm0, %v3607_v5, %v3256_v52  ;;  %v10159_v52 = vld [vmem:[#allocation82_spill] sm:$0xff]  ;;  %v3608_v3 = vsel %vm3604_vm15, %v3575_v6, %v3162_v32 }
 0x48e   : > { %3183 = vrot.lane.b32.xlu0 %v8603_v23, %s5007_s22  ;;  %3185 = vrot.lane.b32.xlu1 %v8607_v45, %s5007_s22 }
 0x490   : > { %v3258_v44 = vpop.permute.xlu0 %3257  ;;  %v3352_v33 = vpop.permute.xlu1 %3351 }
 0x491   : > { %v3673_v56 = vsel %vm3670_vm1, %v3640_v11, %v3352_v33  ;;  %v3641_v39 = vsel %vm3637_vm0, %v3608_v3, %v3258_v44  ;;  %v4965_v33 = vld [vmem:[#allocation3 + $0x30] sm:$0xff]  ;;  %v10162_v3 = vld [vmem:[#allocation131_spill] sm:$0xff] }
 0x492   : > { %3279 = vrot.lane.b32.xlu0 %v10158_v58, %s5008_s25  ;;  %2995 = vrot.lane.b32.xlu1 %v10158_v58, %s5005_s14  ;;  %v3447_v32 = vsel %vm1627_vm3, %v4965_v33, %v8065_v29  ;;  %v10161_v44 = vld [vmem:[#allocation156_spill] sm:$0xff]  ;;  %v8655_v29 = vld [vmem:[#allocation3 + $0xf8] sm:$0xff] }
 0x493   : > { %4801 = vmatprep.mubr.msk.f32.mxu1 %vm4037_vm5, %v3673_v56  ;;  %v3479_v56 = vsel %vm1693_vm7, %v3447_v32, %v8327_v60  ;;  %v10163_v32 = vld [vmem:[#allocation111_spill] sm:$0xff] }
 0x494   : > { %v2974_v42 = vpop.permute.xlu0 %2973  ;;  %v3068_v43 = vpop.permute.xlu1 %3067  ;;  %v3511_v0 = vsel %vm1759_vm9, %v3479_v56, %v8455_v26 }
 0x495   : > { %v3543_v19 = vsel %vm1825_vm11, %v3511_v0, %v2972_v12 }
 0x496   : > { %3281 = vrot.lane.b32.xlu0 %v10159_v52, %s5008_s25  ;;  %3375 = vrot.lane.b32.xlu1 %v10160_v36, %s5009_s26  ;;  %v3576_v37 = vsel %vm3571_vm14, %v3543_v19, %v3068_v43  ;;  %v10164_v19 = vld [vmem:[#allocation164_spill] sm:$0xff] }
 0x498   : > { %v3354_v5 = vpop.permute.xlu0 %3353  ;;  %v3070_v11 = vpop.permute.xlu1 %3069 }
 0x499   : > { %v3674_v7 = vsel %vm3670_vm1, %v3641_v39, %v3354_v5 }
 0x49a   : > { %2997 = vrot.lane.b32.xlu0 %v10159_v52, %s5005_s14  ;;  %3091 = vrot.lane.b32.xlu1 %v10160_v36, %s5006_s16  ;;  %v4968_v36 = vld [vmem:[#allocation3 + $0x38] sm:$0xff] }
 0x49b   : > { %4802 = vmatmul.mubr.msk.f32.gmra.mrb[20].mxu1 %vm4037_vm5, %v3674_v7  ;;  %v3448_v43 = vsel %vm1627_vm3, %v4968_v36, %v8067_v9 }
 0x49c   : > { %v3164_v4 = vpop.permute.xlu0 %3163  ;;  %v3166_v40 = vpop.permute.xlu1 %3165  ;;  %v3480_v39 = vsel %vm1693_vm7, %v3448_v43, %v8329_v57 }
 0x49d   : > { %v3609_v60 = vsel %vm3604_vm15, %v3576_v37, %v3164_v4  ;;  %v3512_v5 = vsel %vm1759_vm9, %v3480_v39, %v8457_v47 }
 0x49e   : > { %3377 = vrot.lane.b32.xlu0 %v10161_v44, %s5009_s26  ;;  %3093 = vrot.lane.b32.xlu1 %v10161_v44, %s5006_s16  ;;  %v3544_v33 = vsel %vm1825_vm11, %v3512_v5, %v2974_v42  ;;  %v10165_v5 = vld [vmem:[#allocation154_spill] sm:$0xff] }
 0x49f   : > { %v3577_v9 = vsel %vm3571_vm14, %v3544_v33, %v3070_v11 }
 0x4a0   : > { %v3260_v21 = vpop.permute.xlu0 %3259  ;;  %v2976_v58 = vpop.permute.xlu1 %2975  ;;  %v3610_v44 = vsel %vm3604_vm15, %v3577_v9, %v3166_v40 }
 0x4a1   : > { %v3642_v26 = vsel %vm3637_vm0, %v3609_v60, %v3260_v21  ;;  %v4969_v21 = vld [vmem:[#allocation3 + $0x48] sm:$0xff] }
 0x4a2   : > { %3187 = vrot.lane.b32.xlu0 %v8651_v15, %s5007_s22  ;;  %3189 = vrot.lane.b32.xlu1 %v8655_v29, %s5007_s22  ;;  %v3449_v40 = vsel %vm1627_vm3, %v4969_v21, %v8083_v41  ;;  %v8703_v41 = vld [vmem:[#allocation3 + $0x110] sm:$0xff] }
 0x4a3   : > { %v3481_v37 = vsel %vm1693_vm7, %v3449_v40, %v8335_v55  ;;  %v4973_v40 = vld [vmem:[#allocation3 + $0x60] sm:$0xff] }
 0x4a4   : > { %v3262_v6 = vpop.permute.xlu0 %3261  ;;  %v3356_v52 = vpop.permute.xlu1 %3355 }
 0x4a5   : > { %v3675_v12 = vsel %vm3670_vm1, %v3642_v26, %v3356_v52  ;;  %v3643_v57 = vsel %vm3637_vm0, %v3610_v44, %v3262_v6 }
 0x4a6   : > { %3283 = vrot.lane.b32.xlu0 %v10162_v3, %s5008_s25  ;;  %2999 = vrot.lane.b32.xlu1 %v10162_v3, %s5005_s14  ;;  %v4972_v3 = vld [vmem:[#allocation3 + $0x50] sm:$0xff] }
 0x4a7   : > { %4804 = vmatprep.mubr.msk.f32.mxu1 %vm4037_vm5, %v3675_v12  ;;  %v8699_v12 = vld [vmem:[#allocation3 + $0x108] sm:$0xff]  ;;  %v3450_v39 = vsel %vm1627_vm3, %v4972_v3, %v8085_v59 }
 0x4a8   : > { %v2978_v7 = vpop.permute.xlu0 %2977  ;;  %v3072_v4 = vpop.permute.xlu1 %3071 }
 0x4aa   : > { %3285 = vrot.lane.b32.xlu0 %v10163_v32, %s5008_s25  ;;  %3379 = vrot.lane.b32.xlu1 %v8000_v22, %s5009_s26 }
 0x4ac   : > { %v3358_v56 = vpop.permute.xlu0 %3357  ;;  %v3074_v0 = vpop.permute.xlu1 %3073 }
 0x4ad   : > { %v3676_v47 = vsel %vm3670_vm1, %v3643_v57, %v3358_v56  ;;  %v10166_v57 = vld [vmem:[#allocation127_spill] sm:$0xff] }
 0x4ae   : > { %3001 = vrot.lane.b32.xlu0 %v10163_v32, %s5005_s14  ;;  %3095 = vrot.lane.b32.xlu1 %v8000_v22, %s5006_s16  ;;  %v3513_v22 = vsel %vm1759_vm9, %v3481_v37, %v8463_v53  ;;  %v10167_v56 = vld [vmem:[#allocation115_spill] sm:$0xff] }
 0x4af   : > { %4805 = vmatmul.mubr.msk.f32.gmra.mrb[22].mxu1 %vm4037_vm5, %v3676_v47  ;;  %v3545_v6 = vsel %vm1825_vm11, %v3513_v22, %v2976_v58 }
 0x4b0   : > { %v3168_v42 = vpop.permute.xlu0 %3167  ;;  %v3170_v11 = vpop.permute.xlu1 %3169  ;;  %v3578_v52 = vsel %vm3571_vm14, %v3545_v6, %v3072_v4  ;;  %v3482_v4 = vsel %vm1693_vm7, %v3450_v39, %v8337_v28  ;;  %v10169_v39 = vld [vmem:[#allocation157_spill] sm:$0xff] }
 0x4b1   : > { %v3611_v55 = vsel %vm3604_vm15, %v3578_v52, %v3168_v42  ;;  %v3514_v33 = vsel %vm1759_vm9, %v3482_v4, %v8465_v25 }
 0x4b2   : > { %3381 = vrot.lane.b32.xlu0 %v10164_v19, %s5009_s26  ;;  %3097 = vrot.lane.b32.xlu1 %v10164_v19, %s5006_s16  ;;  %v3546_v44 = vsel %vm1825_vm11, %v3514_v33, %v2978_v7  ;;  %v10168_v19 = vld [vmem:[#allocation153_spill] sm:$0xff] }
 0x4b3   : > { %v3579_v59 = vsel %vm3571_vm14, %v3546_v44, %v3074_v0 }
 0x4b4   : > { %v3264_v60 = vpop.permute.xlu0 %3263  ;;  %v2980_v26 = vpop.permute.xlu1 %2979  ;;  %v3612_v47 = vsel %vm3604_vm15, %v3579_v59, %v3170_v11  ;;  %v3451_v11 = vsel %vm1627_vm3, %v4973_v40, %v8091_v20  ;;  %v8751_v20 = vld [vmem:[#allocation3 + $0x128] sm:$0xff]  ;;  %v10170_v59 = vld [vmem:[#allocation81_spill] sm:$0xff] }
 0x4b5   : > { %v3644_v53 = vsel %vm3637_vm0, %v3611_v55, %v3264_v60  ;;  %v3483_v37 = vsel %vm1693_vm7, %v3451_v11, %v8343_v49 }
 0x4b6   : > { %3191 = vrot.lane.b32.xlu0 %v8699_v12, %s5007_s22  ;;  %3193 = vrot.lane.b32.xlu1 %v8703_v41, %s5007_s22  ;;  %v3515_v22 = vsel %vm1759_vm9, %v3483_v37, %v8471_v50  ;;  %v8799_v37 = vld [vmem:[#allocation3 + $0x138] sm:$0xff] }
 0x4b7   : > { %v3547_v52 = vsel %vm1825_vm11, %v3515_v22, %v2980_v26 }
 0x4b8   : > { %v3266_v36 = vpop.permute.xlu0 %3265  ;;  %v3360_v43 = vpop.permute.xlu1 %3359 }
 0x4b9   : > { %v3677_v58 = vsel %vm3670_vm1, %v3644_v53, %v3360_v43  ;;  %v3645_v28 = vsel %vm3637_vm0, %v3612_v47, %v3266_v36  ;;  %v8747_v53 = vld [vmem:[#allocation3 + $0x120] sm:$0xff] }
 0x4ba   : > { %3287 = vrot.lane.b32.xlu0 %v10165_v5, %s5008_s25  ;;  %3003 = vrot.lane.b32.xlu1 %v10165_v5, %s5005_s14 }
 0x4bb   : > { %4807 = vmatprep.mubr.msk.f32.mxu1 %vm4037_vm5, %v3677_v58  ;;  %v4976_v58 = vld [vmem:[#allocation3 + $0x68] sm:$0xff] }
 0x4bc   : > { %v2982_v9 = vpop.permute.xlu0 %2981  ;;  %v3076_v32 = vpop.permute.xlu1 %3075  ;;  %v3452_v3 = vsel %vm1627_vm3, %v4976_v58, %v8093_v2 }
 0x4bd   : > { %v3580_v55 = vsel %vm3571_vm14, %v3547_v52, %v3076_v32  ;;  %v3484_v5 = vsel %vm1693_vm7, %v3452_v3, %v8345_v61  ;;  %v4979_v52 = vld [vmem:[#allocation3 + $0x80] sm:$0xff] }
 0x4be   : > { %3289 = vrot.lane.b32.xlu0 %v10166_v57, %s5008_s25  ;;  %3383 = vrot.lane.b32.xlu1 %v10167_v56, %s5009_s26  ;;  %v3516_v4 = vsel %vm1759_vm9, %v3484_v5, %v8473_v14 }
 0x4bf   : > { %v3548_v44 = vsel %vm1825_vm11, %v3516_v4, %v2982_v9 }
 0x4c0   : > { %v3362_v42 = vpop.permute.xlu0 %3361  ;;  %v3078_v21 = vpop.permute.xlu1 %3077 }
 0x4c1   : > { %v3678_v25 = vsel %vm3670_vm1, %v3645_v28, %v3362_v42  ;;  %v3581_v2 = vsel %vm3571_vm14, %v3548_v44, %v3078_v21  ;;  %v8783_v42 = vpop.f32.mrb[32].mxu0  ;;  %v4977_v21 = vld [vmem:[#allocation3 + $0x78] sm:$0xff]  ;;  %v10173_v44 = vld [vmem:[#allocation84_spill] sm:$0xff] }
 0x4c2   : > { %3005 = vrot.lane.b32.xlu0 %v10166_v57, %s5005_s14  ;;  %3099 = vrot.lane.b32.xlu1 %v10167_v56, %s5006_s16 }
 0x4c3   : > { %4808 = vmatmul.mubr.msk.f32.gmra.mrb[24].mxu1 %vm4037_vm5, %v3678_v25  ;;  %v3453_v25 = vsel %vm1627_vm3, %v4977_v21, %v8099_v1 }
 0x4c4   : > { %v3172_v7 = vpop.permute.xlu0 %3171  ;;  %v3174_v0 = vpop.permute.xlu1 %3173 }
 0x4c5   : > { %v3613_v49 = vsel %vm3604_vm15, %v3580_v55, %v3172_v7  ;;  %v3614_v57 = vsel %vm3604_vm15, %v3581_v2, %v3174_v0  ;;  %v3485_v7 = vsel %vm1693_vm7, %v3453_v25, %v8351_v38 }
 0x4c6   : > { %3385 = vrot.lane.b32.xlu0 %v10168_v19, %s5009_s26  ;;  %3101 = vrot.lane.b32.xlu1 %v10168_v19, %s5006_s16  ;;  %v3517_v0 = vsel %vm1759_vm9, %v3485_v7, %v8479_v17 }
 0x4c8   : > { %v3268_v60 = vpop.permute.xlu0 %3267  ;;  %v2984_v6 = vpop.permute.xlu1 %2983 }
 0x4c9   : > { %v3646_v50 = vsel %vm3637_vm0, %v3613_v49, %v3268_v60  ;;  %v3549_v19 = vsel %vm1825_vm11, %v3517_v0, %v2984_v6  ;;  %v10171_v6 = vld [vmem:[#allocation163_spill] sm:$0xff]  ;;  %v8810_v49 = vld [vmem:[#allocation3 + $0x140] sm:$0xff] }
 0x4ca   : > { %3195 = vrot.lane.b32.xlu0 %v8747_v53, %s5007_s22  ;;  %3197 = vrot.lane.b32.xlu1 %v8751_v20, %s5007_s22  ;;  %v3454_v55 = vsel %vm1627_vm3, %v4979_v52, %v10171_v6 }
 0x4cc   : > { %v3270_v36 = vpop.permute.xlu0 %3269  ;;  %v3364_v43 = vpop.permute.xlu1 %3363 }
 0x4cd   : > { %v3679_v26 = vsel %vm3670_vm1, %v3646_v50, %v3364_v43  ;;  %v3647_v61 = vsel %vm3637_vm0, %v3614_v57, %v3270_v36  ;;  %v10172_v50 = vld [vmem:[#allocation78_spill] sm:$0xff]  ;;  %v3486_v36 = vsel %vm1693_vm7, %v3454_v55, %v8353_v30 }
 0x4ce   : > { %3291 = vrot.lane.b32.xlu0 %v10169_v39, %s5008_s25  ;;  %3007 = vrot.lane.b32.xlu1 %v10169_v39, %s5005_s14  ;;  %v3518_v43 = vsel %vm1759_vm9, %v3486_v36, %v8481_v48 }
 0x4cf   : > { %4810 = vmatprep.mubr.msk.f32.mxu1 %vm4037_vm5, %v3679_v26 }
 0x4d0   : > { %v2986_v33 = vpop.permute.xlu0 %2985  ;;  %v3080_v32 = vpop.permute.xlu1 %3079 }
 0x4d1   : > { %v3582_v1 = vsel %vm3571_vm14, %v3549_v19, %v3080_v32  ;;  %v3550_v3 = vsel %vm1825_vm11, %v3518_v43, %v2986_v33  ;;  %v10174_v33 = vld [vmem:[#allocation132_spill] sm:$0xff]  ;;  %v8873_v43 = vld [vmem:[#allocation3 + $0x158] sm:$0xff] }
 0x4d2   : > { %3293 = vrot.lane.b32.xlu0 %v10170_v59, %s5008_s25  ;;  %3387 = vrot.lane.b32.xlu1 %v8030_v8, %s5009_s26 }
 0x4d4   : > { %v3366_v56 = vpop.permute.xlu0 %3365  ;;  %v3082_v47 = vpop.permute.xlu1 %3081 }
 0x4d5   : > { %v3680_v14 = vsel %vm3670_vm1, %v3647_v61, %v3366_v56  ;;  %v3583_v39 = vsel %vm3571_vm14, %v3550_v3, %v3082_v47  ;;  %v4981_v61 = vld [vmem:[#allocation3 + $0x90] sm:$0xff] }
 0x4d6   : > { %3009 = vrot.lane.b32.xlu0 %v10170_v59, %s5005_s14  ;;  %3103 = vrot.lane.b32.xlu1 %v8030_v8, %s5006_s16  ;;  %v8793_v8 = vpop.f32.mrb[33].mxu0  ;;  %v10175_v56 = vld [vmem:[#allocation88_spill] sm:$0xff] }
 0x4d7   : > { %4811 = vmatmul.mubr.msk.f32.gmra.mrb[26].mxu1 %vm4037_vm5, %v3680_v14  ;;  %v8835_v57 = vpop.f32.mrb[34].mxu0  ;;  %v3455_v47 = vsel %vm1627_vm3, %v4981_v61, %v10175_v56 }
 0x4d8   : > { %v3176_v9 = vpop.permute.xlu0 %3175  ;;  %v3178_v28 = vpop.permute.xlu1 %3177  ;;  %v3487_v14 = vsel %vm1693_vm7, %v3455_v47, %v8359_v16 }
 0x4d9   : > { %v3616_v5 = vsel %vm3604_vm15, %v3583_v39, %v3178_v28  ;;  %v3519_v28 = vsel %vm1759_vm9, %v3487_v14, %v8487_v62 }
 0x4da   : > { %3389 = vrot.lane.b32.xlu0 %v8027_v51, %s5009_s26  ;;  %3105 = vrot.lane.b32.xlu1 %v8027_v51, %s5006_s16  ;;  %v3615_v51 = vsel %vm3604_vm15, %v3582_v1, %v3176_v9  ;;  %v8845_v9 = vpop.f32.mrb[35].mxu0 }
 0x4dc   : > { %v3272_v40 = vpop.permute.xlu0 %3271  ;;  %v2988_v11 = vpop.permute.xlu1 %2987 }
 0x4dd   : > { %v3648_v38 = vsel %vm3637_vm0, %v3615_v51, %v3272_v40  ;;  %v3551_v7 = vsel %vm1825_vm11, %v3519_v28, %v2988_v11  ;;  %v10176_v40 = vld [vmem:[#allocation118_spill] sm:$0xff] }
 0x4de   : > { %3199 = vrot.lane.b32.xlu0 %v8799_v37, %s5007_s22  ;;  %2915 = vrot.lane.b32.xlu1 %v8799_v37, %s5003_s21 }
 0x4e0   : > { %v3274_v22 = vpop.permute.xlu0 %3273  ;;  %v3368_v17 = vpop.permute.xlu1 %3367 }
 0x4e1   : > { %v3681_v60 = vsel %vm3670_vm1, %v3648_v38, %v3368_v17  ;;  %v3649_v30 = vsel %vm3637_vm0, %v3616_v5, %v3274_v22  ;;  %v4982_v38 = vld [vmem:[#allocation3 + $0x98] sm:$0xff]  ;;  %v10177_v22 = vld [vmem:[#allocation168_spill] sm:$0xff] }
 0x4e2   : > { %3201 = vrot.lane.b32.xlu0 %v8810_v49, %s5007_s22  ;;  %3295 = vrot.lane.b32.xlu1 %v10172_v50, %s5008_s25  ;;  %v3456_v11 = vsel %vm1627_vm3, %v4982_v38, %v10177_v22  ;;  %v8860_v17 = vld [vmem:[#allocation3 + $0x150] sm:$0xff] }
 0x4e3   : > { %4813 = vmatprep.mubr.msk.f32.mxu1 %vm4037_vm5, %v3681_v60  ;;  %v3488_v60 = vsel %vm1693_vm7, %v3456_v11, %v8361_v31 }
 0x4e4   : > { %v2990_v26 = vpop.permute.xlu0 %2989  ;;  %v3084_v58 = vpop.permute.xlu1 %3083  ;;  %v3520_v52 = vsel %vm1759_vm9, %v3488_v60, %v8489_v63 }
 0x4e5   : > { %v3584_v0 = vsel %vm3571_vm14, %v3551_v7, %v3084_v58  ;;  %v10178_v58 = vld [vmem:[#allocation160_spill] sm:$0xff] }
 0x4e6   : > { %2917 = vrot.lane.b32.xlu0 %v8810_v49, %s5003_s21  ;;  %3011 = vrot.lane.b32.xlu1 %v10172_v50, %s5005_s14  ;;  %v3552_v50 = vsel %vm1825_vm11, %v3520_v52, %v2990_v26  ;;  %v8923_v52 = vld [vmem:[#allocation3 + $0x168] sm:$0xff] }
 0x4e8   : > { %v3370_v4 = vpop.permute.xlu0 %3369  ;;  %v3086_v32 = vpop.permute.xlu1 %3085 }
 0x4e9   : > { %v3682_v48 = vsel %vm3670_vm1, %v3649_v30, %v3370_v4  ;;  %v3585_v36 = vsel %vm3571_vm14, %v3552_v50, %v3086_v32  ;;  %v8887_v4 = vpop.f32.mrb[36].mxu0  ;;  %v4985_v32 = vld [vmem:[#allocation3 + $0xa8] sm:$0xff] }
 0x4ea   : > { %3297 = vrot.lane.b32.xlu0 %v10173_v44, %s5008_s25  ;;  %3391 = vrot.lane.b32.xlu1 %v10174_v33, %s5009_s26  ;;  %v8897_v61 = vpop.f32.mrb[37].mxu0 }
 0x4eb   : > { %4814 = vmatmul.mubr.msk.f32.gmra.mrb[28].mxu1 %vm4037_vm5, %v3682_v48  ;;  %v10179_v48 = vld [vmem:[#allocation117_spill] sm:$0xff] }
 0x4ec   : > { %v3180_v2 = vpop.permute.xlu0 %3179  ;;  %v3182_v59 = vpop.permute.xlu1 %3181 }
 0x4ed   : > { %v3617_v19 = vsel %vm3604_vm15, %v3584_v0, %v3180_v2  ;;  %v3618_v31 = vsel %vm3604_vm15, %v3585_v36, %v3182_v59  ;;  %v10181_v2 = vld [vmem:[#allocation155_spill] sm:$0xff] }
 0x4ee   : > { %3013 = vrot.lane.b32.xlu0 %v10173_v44, %s5005_s14  ;;  %3107 = vrot.lane.b32.xlu1 %v10174_v33, %s5006_s16  ;;  %v3457_v44 = vsel %vm1627_vm3, %v4985_v32, %v10179_v48  ;;  %v10180_v33 = vld [vmem:[#allocation83_spill] sm:$0xff] }
 0x4ef   : > { %v3489_v59 = vsel %vm1693_vm7, %v3457_v44, %v8367_v10 }
 0x4f0   : > { %v3276_v21 = vpop.permute.xlu0 %3275  ;;  %v2992_v25 = vpop.permute.xlu1 %2991  ;;  %v3521_v56 = vsel %vm1759_vm9, %v3489_v59, %v8495_v24  ;;  %v10187_v59 = vld [vmem:[#allocation85_spill] sm:$0xff] }
 0x4f1   : > { %v3650_v16 = vsel %vm3637_vm0, %v3617_v19, %v3276_v21  ;;  %v3553_v28 = vsel %vm1825_vm11, %v3521_v56, %v2992_v25  ;;  %v4986_v19 = vld [vmem:[#allocation3 + $0xb0] sm:$0xff] }
 0x4f2   : > { %3393 = vrot.lane.b32.xlu0 %v10176_v40, %s5009_s26  ;;  %3109 = vrot.lane.b32.xlu1 %v10176_v40, %s5006_s16 }
 0x4f4   : > { %v3278_v1 = vpop.permute.xlu0 %3277  ;;  %v3372_v51 = vpop.permute.xlu1 %3371 }
 0x4f5   : > { %v3683_v62 = vsel %vm3670_vm1, %v3650_v16, %v3372_v51  ;;  %v3651_v3 = vsel %vm3637_vm0, %v3618_v31, %v3278_v1  ;;  %v10182_v16 = vld [vmem:[#allocation120_spill] sm:$0xff]  ;;  %v10183_v1 = vld [vmem:[#allocation135_spill] sm:$0xff] }
 0x4f6   : > { %3203 = vrot.lane.b32.xlu0 %v8860_v17, %s5007_s22  ;;  %2919 = vrot.lane.b32.xlu1 %v8860_v17, %s5003_s21  ;;  %v3458_v25 = vsel %vm1627_vm3, %v4986_v19, %v10182_v16  ;;  %v10190_v16 = vld [vmem:[#allocation159_spill] sm:$0xff] }
 0x4f7   : > { %4816 = vmatprep.mubr.msk.f32.mxu1 %vm4037_vm5, %v3683_v62  ;;  %v3490_v51 = vsel %vm1693_vm7, %v3458_v25, %v8369_v18  ;;  %v2435_v25 = vld [vmem:[#allocation3 + $0x180] sm:$0xff] }
 0x4f8   : > { %v2994_v6 = vpop.permute.xlu0 %2993  ;;  %v3088_v55 = vpop.permute.xlu1 %3087  ;;  %v3522_v62 = vsel %vm1759_vm9, %v3490_v51, %v8497_v34 }
 0x4f9   : > { %v3586_v21 = vsel %vm3571_vm14, %v3553_v28, %v3088_v55  ;;  %v3554_v11 = vsel %vm1825_vm11, %v3522_v62, %v2994_v6  ;;  %v10184_v6 = vld [vmem:[#allocation113_spill] sm:$0xff] }
 0x4fa   : > { %3205 = vrot.lane.b32.xlu0 %v8873_v43, %s5007_s22  ;;  %3299 = vrot.lane.b32.xlu1 %v10178_v58, %s5008_s25 }
 0x4fc   : > { %v3374_v39 = vpop.permute.xlu0 %3373  ;;  %v3090_v63 = vpop.permute.xlu1 %3089 }
 0x4fd   : > { %v3684_v5 = vsel %vm3670_vm1, %v3651_v3, %v3374_v39  ;;  %v3587_v60 = vsel %vm3571_vm14, %v3554_v11, %v3090_v63  ;;  %v8939_v39 = vpop.f32.mrb[38].mxu0  ;;  %v10185_v63 = vld [vmem:[#allocation134_spill] sm:$0xff] }
 0x4fe   : > { %2921 = vrot.lane.b32.xlu0 %v8873_v43, %s5003_s21  ;;  %3015 = vrot.lane.b32.xlu1 %v10178_v58, %s5005_s14  ;;  %v8932_v58 = vld [vmem:[#allocation3 + $0x170] sm:$0xff] }
 0x4ff   : > { %4817 = vmatmul.mubr.msk.f32.gmra.mrb[30].mxu1 %vm4037_vm5, %v3684_v5  ;;  %v3459_v5 = vsel %vm1627_vm3, %v8555_v54, %v10185_v63 }
 0x500   : > { %v3184_v26 = vpop.permute.xlu0 %3183  ;;  %v3186_v30 = vpop.permute.xlu1 %3185 }
 0x501   : > { %v3619_v7 = vsel %vm3604_vm15, %v3586_v21, %v3184_v26  ;;  %v3620_v18 = vsel %vm3604_vm15, %v3587_v60, %v3186_v30  ;;  %v3491_v26 = vsel %vm1693_vm7, %v3459_v5, %v8375_v35  ;;  %v8950_v30 = vpop.f32.mrb[39].mxu0  ;;  %v10188_v21 = vld [vmem:[#allocation137_spill] sm:$0xff]  ;;  %v2652_v60 = vrot.slane %v2435_v25, 1 }
 0x502   : > { %3301 = vrot.lane.b32.xlu0 %v10180_v33, %s5008_s25  ;;  %3395 = vrot.lane.b32.xlu1 %v10181_v2, %s5009_s26  ;;  %v3523_v32 = vsel %vm1759_vm9, %v3491_v26, %v8503_v27  ;;  %v10193_v26 = vld [vmem:[#allocation173_spill] sm:$0xff] }
 0x504   : > { %v3280_v47 = vpop.permute.xlu0 %3279  ;;  %v2996_v14 = vpop.permute.xlu1 %2995 }
 0x505   : > { %v3652_v10 = vsel %vm3637_vm0, %v3619_v7, %v3280_v47 }
 0x506   : > { %3017 = vrot.lane.b32.xlu0 %v10180_v33, %s5005_s14  ;;  %3111 = vrot.lane.b32.xlu1 %v10181_v2, %s5006_s16  ;;  %v3555_v33 = vsel %vm1825_vm11, %v3523_v32, %v2996_v14  ;;  %v10186_v2 = vld [vmem:[#allocation116_spill] sm:$0xff]  ;;  %v3460_v14 = vsel %vm1627_vm3, %v8559_v13, %v10188_v21 }
 0x507   : > { %v3492_v7 = vsel %vm1693_vm7, %v3460_v14, %v8377_v46 }
 0x508   : > { %v3282_v0 = vpop.permute.xlu0 %3281  ;;  %v3376_v40 = vpop.permute.xlu1 %3375 }
 0x509   : > { %v3685_v24 = vsel %vm3670_vm1, %v3652_v10, %v3376_v40  ;;  %v3653_v55 = vsel %vm3637_vm0, %v3620_v18, %v3282_v0  ;;  %v10189_v10 = vld [vmem:[#allocation169_spill] sm:$0xff] }
 0x50a   : > { %3397 = vrot.lane.b32.xlu0 %v10183_v1, %s5009_s26  ;;  %3113 = vrot.lane.b32.xlu1 %v10183_v1, %s5006_s16  ;;  %v3524_v0 = vsel %vm1759_vm9, %v3492_v7, %v10189_v10  ;;  %v2436_v1 = vld [vmem:[#allocation3 + $0x188] sm:$0xff]  ;;  %v10194_v7 = vld [vmem:[#allocation162_spill] sm:$0xff] }
 0x50b   : > { %4819 = vmatprep.mubr.msk.f32.mxu1 %vm4037_vm5, %v3685_v24  ;;  %v3462_v10 = vsel %vm1627_vm3, %v8607_v45, %v10194_v7 }
 0x50c   : > { %v2998_v38 = vpop.permute.xlu0 %2997  ;;  %v3092_v22 = vpop.permute.xlu1 %3091 }
 0x50d   : > { %v3588_v54 = vsel %vm3571_vm14, %v3555_v33, %v3092_v22  ;;  %v3556_v19 = vsel %vm1825_vm11, %v3524_v0, %v2998_v38  ;;  %v2653_v38 = vrot.slane %v2436_v1, 1  ;;  %v10195_v0 = vld [vmem:[#allocation25_spill] sm:$0xff] }
 0x50e   : > { %3207 = vrot.lane.b32.xlu0 %v8923_v52, %s5007_s22  ;;  %2923 = vrot.lane.b32.xlu1 %v8923_v52, %s5003_s21 }
 0x510   : > { %v3378_v50 = vpop.permute.xlu0 %3377  ;;  %v3094_v34 = vpop.permute.xlu1 %3093 }
 0x511   : > { %v3686_v36 = vsel %vm3670_vm1, %v3653_v55, %v3378_v50  ;;  %v3589_v13 = vsel %vm3571_vm14, %v3556_v19, %v3094_v34  ;;  %v2654_v50 = vsel %vm639_vm2, %v2652_v60, %v2653_v38  ;;  %v8988_v34 = vpop.f32.mrb[40].mxu0  ;;  %v10196_v19 = vld [vmem:[#allocation93_spill] sm:$0xff] }
 0x512   : > { %3209 = vrot.lane.b32.xlu0 %v8932_v58, %s5007_s22  ;;  %3303 = vrot.lane.b32.xlu1 %v10184_v6, %s5008_s25  ;;  %v8997_v5 = vpop.f32.mrb[41].mxu0 }
 0x513   : > { %4820 = vmatmul.mubr.msk.f32.gmra.mrb[0].mxu1 %vm4037_vm5, %v3686_v36  ;;  %v10191_v36 = vld [vmem:[#allocation158_spill] sm:$0xff] }
 0x514   : > { %v3188_v31 = vpop.permute.xlu0 %3187  ;;  %v3190_v3 = vpop.permute.xlu1 %3189 }
 0x515   : > { %v3621_v56 = vsel %vm3604_vm15, %v3588_v54, %v3188_v31  ;;  %v3622_v46 = vsel %vm3604_vm15, %v3589_v13, %v3190_v3  ;;  %v2437_v31 = vld [vmem:[#allocation3 + $0x190] sm:$0x3]  ;;  %v10192_v3 = vld [vmem:[#allocation22_spill] sm:$0xff] }
 0x516   : > { %2925 = vrot.lane.b32.xlu0 %v8932_v58, %s5003_s21  ;;  %3019 = vrot.lane.b32.xlu1 %v10184_v6, %s5005_s14  ;;  %v3461_v6 = vsel %vm1627_vm3, %v8603_v23, %v10191_v36  ;;  %v2655_v23 = vrot.slane %v2437_v31, 1 }
 0x517   : > { %v3493_v63 = vsel %vm1693_vm7, %v3461_v6, %v10192_v3 }
 0x518   : > { %v3284_v48 = vpop.permute.xlu0 %3283  ;;  %v3000_v44 = vpop.permute.xlu1 %2999  ;;  %v3525_v32 = vsel %vm1759_vm9, %v3493_v63, %v10193_v26  ;;  %v2656_v14 = vsel %vm639_vm2, %v2653_v38, %v2655_v23  ;;  %v2438_v38 = vld [vmem:[#allocation3 + $0x198] sm:$0xff]  ;;  %v10197_v26 = vld [vmem:[#allocation87_spill] sm:$0xff] }
 0x519   : > { %v3654_v35 = vsel %vm3637_vm0, %v3621_v56, %v3284_v48  ;;  %v3557_v54 = vsel %vm1825_vm11, %v3525_v32, %v3000_v44  ;;  %v3463_v32 = vsel %vm1627_vm3, %v8651_v15, %v10197_v26 }
 0x51a   : > { %3305 = vrot.lane.b32.xlu0 %v10186_v2, %s5008_s25  ;;  %3399 = vrot.lane.b32.xlu1 %v10187_v59, %s5009_s26 }
 0x51c   : > { %v3286_v47 = vpop.permute.xlu0 %3285  ;;  %v3380_v28 = vpop.permute.xlu1 %3379 }
 0x51d   : > { %v3687_v27 = vsel %vm3670_vm1, %v3654_v35, %v3380_v28  ;;  %v3655_v51 = vsel %vm3637_vm0, %v3622_v46, %v3286_v47  ;;  %v2660_v46 = vrot.slane %v2437_v31, 2  ;;  %v9031_v31 = vpop.f32.mrb[42].mxu0 }
 0x51e   : > { %3021 = vrot.lane.b32.xlu0 %v10186_v2, %s5005_s14  ;;  %3115 = vrot.lane.b32.xlu1 %v10187_v59, %s5006_s16  ;;  %v2657_v2 = vrot.slane %v2435_v25, 2  ;;  %v2658_v59 = vrot.slane %v2436_v1, 2 }
 0x51f   : > { %4822 = vmatprep.mubr.msk.f32.mxu1 %vm4037_vm5, %v3687_v27 }
 0x520   : > { %v3002_v40 = vpop.permute.xlu0 %3001  ;;  %v3096_v24 = vpop.permute.xlu1 %3095  ;;  %v2659_v44 = vsel %vm720_vm4, %v2657_v2, %v2658_v59  ;;  %v2670_v2 = vrot.slane %v2438_v38, 2 }
 0x521   : > { %v3590_v56 = vsel %vm3571_vm14, %v3557_v54, %v3096_v24  ;;  %v3494_v24 = vsel %vm1693_vm7, %v3462_v10, %v10195_v0 }
 0x522   : > { %3401 = vrot.lane.b32.xlu0 %v10190_v16, %s5009_s26  ;;  %3117 = vrot.lane.b32.xlu1 %v10190_v16, %s5006_s16  ;;  %v3526_v13 = vsel %vm1759_vm9, %v3494_v24, %v10196_v19 }
 0x524   : > { %v3382_v62 = vpop.permute.xlu0 %3381  ;;  %v3098_v22 = vpop.permute.xlu1 %3097 }
 0x525   : > { %v3688_v11 = vsel %vm3670_vm1, %v3655_v51, %v3382_v62 }
 0x526   : > { %3211 = vrot.lane.b32.xlu0 %v2435_v25, %s5007_s22  ;;  %2927 = vrot.lane.b32.xlu1 %v2435_v25, %s5003_s21 }
 0x527   : > { %4823 = vmatmul.mubr.msk.f32.gmra.mrb[2].mxu1 %vm4037_vm5, %v3688_v11 }
 0x528   : > { %v3192_v18 = vpop.permute.xlu0 %3191  ;;  %v3194_v55 = vpop.permute.xlu1 %3193 }
 0x529   : > { %v3623_v35 = vsel %vm3604_vm15, %v3590_v56, %v3192_v18  ;;  %v2439_v18 = vld [vmem:[#allocation3 + $0x1a0] sm:$0xff] }
 0x52a   : > { %3213 = vrot.lane.b32.xlu0 %v2436_v1, %s5007_s22  ;;  %3307 = vrot.lane.b32.xlu1 %v2654_v50, %s5008_s25  ;;  %v2666_v6 = vrot.slane %v2439_v18, 1 }
 0x52c   : > { %v3288_v48 = vpop.permute.xlu0 %3287  ;;  %v3004_v33 = vpop.permute.xlu1 %3003 }
 0x52d   : > { %v3656_v47 = vsel %vm3637_vm0, %v3623_v35, %v3288_v48  ;;  %v10198_v48 = vld [vmem:[#allocation138_spill] sm:$0xff] }
 0x52e   : > { %2929 = vrot.lane.b32.xlu0 %v2436_v1, %s5003_s21  ;;  %3023 = vrot.lane.b32.xlu1 %v2654_v50, %s5005_s14  ;;  %v3558_v1 = vsel %vm1825_vm11, %v3526_v13, %v3002_v40  ;;  %v2440_v50 = vld [vmem:[#allocation3 + $0x1a8] sm:$0x3]  ;;  %v2661_v40 = vsel %vm720_vm4, %v2658_v59, %v2660_v46  ;;  %v3495_v54 = vsel %vm1693_vm7, %v3463_v32, %v10198_v48  ;;  %v2671_v59 = vrot.slane %v2439_v18, 2 }
 0x52f   : > { %v3591_v51 = vsel %vm3571_vm14, %v3558_v1, %v3098_v22  ;;  %v2665_v22 = vrot.slane %v2438_v38, 1  ;;  %v2673_v35 = vrot.slane %v2440_v50, 2  ;;  %v10200_v46 = vld [vmem:[#allocation167_spill] sm:$0xff] }
 0x530   : > { %v3290_v28 = vpop.permute.xlu0 %3289  ;;  %v3384_v27 = vpop.permute.xlu1 %3383  ;;  %v3624_v45 = vsel %vm3604_vm15, %v3591_v51, %v3194_v55  ;;  %v2668_v55 = vrot.slane %v2440_v50, 1  ;;  %v2672_v0 = vsel %vm720_vm4, %v2670_v2, %v2671_v59  ;;  %v10201_v51 = vld [vmem:[#allocation141_spill] sm:$0xff] }
 0x531   : > { %v3689_v21 = vsel %vm3670_vm1, %v3656_v47, %v3384_v27  ;;  %v3657_v62 = vsel %vm3637_vm0, %v3624_v45, %v3290_v28  ;;  %v2667_v23 = vsel %vm639_vm2, %v2665_v22, %v2666_v6  ;;  %v9042_v47 = vpop.f32.mrb[43].mxu0  ;;  %v10199_v28 = vld [vmem:[#allocation177_spill] sm:$0xff]  ;;  %v2674_v24 = vsel %vm720_vm4, %v2671_v59, %v2673_v35 }
 0x532   : > { %3309 = vrot.lane.b32.xlu0 %v2656_v14, %s5008_s25  ;;  %3403 = vrot.lane.b32.xlu1 %v2659_v44, %s5009_s26  ;;  %v2669_v56 = vsel %vm639_vm2, %v2666_v6, %v2668_v55  ;;  %v3527_v27 = vsel %vm1759_vm9, %v3495_v54, %v10199_v28  ;;  %v9050_v7 = vpop.f32.mrb[44].mxu0  ;;  %v10205_v59 = vld [vmem:[#allocation29_spill] sm:$0xff] }
 0x533   : > { %4825 = vmatprep.mubr.msk.f32.mxu1 %vm4037_vm5, %v3689_v21  ;;  %v9073_v32 = vpop.f32.mrb[45].mxu0 }
 0x534   : > { %v3006_v16 = vpop.permute.xlu0 %3005  ;;  %v3100_v25 = vpop.permute.xlu1 %3099 }
 0x536   : > { %3025 = vrot.lane.b32.xlu0 %v2656_v14, %s5005_s14  ;;  %3119 = vrot.lane.b32.xlu1 %v2659_v44, %s5006_s16  ;;  %v3559_v14 = vsel %vm1825_vm11, %v3527_v27, %v3004_v33 }
 0x537   : > { %v3592_v44 = vsel %vm3571_vm14, %v3559_v14, %v3100_v25  ;;  %v3464_v25 = vsel %vm1627_vm3, %v8655_v29, %v10200_v46  ;;  %v10208_v46 = vld [vmem:[#allocation33_spill] sm:$0xff] }
 0x538   : > { %v3386_v11 = vpop.permute.xlu0 %3385  ;;  %v3102_v60 = vpop.permute.xlu1 %3101  ;;  %v3496_v45 = vsel %vm1693_vm7, %v3464_v25, %v10201_v51 }
 0x539   : > { %v3690_v36 = vsel %vm3670_vm1, %v3657_v62, %v3386_v11  ;;  %v10202_v62 = vld [vmem:[#allocation96_spill] sm:$0xff] }
 0x53a   : > { %3405 = vrot.lane.b32.xlu0 %v2661_v40, %s5009_s26  ;;  %3121 = vrot.lane.b32.xlu1 %v2661_v40, %s5006_s16  ;;  %v3528_v11 = vsel %vm1759_vm9, %v3496_v45, %v10202_v62 }
 0x53b   : > { %4826 = vmatmul.mubr.msk.f32.gmra.mrb[4].mxu1 %vm4037_vm5, %v3690_v36  ;;  %v3560_v50 = vsel %vm1825_vm11, %v3528_v11, %v3006_v16  ;;  %v10203_v16 = vld [vmem:[#allocation90_spill] sm:$0xff] }
 0x53c   : > { %v3196_v3 = vpop.permute.xlu0 %3195  ;;  %v3198_v63 = vpop.permute.xlu1 %3197  ;;  %v3593_v36 = vsel %vm3571_vm14, %v3560_v50, %v3102_v60  ;;  %v3465_v60 = vsel %vm1627_vm3, %v8699_v12, %v10203_v16 }
 0x53d   : > { %v3625_v10 = vsel %vm3604_vm15, %v3592_v44, %v3196_v3  ;;  %v3626_v29 = vsel %vm3604_vm15, %v3593_v36, %v3198_v63  ;;  %v10204_v63 = vld [vmem:[#allocation165_spill] sm:$0xff] }
 0x53e   : > { %3215 = vrot.lane.b32.xlu0 %v2438_v38, %s5007_s22  ;;  %3217 = vrot.lane.b32.xlu1 %v2439_v18, %s5007_s22  ;;  %v3497_v2 = vsel %vm1693_vm7, %v3465_v60, %v10204_v63 }
 0x540   : > { %v3292_v15 = vpop.permute.xlu0 %3291  ;;  %v3008_v21 = vpop.permute.xlu1 %3007 }
 0x541   : > { %v3658_v19 = vsel %vm3637_vm0, %v3625_v10, %v3292_v15 }
 0x542   : > { %3311 = vrot.lane.b32.xlu0 %v2667_v23, %s5008_s25  ;;  %3313 = vrot.lane.b32.xlu1 %v2669_v56, %s5008_s25  ;;  %v3529_v23 = vsel %vm1759_vm9, %v3497_v2, %v10205_v59 }
 0x543   : > { %v3561_v28 = vsel %vm1825_vm11, %v3529_v23, %v3008_v21 }
 0x544   : > { %v3294_v13 = vpop.permute.xlu0 %3293  ;;  %v3388_v1 = vpop.permute.xlu1 %3387 }
 0x545   : > { %v3691_v33 = vsel %vm3670_vm1, %v3658_v19, %v3388_v1  ;;  %v3659_v40 = vsel %vm3637_vm0, %v3626_v29, %v3294_v13  ;;  %v10206_v13 = vld [vmem:[#allocation119_spill] sm:$0xff] }
 0x546   : > { %3407 = vrot.lane.b32.xlu0 %v2672_v0, %s5009_s26  ;;  %3409 = vrot.lane.b32.xlu1 %v2674_v24, %s5009_s26  ;;  %v3466_v1 = vsel %vm1627_vm3, %v8703_v41, %v10206_v13 }
 0x547   : > { %4828 = vmatprep.mubr.msk.f32.mxu1 %vm4037_vm5, %v3691_v33 }
 0x548   : > { %v3010_v38 = vpop.permute.xlu0 %3009  ;;  %v3104_v18 = vpop.permute.xlu1 %3103 }
 0x549   : > { %v3594_v27 = vsel %vm3571_vm14, %v3561_v28, %v3104_v18 }
 0x54c   : > { %v3390_v22 = vpop.permute.xlu0 %3389  ;;  %v3106_v6 = vpop.permute.xlu1 %3105 }
 0x54d   : > { %v3692_v55 = vsel %vm3670_vm1, %v3659_v40, %v3390_v22 }
 0x54e   : > { %4829 = vmatmul.mubr.msk.f32.gmra.mrb[6].mxu1 %vm4037_vm5, %v3692_v55 }
 0x550   : > { %v3200_v3 = vpop.permute.xlu0 %3199  ;;  %v2916_v26 = vpop.permute.xlu1 %2915 }
 0x551   : > { %v3627_v15 = vsel %vm3604_vm15, %v3594_v27, %v3200_v3  ;;  %v10209_v3 = vld [vmem:[#allocation121_spill] sm:$0xff] }
 0x554   : > { %v3202_v48 = vpop.permute.xlu0 %3201  ;;  %v3296_v54 = vpop.permute.xlu1 %3295 }
 0x555   : > { %v3660_v10 = vsel %vm3637_vm0, %v3627_v15, %v3296_v54 }
 0x558   : > { %v2918_v56 = vpop.permute.xlu0 %2917  ;;  %v3012_v35 = vpop.permute.xlu1 %3011 }
 0x55a   : > { %v4800_v12 = vpop.f32.mrb[18].mxu1 }
 0x55b   : > { %v4206_v14 = vadd.f32 %v4800_v12, %v8783_v42  ;;  %v4200_v44 = vpop.f32.mrb[19].mxu1  ;;  %v10207_v42 = vld [vmem:[#allocation170_spill] sm:$0xff] }
 0x55c   : > { %v4201_v21 = vadd.f32 %v4200_v44, %v8793_v8  ;;  %v3298_v0 = vpop.permute.xlu0 %3297  ;;  %v3392_v24 = vpop.permute.xlu1 %3391  ;;  %v3498_v33 = vsel %vm1693_vm7, %v3466_v1, %v10207_v42 }
 0x55d   : > { %4360 = vst.msk [vmem:[%s9089_s29 + $0x8] sm:$0xff] %vm1627_vm3, %v4206_v14  ;;  %v3693_v19 = vsel %vm3670_vm1, %v3660_v10, %v3392_v24  ;;  %v3530_v8 = vsel %vm1759_vm9, %v3498_v33, %v10208_v46  ;;  %v10211_v14 = vld [vmem:[#allocation136_spill] sm:$0xff] }
 0x55e   : > { %4359 = vst.msk [vmem:[%s9089_s29] sm:$0xff] %vm1627_vm3, %v4201_v21  ;;  %4831 = vmatprep.mubr.msk.f32.mxu1 %vm4037_vm5, %v3693_v19  ;;  %v3562_v45 = vsel %vm1825_vm11, %v3530_v8, %v3010_v38  ;;  %v3467_v38 = vsel %vm1627_vm3, %v8747_v53, %v10209_v3 }
 0x55f   : > { %v3595_v62 = vsel %vm3571_vm14, %v3562_v45, %v3106_v6 }
 0x560   : > { %v3014_v25 = vpop.permute.xlu0 %3013  ;;  %v3108_v51 = vpop.permute.xlu1 %3107  ;;  %v3628_v11 = vsel %vm3604_vm15, %v3595_v62, %v3202_v48  ;;  %v10210_v48 = vld [vmem:[#allocation91_spill] sm:$0xff] }
 0x561   : > { %v3661_v41 = vsel %vm3637_vm0, %v3628_v11, %v3298_v0  ;;  %v3499_v54 = vsel %vm1693_vm7, %v3467_v38, %v10210_v48 }
 0x562   : > { %v3531_v63 = vsel %vm1759_vm9, %v3499_v54, %v2916_v26  ;;  %v10215_v54 = vld [vmem:[#allocation161_spill] sm:$0xff] }
 0x563   : > { %v3563_v28 = vsel %vm1825_vm11, %v3531_v63, %v3012_v35  ;;  %v10212_v35 = vld [vmem:[#allocation174_spill] sm:$0xff] }
 0x564   : > { %v3394_v18 = vpop.permute.xlu0 %3393  ;;  %v3110_v50 = vpop.permute.xlu1 %3109  ;;  %v3596_v27 = vsel %vm3571_vm14, %v3563_v28, %v3108_v51 }
 0x565   : > { %v3694_v36 = vsel %vm3670_vm1, %v3661_v41, %v3394_v18  ;;  %v10213_v41 = vld [vmem:[#allocation139_spill] sm:$0xff] }
 0x566   : > { %4832 = vmatmul.mubr.msk.f32.gmra.mrb[8].mxu1 %vm4037_vm5, %v3694_v36  ;;  %v3469_v18 = vsel %vm1627_vm3, %v8799_v37, %v10213_v41 }
 0x568   : > { %v3204_v29 = vpop.permute.xlu0 %3203  ;;  %v2920_v40 = vpop.permute.xlu1 %2919 }
 0x569   : > { %v3629_v53 = vsel %vm3604_vm15, %v3596_v27, %v3204_v29 }
 0x56c   : > { %v3206_v22 = vpop.permute.xlu0 %3205  ;;  %v3300_v55 = vpop.permute.xlu1 %3299 }
 0x56d   : > { %v3662_v12 = vsel %vm3637_vm0, %v3629_v53, %v3300_v55 }
 0x56e   : > { %v4803_v6 = vpop.f32.mrb[20].mxu1 }
 0x56f   : > { %v4216_v16 = vadd.f32 %v4803_v6, %v8835_v57  ;;  %v4210_v60 = vpop.f32.mrb[21].mxu1 }
 0x570   : > { %v4211_v2 = vadd.f32 %v4210_v60, %v8845_v9  ;;  %v2922_v59 = vpop.permute.xlu0 %2921  ;;  %v3016_v23 = vpop.permute.xlu1 %3015  ;;  %v3468_v9 = vsel %vm1627_vm3, %v8751_v20, %v10211_v14 }
 0x571   : > { %4362 = vst.msk [vmem:[%s9089_s29 + $0x18] sm:$0xff] %vm1627_vm3, %v4216_v16  ;;  %v3500_v44 = vsel %vm1693_vm7, %v3468_v9, %v10212_v35  ;;  %v3470_v16 = vsel %vm1627_vm3, %v8810_v49, %v10215_v54  ;;  %v10221_v54 = vld [vmem:[#allocation171_spill] sm:$0xff] }
 0x572   : > { %4361 = vst.msk [vmem:[%s9089_s29 + $0x10] sm:$0xff] %vm1627_vm3, %v4211_v2  ;;  %v3532_v10 = vsel %vm1759_vm9, %v3500_v44, %v2918_v56 }
 0x573   : > { %v3564_v24 = vsel %vm1825_vm11, %v3532_v10, %v3014_v25 }
 0x574   : > { %v3302_v57 = vpop.permute.xlu0 %3301  ;;  %v3396_v15 = vpop.permute.xlu1 %3395  ;;  %v3597_v19 = vsel %vm3571_vm14, %v3564_v24, %v3110_v50  ;;  %v10214_v50 = vld [vmem:[#allocation94_spill] sm:$0xff] }
 0x575   : > { %v3695_v26 = vsel %vm3670_vm1, %v3662_v12, %v3396_v15  ;;  %v3630_v13 = vsel %vm3604_vm15, %v3597_v19, %v3206_v22  ;;  %v3501_v36 = vsel %vm1693_vm7, %v3469_v18, %v10214_v50  ;;  %v10218_v19 = vld [vmem:[#allocation24_spill] sm:$0xff] }
 0x576   : > { %4834 = vmatprep.mubr.msk.f32.mxu1 %vm4037_vm5, %v3695_v26  ;;  %v3663_v1 = vsel %vm3637_vm0, %v3630_v13, %v3302_v57  ;;  %v3533_v29 = vsel %vm1759_vm9, %v3501_v36, %v2920_v40  ;;  %v10216_v40 = vld [vmem:[#allocation178_spill] sm:$0xff] }
 0x577   : > { %v3565_v55 = vsel %vm1825_vm11, %v3533_v29, %v3016_v23  ;;  %v3502_v60 = vsel %vm1693_vm7, %v3470_v16, %v10216_v40  ;;  %v10222_v16 = vld [vmem:[#allocation92_spill] sm:$0xff] }
 0x578   : > { %v3018_v21 = vpop.permute.xlu0 %3017  ;;  %v3112_v0 = vpop.permute.xlu1 %3111  ;;  %v3534_v63 = vsel %vm1759_vm9, %v3502_v60, %v2922_v59  ;;  %v10223_v40 = vld [vmem:[#allocation140_spill] sm:$0xff] }
 0x579   : > { %v3566_v28 = vsel %vm1825_vm11, %v3534_v63, %v3018_v21  ;;  %v10224_v63 = vld [vmem:[#allocation64_spill] sm:$0xff] }
 0x57c   : > { %v3398_v20 = vpop.permute.xlu0 %3397  ;;  %v3114_v42 = vpop.permute.xlu1 %3113 }
 0x57d   : > { %v3696_v33 = vsel %vm3670_vm1, %v3663_v1, %v3398_v20  ;;  %v3599_v27 = vsel %vm3571_vm14, %v3566_v28, %v3114_v42 }
 0x57e   : > { %4835 = vmatmul.mubr.msk.f32.gmra.mrb[10].mxu1 %vm4037_vm5, %v3696_v33 }
 0x580   : > { %v3208_v46 = vpop.permute.xlu0 %3207  ;;  %v2924_v56 = vpop.permute.xlu1 %2923 }
 0x582   : > { %v4806_v8 = vpop.f32.mrb[22].mxu1 }
 0x583   : > { %v4226_v51 = vadd.f32 %v4806_v8, %v8887_v4  ;;  %v4220_v25 = vpop.f32.mrb[23].mxu1 }
 0x584   : > { %v4221_v45 = vadd.f32 %v4220_v25, %v8897_v61  ;;  %v3210_v62 = vpop.permute.xlu0 %3209  ;;  %v3304_v11 = vpop.permute.xlu1 %3303  ;;  %v3598_v61 = vsel %vm3571_vm14, %v3565_v55, %v3112_v0  ;;  %v10217_v0 = vld [vmem:[#allocation166_spill] sm:$0xff] }
 0x585   : > { %4364 = vst.msk [vmem:[%s9089_s29 + $0x28] sm:$0xff] %vm1627_vm3, %v4226_v51  ;;  %v3631_v3 = vsel %vm3604_vm15, %v3598_v61, %v3208_v46  ;;  %v3632_v53 = vsel %vm3604_vm15, %v3599_v27, %v3210_v62  ;;  %v3471_v24 = vsel %vm1627_vm3, %v8860_v17, %v10217_v0  ;;  %v10219_v17 = vld [vmem:[#allocation89_spill] sm:$0xff] }
 0x586   : > { %4363 = vst.msk [vmem:[%s9089_s29 + $0x20] sm:$0xff] %vm1627_vm3, %v4221_v45  ;;  %v3664_v38 = vsel %vm3637_vm0, %v3631_v3, %v3304_v11  ;;  %v3503_v13 = vsel %vm1693_vm7, %v3471_v24, %v10218_v19  ;;  %v3472_v45 = vsel %vm1627_vm3, %v8873_v43, %v10219_v17 }
 0x588   : > { %v2926_v22 = vpop.permute.xlu0 %2925  ;;  %v3020_v4 = vpop.permute.xlu1 %3019 }
 0x58c   : > { %v3306_v6 = vpop.permute.xlu0 %3305  ;;  %v3400_v48 = vpop.permute.xlu1 %3399 }
 0x58d   : > { %v3697_v37 = vsel %vm3670_vm1, %v3664_v38, %v3400_v48  ;;  %v3665_v12 = vsel %vm3637_vm0, %v3632_v53, %v3306_v6 }
 0x58e   : > { %4837 = vmatprep.mubr.msk.f32.mxu1 %vm4037_vm5, %v3697_v37 }
 0x590   : > { %v3022_v2 = vpop.permute.xlu0 %3021  ;;  %v3116_v23 = vpop.permute.xlu1 %3115 }
 0x594   : > { %v3402_v49 = vpop.permute.xlu0 %3401  ;;  %v3118_v57 = vpop.permute.xlu1 %3117 }
 0x595   : > { %v3698_v15 = vsel %vm3670_vm1, %v3665_v12, %v3402_v49 }
 0x596   : > { %v4809_v26 = vpop.f32.mrb[24].mxu1  ;;  %4838 = vmatmul.mubr.msk.f32.gmra.mrb[12].mxu1 %vm4037_vm5, %v3698_v15 }
 0x597   : > { %v4236_v59 = vadd.f32 %v4809_v26, %v8939_v39  ;;  %v4230_v14 = vpop.f32.mrb[25].mxu1  ;;  %v3535_v39 = vsel %vm1759_vm9, %v3503_v13, %v2924_v56  ;;  %v10220_v56 = vld [vmem:[#allocation26_spill] sm:$0xff] }
 0x598   : > { %v4231_v9 = vadd.f32 %v4230_v14, %v8950_v30  ;;  %v3212_v35 = vpop.permute.xlu0 %3211  ;;  %v2928_v44 = vpop.permute.xlu1 %2927  ;;  %v3567_v30 = vsel %vm1825_vm11, %v3535_v39, %v3020_v4  ;;  %v3504_v62 = vsel %vm1693_vm7, %v3472_v45, %v10220_v56 }
 0x599   : > { %4366 = vst.msk [vmem:[%s9089_s29 + $0x38] sm:$0xff] %vm1627_vm3, %v4236_v59  ;;  %v3600_v42 = vsel %vm3571_vm14, %v3567_v30, %v3116_v23  ;;  %v3536_v11 = vsel %vm1759_vm9, %v3504_v62, %v2926_v22 }
 0x59a   : > { %4365 = vst.msk [vmem:[%s9089_s29 + $0x30] sm:$0xff] %vm1627_vm3, %v4231_v9  ;;  %v3633_v33 = vsel %vm3604_vm15, %v3600_v42, %v3212_v35  ;;  %v3568_v50 = vsel %vm1825_vm11, %v3536_v11, %v3022_v2 }
 0x59b   : > { %v3601_v36 = vsel %vm3571_vm14, %v3568_v50, %v3118_v57 }
 0x59c   : > { %v3214_v10 = vpop.permute.xlu0 %3213  ;;  %v3308_v21 = vpop.permute.xlu1 %3307 }
 0x59d   : > { %v3666_v46 = vsel %vm3637_vm0, %v3633_v33, %v3308_v21  ;;  %v3634_v4 = vsel %vm3604_vm15, %v3601_v36, %v3214_v10 }
 0x5a0   : > { %v2930_v1 = vpop.permute.xlu0 %2929  ;;  %v3024_v20 = vpop.permute.xlu1 %3023 }
 0x5a4   : > { %v3310_v8 = vpop.permute.xlu0 %3309  ;;  %v3404_v51 = vpop.permute.xlu1 %3403 }
 0x5a5   : > { %v3699_v25 = vsel %vm3670_vm1, %v3666_v46, %v3404_v51  ;;  %v3667_v61 = vsel %vm3637_vm0, %v3634_v4, %v3310_v8 }
 0x5a6   : > { %4840 = vmatprep.mubr.msk.f32.mxu1 %vm4037_vm5, %v3699_v25 }
 0x5a8   : > { %v3026_v41 = vpop.permute.xlu0 %3025  ;;  %v3120_v18 = vpop.permute.xlu1 %3119 }
 0x5aa   : > { %v4812_v29 = vpop.f32.mrb[26].mxu1 }
 0x5ab   : > { %v4246_v43 = vadd.f32 %v4812_v29, %v8988_v34  ;;  %v4240_v55 = vpop.f32.mrb[27].mxu1  ;;  %v3473_v34 = vsel %vm1627_vm3, %v8923_v52, %v10221_v54 }
 0x5ac   : > { %v4241_v3 = vadd.f32 %v4240_v55, %v8997_v5  ;;  %v3406_v38 = vpop.permute.xlu0 %3405  ;;  %v3122_v6 = vpop.permute.xlu1 %3121  ;;  %v3474_v5 = vsel %vm1627_vm3, %v8932_v58, %v10222_v16  ;;  %v3505_v60 = vsel %vm1693_vm7, %v3473_v34, %v10223_v40 }
 0x5ad   : > { %4368 = vst.msk [vmem:[%s9089_s29 + $0x48] sm:$0xff] %vm1627_vm3, %v4246_v43  ;;  %v3700_v22 = vsel %vm3670_vm1, %v3667_v61, %v3406_v38  ;;  %v3506_v2 = vsel %vm1693_vm7, %v3474_v5, %v10224_v63  ;;  %v3537_v23 = vsel %vm1759_vm9, %v3505_v60, %v2928_v44 }
 0x5ae   : > { %4367 = vst.msk [vmem:[%s9089_s29 + $0x40] sm:$0xff] %vm1627_vm3, %v4241_v3  ;;  %4841 = vmatmul.mubr.msk.f32.gmra.mrb[14].mxu1 %vm4037_vm5, %v3700_v22  ;;  %v3538_v28 = vsel %vm1759_vm9, %v3506_v2, %v2930_v1  ;;  %v3569_v12 = vsel %vm1825_vm11, %v3537_v23, %v3024_v20 }
 0x5af   : > { %v3570_v52 = vsel %vm1825_vm11, %v3538_v28, %v3026_v41  ;;  %v3602_v49 = vsel %vm3571_vm14, %v3569_v12, %v3120_v18 }
 0x5b0   : > { %v3216_v48 = vpop.permute.xlu0 %3215  ;;  %v3218_v37 = vpop.permute.xlu1 %3217  ;;  %v3603_v58 = vsel %vm3571_vm14, %v3570_v52, %v3122_v6 }
 0x5b1   : > { %v3635_v57 = vsel %vm3604_vm15, %v3602_v49, %v3216_v48  ;;  %v3636_v15 = vsel %vm3604_vm15, %v3603_v58, %v3218_v37 }
 0x5b4   : > { %v3312_v27 = vpop.permute.xlu0 %3311  ;;  %v3314_v53 = vpop.permute.xlu1 %3313 }
 0x5b5   : > { %v3668_v26 = vsel %vm3637_vm0, %v3635_v57, %v3312_v27  ;;  %v3669_v59 = vsel %vm3637_vm0, %v3636_v15, %v3314_v53 }
 0x5b8   : > { %v3408_v14 = vpop.permute.xlu0 %3407  ;;  %v3410_v9 = vpop.permute.xlu1 %3409 }
 0x5b9   : > { %v3701_v35 = vsel %vm3670_vm1, %v3668_v26, %v3408_v14  ;;  %v3702_v44 = vsel %vm3670_vm1, %v3669_v59, %v3410_v9 }
 0x5ba   : > { %4843 = vmatprep.mubr.msk.f32.mxu1 %vm4037_vm5, %v3701_v35 }
 0x5bb   : > { %4844 = vmatmul.mubr.msk.f32.gmra.mrb[16].mxu1 %vm4037_vm5, %v3702_v44 }
 0x5be   : > { %v4815_v10 = vpop.f32.mrb[28].mxu1 }
 0x5bf   : > { %v4256_v21 = vadd.f32 %v4815_v10, %v9031_v31  ;;  %v4250_v0 = vpop.f32.mrb[29].mxu1 }
 0x5c0   : > { %v4251_v24 = vadd.f32 %v4250_v0, %v9042_v47 }
 0x5c1   : > { %4370 = vst.msk [vmem:[%s9089_s29 + $0x58] sm:$0xff] %vm1627_vm3, %v4256_v21 }
 0x5c2   : > { %4369 = vst.msk [vmem:[%s9089_s29 + $0x50] sm:$0xff] %vm1627_vm3, %v4251_v24 }
 0x5d2   : > { %v4818_v19 = vpop.f32.mrb[30].mxu1 }
 0x5d3   : > { %v4266_v13 = vadd.f32 %v4818_v19, %v9050_v7  ;;  %v4260_v39 = vpop.f32.mrb[31].mxu1 }
 0x5d4   : > { %v4261_v1 = vadd.f32 %v4260_v39, %v9073_v32 }
 0x5d5   : > { %4372 = vst.msk [vmem:[%s9089_s29 + $0x68] sm:$0xff] %vm1627_vm3, %v4266_v13 }
 0x5d6   : > { %4371 = vst.msk [vmem:[%s9089_s29 + $0x60] sm:$0xff] %vm1627_vm3, %v4261_v1 }
 0x5e6   : > { %v4821_v31 = vpop.f32.mrb[0].mxu1 }
 0x5e7   : > { %4374 = vst.msk [vmem:[%s9089_s29 + $0x78] sm:$0xff] %vm1627_vm3, %v4821_v31  ;;  %v4270_v47 = vpop.f32.mrb[1].mxu1 }
 0x5e8   : > { %4373 = vst.msk [vmem:[%s9089_s29 + $0x70] sm:$0xff] %vm1627_vm3, %v4270_v47 }
 0x5fa   : > { %v4824_v20 = vpop.f32.mrb[2].mxu1 }
 0x5fb   : > { %4376 = vst.msk [vmem:[%s9089_s29 + $0x88] sm:$0xff] %vm1627_vm3, %v4824_v20  ;;  %v4280_v7 = vpop.f32.mrb[3].mxu1 }
 0x5fc   : > { %4375 = vst.msk [vmem:[%s9089_s29 + $0x80] sm:$0xff] %vm1627_vm3, %v4280_v7 }
 0x60e   : > { %v4827_v32 = vpop.f32.mrb[4].mxu1 }
 0x60f   : > { %4378 = vst.msk [vmem:[%s9089_s29 + $0x98] sm:$0xff] %vm1627_vm3, %v4827_v32  ;;  %v4290_v30 = vpop.f32.mrb[5].mxu1 }
 0x610   : > { %4377 = vst.msk [vmem:[%s9089_s29 + $0x90] sm:$0xff] %vm1627_vm3, %v4290_v30 }
 0x621   : > { %v4830_v42 = vpop.f32.mrb[6].mxu1 }
 0x622   : > { %4380 = vst.msk [vmem:[%s9089_s29 + $0xa8] sm:$0xff] %vm1627_vm3, %v4830_v42  ;;  %v4300_v33 = vpop.f32.mrb[7].mxu1 }
 0x623   : > { %4379 = vst.msk [vmem:[%s9089_s29 + $0xa0] sm:$0xff] %vm1627_vm3, %v4300_v33 }
 0x639   : > { %v4833_v46 = vpop.f32.mrb[8].mxu1 }
 0x63a   : > { %4382 = vst.msk [vmem:[%s9089_s29 + $0xb8] sm:$0xff] %vm1627_vm3, %v4833_v46  ;;  %v4310_v8 = vpop.f32.mrb[9].mxu1 }
 0x63b   : > { %4381 = vst.msk [vmem:[%s9089_s29 + $0xb0] sm:$0xff] %vm1627_vm3, %v4310_v8 }
 0x651   : > { %v4836_v51 = vpop.f32.mrb[10].mxu1 }
 0x652   : > { %4384 = vst.msk [vmem:[%s9089_s29 + $0xc8] sm:$0xff] %vm1627_vm3, %v4836_v51  ;;  %v4320_v25 = vpop.f32.mrb[11].mxu1 }
 0x653   : > { %4383 = vst.msk [vmem:[%s9089_s29 + $0xc0] sm:$0xff] %vm1627_vm3, %v4320_v25 }
 0x669   : > { %v4839_v17 = vpop.f32.mrb[12].mxu1 }
 0x66a   : > { %4386 = vst.msk [vmem:[%s9089_s29 + $0xd8] sm:$0xff] %vm1627_vm3, %v4839_v17  ;;  %v4330_v45 = vpop.f32.mrb[13].mxu1 }
 0x66b   : > { %4385 = vst.msk [vmem:[%s9089_s29 + $0xd0] sm:$0xff] %vm1627_vm3, %v4330_v45 }
 0x681   : > { %v4842_v56 = vpop.f32.mrb[14].mxu1 }
 0x682   : > { %4388 = vst.msk [vmem:[%s9089_s29 + $0xe8] sm:$0xff] %vm1627_vm3, %v4842_v56  ;;  %v4340_v62 = vpop.f32.mrb[15].mxu1 }
 0x683   : > { %4387 = vst.msk [vmem:[%s9089_s29 + $0xe0] sm:$0xff] %vm1627_vm3, %v4340_v62 }
 0x68e   : > { %v4845_v11 = vpop.f32.mrb[16].mxu1 }
 0x68f   : > { %4390 = vst.msk [vmem:[%s9089_s29 + $0xf8] sm:$0xff] %vm1627_vm3, %v4845_v11  ;;  %v4350_v41 = vpop.f32.mrb[17].mxu1 }
 0x690   : > { %4389 = vst.msk [vmem:[%s9089_s29 + $0xf0] sm:$0xff] %vm1627_vm3, %v4350_v41 }
 0x691 PF: > { %s18_s27 = sadd.s32 1, %s4995_s27  }
 0x692   : > { %p15_p4 = scmp.ge.s32.totalorder %s18_s27, 4  }
 0x694   :  { %17 = sbr.rel (!%p15_p4) target bundleno = 1 (0x1), region = 84 }

</bundles_post_ra>
